<compile_context>
chip_gen: v7x
topology: tpu7x:2x2x1
jax: 0.10.0
libtpu: 0.0.40
codegen_flags: <defaults>
</compile_context>

<pallas_src>
import functools
import numpy as np

import jax
import jax.numpy as jnp
from jax.experimental import pallas as pl
from jax.experimental.pallas import tpu as pltpu


# ----------------------------------------------------------------------------
# Small helpers for tile selection
# ----------------------------------------------------------------------------
def _round_up(x, m):
    return (x + m - 1) // m * m


def _pick_tile(size, candidates):
    for c in candidates:
        if size % c == 0:
            return c
    return size


def _lane_dense_2d(total):
    """Pick a lane-dense 2-D view (rows, lanes) with lanes a multiple of 128."""
    for lanes in (2048, 1024, 512, 256, 128):
        if total % lanes == 0:
            return total // lanes, lanes
    return 1, total


def _pick_row_tile(rows):
    for t in (512, 256, 128, 64, 32, 16, 8):
        if rows % t == 0:
            return t
    return rows


# ----------------------------------------------------------------------------
# Pallas kernels
# ----------------------------------------------------------------------------
def _matmul_bias_kernel(a_ref, b_ref, bias_ref, o_ref, acc_ref, *, relu):
    # bf16 operands on the MXU, f32 accumulation in a VMEM scratch.
    @pl.when(pl.program_id(2) == 0)
    def _():
        acc_ref[...] = jnp.zeros_like(acc_ref)

    acc_ref[...] += jnp.dot(a_ref[...], b_ref[...],
                            preferred_element_type=jnp.float32)

    @pl.when(pl.program_id(2) == pl.num_programs(2) - 1)
    def _():
        out = acc_ref[...] + bias_ref[...]          # f32 epilogue
        if relu:
            out = jnp.maximum(out, 0.0)
        o_ref[...] = out.astype(o_ref.dtype)


def matmul_bias(a, b, bias, relu=False):
    """(M,K) @ (K,N) + bias[N], optional fused ReLU.

    bf16 MXU operands, f32 accumulation, M/N/K tiling with padded edges,
    N/K padded to lane-dense multiples of 128.
    """
    M, K = a.shape
    Kb, N = b.shape
    assert K == Kb
    a = a.astype(jnp.bfloat16)
    b = b.astype(jnp.bfloat16)
    bias = bias.astype(jnp.float32)

    K_pad = _round_up(K, 128)
    N_pad = _round_up(N, 128)
    tk = _pick_tile(K_pad, (512, 256, 128))
    tn = _pick_tile(N_pad, (512, 256, 128))
    if M <= 512:
        tm = _round_up(M, 8)
        M_pad = tm
    else:
        tm = 512
        M_pad = _round_up(M, tm)

    a_p = jnp.pad(a, ((0, M_pad - M), (0, K_pad - K)))
    b_p = jnp.pad(b, ((0, K_pad - K), (0, N_pad - N)))
    bias_p = jnp.pad(bias, ((0, N_pad - N),)).reshape(1, N_pad)

    grid = (M_pad // tm, N_pad // tn, K_pad // tk)
    out = pl.pallas_call(
        functools.partial(_matmul_bias_kernel, relu=relu),
        out_shape=jax.ShapeDtypeStruct((M_pad, N_pad), jnp.float32),
        grid=grid,
        in_specs=[
            pl.BlockSpec((tm, tk), lambda i, j, k: (i, k)),
            pl.BlockSpec((tk, tn), lambda i, j, k: (k, j)),
            pl.BlockSpec((1, tn), lambda i, j, k: (0, j)),
        ],
        out_specs=pl.BlockSpec((tm, tn), lambda i, j, k: (i, j)),
        scratch_shapes=[pltpu.VMEM((tm, tn), jnp.float32)],
        compiler_params=pltpu.CompilerParams(
            dimension_semantics=("parallel", "parallel", "arbitrary"),
            vmem_limit_bytes=48 * 1024 * 1024,
        ),
    )(a_p, b_p, bias_p)
    return out[:M, :N]


def _add_relu_kernel(x_ref, y_ref, o_ref):
    o_ref[...] = jnp.maximum(x_ref[...] + y_ref[...], 0.0)


def add_relu(x, y):
    """Elementwise residual add + ReLU on a lane-dense, row-tiled 2-D view."""
    shape = x.shape
    total = int(np.prod(shape))
    rows, lanes = _lane_dense_2d(total)
    x2 = x.astype(jnp.float32).reshape(rows, lanes)
    y2 = y.astype(jnp.float32).reshape(rows, lanes)
    tr = _pick_row_tile(rows)
    out = pl.pallas_call(
        _add_relu_kernel,
        out_shape=jax.ShapeDtypeStruct((rows, lanes), jnp.float32),
        grid=(rows // tr,),
        in_specs=[
            pl.BlockSpec((tr, lanes), lambda i: (i, 0)),
            pl.BlockSpec((tr, lanes), lambda i: (i, 0)),
        ],
        out_specs=pl.BlockSpec((tr, lanes), lambda i: (i, 0)),
        compiler_params=pltpu.CompilerParams(dimension_semantics=("parallel",)),
    )(x2, y2)
    return out.reshape(shape)


def _max_reduce_kernel(x_ref, o_ref, acc_ref):
    t = pl.program_id(1)

    @pl.when(t == 0)
    def _():
        acc_ref[...] = jnp.full(acc_ref.shape, -jnp.inf, acc_ref.dtype)

    acc_ref[...] = jnp.maximum(acc_ref[...], x_ref[0])

    @pl.when(t == pl.num_programs(1) - 1)
    def _():
        o_ref[...] = acc_ref[...]


def _attn_pool_kernel(q_ref, k_ref, v_ref, o_ref, *, scale):
    # One grid step handles all heads of one batch element.
    q = q_ref[0]                                    # (heads, 1, dh)  bf16
    k = k_ref[0]                                    # (heads, L, dh)  bf16
    v = v_ref[0]                                    # (heads, L, dh)  bf16
    s = jnp.einsum('hqd,hkd->hqk', q, k,
                   preferred_element_type=jnp.float32) * scale   # f32 (heads,1,L)
    s = s - jnp.max(s, axis=-1, keepdims=True)
    p = jnp.exp(s)
    p = p * pl.reciprocal(jnp.sum(p, axis=-1, keepdims=True), approx=True)
    o = jnp.einsum('hqk,hkd->hqd', p.astype(v.dtype), v,
                   preferred_element_type=jnp.float32)           # (heads,1,dh)
    o_ref[0] = o


def _l2norm_kernel(x_ref, o_ref):
    x = x_ref[...]
    inv = jax.lax.rsqrt(jnp.sum(x * x, axis=-1, keepdims=True) + 1e-12)
    o_ref[...] = x * inv


# ----------------------------------------------------------------------------
# Conv / pooling glue (patch extraction in plain JAX, compute in Pallas)
# ----------------------------------------------------------------------------
def _im2col(x, kh, kw, stride, pad):
    N, H, W, C = x.shape
    if kh == 1 and kw == 1 and pad == 0:
        xs = x[:, ::stride, ::stride, :]
        Ho, Wo = xs.shape[1], xs.shape[2]
        return xs.reshape(N * Ho * Wo, C), Ho, Wo
    xp = jnp.pad(x, ((0, 0), (pad, pad), (pad, pad), (0, 0)))
    Ho = (H + 2 * pad - kh) // stride + 1
    Wo = (W + 2 * pad - kw) // stride + 1
    cols = []
    for i in range(kh):
        for j in range(kw):
            cols.append(xp[:, i:i + stride * Ho:stride, j:j + stride * Wo:stride, :])
    patches = jnp.stack(cols, axis=3)               # (N, Ho, Wo, kh*kw, C)
    return patches.reshape(N * Ho * Wo, kh * kw * C), Ho, Wo


def conv_bn(x, wmat, b, k, stride, pad, relu):
    """Conv2d (bias-free) + folded eval-mode BatchNorm (+ optional ReLU)."""
    # TODO(synk): im2col patches for k>1 are still materialized in HBM (kh*kw
    # amplification, though in bf16); full fusion of the tap loop into the
    # matmul grid (Element-offset index maps / manual DMA) is not implemented.
    N = x.shape[0]
    patches, Ho, Wo = _im2col(x.astype(jnp.bfloat16), k, k, stride, pad)
    out = matmul_bias(patches, wmat, b, relu=relu)
    return out.reshape(N, Ho, Wo, -1)


def maxpool3x3s2(x):
    N, H, W, C = x.shape
    xf = x.astype(jnp.float32)
    xp = jnp.pad(xf, ((0, 0), (1, 1), (1, 1), (0, 0)),
                 constant_values=-jnp.inf)
    Ho = (H + 2 - 3) // 2 + 1
    Wo = (W + 2 - 3) // 2 + 1
    taps = []
    for i in range(3):
        for j in range(3):
            taps.append(xp[:, i:i + 2 * Ho:2, j:j + 2 * Wo:2, :])
    total = N * Ho * Wo * C
    rows, lanes = _lane_dense_2d(total)
    stacked = jnp.stack(taps, axis=0).reshape(9, rows, lanes)
    tr = _pick_row_tile(rows)
    out = pl.pallas_call(
        _max_reduce_kernel,
        out_shape=jax.ShapeDtypeStruct((rows, lanes), jnp.float32),
        grid=(rows // tr, 9),
        in_specs=[pl.BlockSpec((1, tr, lanes), lambda i, t: (t, i, 0))],
        out_specs=pl.BlockSpec((tr, lanes), lambda i, t: (i, 0)),
        scratch_shapes=[pltpu.VMEM((tr, lanes), jnp.float32)],
        compiler_params=pltpu.CompilerParams(
            dimension_semantics=("parallel", "arbitrary")),
    )(stacked)
    return out.reshape(N, Ho, Wo, C)


# ----------------------------------------------------------------------------
# Model blocks
# ----------------------------------------------------------------------------
def bottleneck(x, p, stride):
    identity = x
    out = conv_bn(x, *p['c1'], k=1, stride=1, pad=0, relu=True)
    out = conv_bn(out, *p['c2'], k=3, stride=stride, pad=1, relu=True)
    out = conv_bn(out, *p['c3'], k=1, stride=1, pad=0, relu=False)
    if 'down' in p:
        identity = conv_bn(x, *p['down'], k=1, stride=stride, pad=0, relu=False)
    return add_relu(out, identity)


def attention_pool(x_nhwc, ap, heads):
    """CLIP AttentionPool2d: query = mean token, single-query MHA, c_proj."""
    N, H, W, C = x_nhwc.shape
    L0 = H * W
    tok = x_nhwc.reshape(N, L0, C)
    mean_tok = jnp.mean(tok, axis=1, keepdims=True)
    tok = jnp.concatenate([mean_tok, tok], axis=1)           # (N, L, C)
    tok = tok + ap['pos'][None]
    L = L0 + 1

    (Wq, bq), (Wk, bk), (Wv, bv), (Wc, bc) = ap['q'], ap['k'], ap['v'], ap['c']
    q = matmul_bias(tok[:, 0, :], Wq.T, bq)                   # (N, C)
    kf = matmul_bias(tok.reshape(N * L, C), Wk.T, bk)         # (N*L, C)
    vf = matmul_bias(tok.reshape(N * L, C), Wv.T, bv)         # (N*L, C)

    dh = C // heads
    qh = q.reshape(N, heads, 1, dh).astype(jnp.bfloat16)
    kh = kf.reshape(N, L, heads, dh).transpose(0, 2, 1, 3).astype(jnp.bfloat16)
    vh = vf.reshape(N, L, heads, dh).transpose(0, 2, 1, 3).astype(jnp.bfloat16)

    o = pl.pallas_call(
        functools.partial(_attn_pool_kernel, scale=1.0 / float(np.sqrt(dh))),
        out_shape=jax.ShapeDtypeStruct((N, heads, 1, dh), jnp.float32),
        grid=(N,),
        in_specs=[
            pl.BlockSpec((1, heads, 1, dh), lambda i: (i, 0, 0, 0)),
            pl.BlockSpec((1, heads, L, dh), lambda i: (i, 0, 0, 0)),
            pl.BlockSpec((1, heads, L, dh), lambda i: (i, 0, 0, 0)),
        ],
        out_specs=pl.BlockSpec((1, heads, 1, dh), lambda i: (i, 0, 0, 0)),
        compiler_params=pltpu.CompilerParams(dimension_semantics=("parallel",)),
    )(qh, kh, vh)
    o = o.reshape(N, heads * dh)                              # concat heads
    return matmul_bias(o, Wc.T, bc)                           # (N, num_classes)


def image_encoder_attnpool_forward(x_nchw, params, *, heads, img_norm=True):
    # layout: input NCHW (PyTorch), converted once to NHWC.
    x = jnp.transpose(x_nchw.astype(jnp.float32), (0, 2, 3, 1))
    x = conv_bn(x, *params['conv1'], k=7, stride=2, pad=3, relu=True)
    x = maxpool3x3s2(x)
    for layer, stride in zip(params['layers'], (1, 2, 2, 2)):
        for bi, bp in enumerate(layer):
            x = bottleneck(x, bp, stride if bi == 0 else 1)
    # (layer3 output would be `local_features`; forward() only returns global_emb)
    g = attention_pool(x, params['attnpool'], heads)
    g = g.reshape(g.shape[0], -1)
    if img_norm:
        g = pl.pallas_call(
            _l2norm_kernel,
            out_shape=jax.ShapeDtypeStruct(g.shape, jnp.float32),
        )(g)
    return g


# ----------------------------------------------------------------------------
# Deterministic parameter construction
# ----------------------------------------------------------------------------
def _make_conv_bn(key, cin, cout, k):
    k1, k2, k3, k4, k5 = jax.random.split(key, 5)
    w = jax.random.normal(k1, (cout, cin, k, k), jnp.float32) / np.sqrt(cin * k * k)
    gamma = 1.0 + 0.1 * jax.random.normal(k2, (cout,), jnp.float32)
    beta = 0.1 * jax.random.normal(k3, (cout,), jnp.float32)
    mean = 0.1 * jax.random.normal(k4, (cout,), jnp.float32)
    var = jnp.abs(1.0 + 0.1 * jax.random.normal(k5, (cout,), jnp.float32))
    scale = gamma / jnp.sqrt(var + 1e-5)
    w_f = w * scale[:, None, None, None]
    b_f = beta - mean * scale
    wmat = jnp.transpose(w_f, (2, 3, 1, 0)).reshape(k * k * cin, cout)
    return wmat, b_f


def _make_linear(key, cin, cout):
    k1, k2 = jax.random.split(key)
    w = jax.random.normal(k1, (cout, cin), jnp.float32) / np.sqrt(cin)
    b = 0.01 * jax.random.normal(k2, (cout,), jnp.float32)
    return w, b


def build_params(key, width, num_classes, input_resolution, blocks=(1, 1, 1, 1)):
    keys = iter(jax.random.split(key, 256))
    params = {'conv1': _make_conv_bn(next(keys), 3, width, 7)}
    inplanes = width
    layers = []
    for planes_mult, nblocks in zip((1, 2, 4, 8), blocks):
        planes = width * planes_mult
        layer = []
        for bi in range(nblocks):
            s = (2 if planes_mult > 1 else 1) if bi == 0 else 1
            bp = {'c1': _make_conv_bn(next(keys), inplanes, planes, 1),
                  'c2': _make_conv_bn(next(keys), planes, planes, 3),
                  'c3': _make_conv_bn(next(keys), planes, planes * 4, 1)}
            if s != 1 or inplanes != planes * 4:
                bp['down'] = _make_conv_bn(next(keys), inplanes, planes * 4, 1)
            inplanes = planes * 4
            layer.append(bp)
        layers.append(layer)
    params['layers'] = layers

    embed_dim = width * 32
    spacial = input_resolution // 32
    params['attnpool'] = {
        'pos': jax.random.normal(next(keys), (spacial ** 2 + 1, embed_dim),
                                 jnp.float32) / np.sqrt(embed_dim),
        'q': _make_linear(next(keys), embed_dim, embed_dim),
        'k': _make_linear(next(keys), embed_dim, embed_dim),
        'v': _make_linear(next(keys), embed_dim, embed_dim),
        'c': _make_linear(next(keys), embed_dim, num_classes),
    }
    # NOTE: self.global_embedder exists in __init__ but is unused in forward().
    return params


# ----------------------------------------------------------------------------
if __name__ == "__main__":
    WIDTH = 4                  # scaled-down (resnet50 uses 64)
    NUM_CLASSES = 32
    HEADS = 4
    INPUT_RES = 64             # must be divisible by 32; spacial_dim = 2
    BATCH = 2

    key = jax.random.PRNGKey(0)
    k_params, k_input = jax.random.split(key)
    params = build_params(k_params, WIDTH, NUM_CLASSES, INPUT_RES)
    x = jax.random.normal(k_input, (BATCH, 3, INPUT_RES, INPUT_RES), jnp.float32)

    fwd = jax.jit(functools.partial(image_encoder_attnpool_forward,
                                    heads=HEADS, img_norm=True))
    out = fwd(x, params)
    out = jax.block_until_ready(out)

    assert out.shape == (BATCH, NUM_CLASSES), out.shape
    assert bool(jnp.all(jnp.isfinite(out)))
    # img_norm=True => rows are unit L2 norm
    norms = jnp.linalg.norm(out, axis=1)
    assert bool(jnp.all(jnp.abs(norms - 1.0) < 1e-4))
    print("KERNEL_OK")
</pallas_src>

<mosaic_0001>
module attributes {stable_mosaic.version = 11 : i64} {
  func.func @_matmul_bias_kernel(%arg0: i32, %arg1: i32, %arg2: i32, %arg3: memref<512x256xbf16, #tpu.memory_space<vmem>>, %arg4: memref<256x128xbf16, #tpu.memory_space<vmem>>, %arg5: memref<1x128xf32, #tpu.memory_space<vmem>>, %arg6: memref<512x128xf32, #tpu.memory_space<vmem>>, %arg7: memref<512x128xf32, #tpu.memory_space<vmem>>) attributes {dimension_semantics = [#tpu.dimension_semantics<parallel>, #tpu.dimension_semantics<parallel>, #tpu.dimension_semantics<arbitrary>], iteration_bounds = array<i64: 4, 1, 1>, scalar_prefetch = 0 : i64, scratch_operands = 1 : i64, tpu.core_type = #tpu.core_type<tc>, window_params = [{transform_indices = @transform_0, window_bounds = array<i64: 512, 256>}, {transform_indices = @transform_1, window_bounds = array<i64: 256, 128>}, {transform_indices = @transform_2, window_bounds = array<i64: 1, 128>}, {transform_indices = @transform_3, window_bounds = array<i64: 512, 128>}]} {
    %c0_i32 = arith.constant 0 : i32
    %0 = arith.cmpi eq, %arg2, %c0_i32 : i32
    %1 = arith.extui %0 : i1 to i32
    %c0_i32_0 = arith.constant 0 : i32
    %2 = arith.cmpi ne, %1, %c0_i32_0 : i32
    scf.if %2 {
      %cst_10 = arith.constant 0.000000e+00 : f32
      %12 = vector.broadcast %cst_10 : f32 to vector<512x128xf32>
      %c0_11 = arith.constant 0 : index
      %c0_12 = arith.constant 0 : index
      %13 = vector.load %arg7[%c0_11, %c0_12] : memref<512x128xf32, #tpu.memory_space<vmem>>, vector<512x128xf32>
      tpu.vector_store %arg7[%c0_11, %c0_12], %12 {strides = array<i32>} : memref<512x128xf32, #tpu.memory_space<vmem>>, vector<512x128xf32>,
    } else {
    }
    %c0 = arith.constant 0 : index
    %c0_1 = arith.constant 0 : index
    %3 = vector.load %arg7[%c0, %c0_1] : memref<512x128xf32, #tpu.memory_space<vmem>>, vector<512x128xf32>
    %c0_2 = arith.constant 0 : index
    %c0_3 = arith.constant 0 : index
    %4 = vector.load %arg3[%c0_2, %c0_3] : memref<512x256xbf16, #tpu.memory_space<vmem>>, vector<512x256xbf16>
    %c0_4 = arith.constant 0 : index
    %c0_5 = arith.constant 0 : index
    %5 = vector.load %arg4[%c0_4, %c0_5] : memref<256x128xbf16, #tpu.memory_space<vmem>>, vector<256x128xbf16>
    %cst = arith.constant dense<0.000000e+00> : vector<512x128xf32>
    %6 = tpu.matmul %4, %5, %cst {dimension_numbers = #tpu.dot_dimension_numbers<[1], [0], [0], [1], [0, 0, 1, 1], [], []>} : vector<512x256xbf16>, vector<256x128xbf16>, vector<512x128xf32> -> vector<512x128xf32>
    %7 = arith.addf %3, %6 : vector<512x128xf32>
    %c0_6 = arith.constant 0 : index
    %c0_7 = arith.constant 0 : index
    %8 = vector.load %arg7[%c0_6, %c0_7] : memref<512x128xf32, #tpu.memory_space<vmem>>, vector<512x128xf32>
    tpu.vector_store %arg7[%c0_6, %c0_7], %7 {strides = array<i32>} : memref<512x128xf32, #tpu.memory_space<vmem>>, vector<512x128xf32>,
    %c0_i32_8 = arith.constant 0 : i32
    %9 = arith.cmpi eq, %arg2, %c0_i32_8 : i32
    %10 = arith.extui %9 : i1 to i32
    %c0_i32_9 = arith.constant 0 : i32
    %11 = arith.cmpi ne, %10, %c0_i32_9 : i32
    scf.if %11 {
      %c0_10 = arith.constant 0 : index
      %c0_11 = arith.constant 0 : index
      %12 = vector.load %arg7[%c0_10, %c0_11] : memref<512x128xf32, #tpu.memory_space<vmem>>, vector<512x128xf32>
      %c0_12 = arith.constant 0 : index
      %c0_13 = arith.constant 0 : index
      %13 = vector.load %arg5[%c0_12, %c0_13] : memref<1x128xf32, #tpu.memory_space<vmem>>, vector<1x128xf32>
      %14 = vector.broadcast %13 : vector<1x128xf32> to vector<512x128xf32>
      %15 = arith.addf %12, %14 : vector<512x128xf32>
      %cst_14 = arith.constant 0.000000e+00 : f32
      %16 = vector.broadcast %cst_14 : f32 to vector<512x128xf32>
      %17 = arith.maximumf %15, %16 : vector<512x128xf32>
      %c0_15 = arith.constant 0 : index
      %c0_16 = arith.constant 0 : index
      %18 = vector.load %arg6[%c0_15, %c0_16] : memref<512x128xf32, #tpu.memory_space<vmem>>, vector<512x128xf32>
      tpu.vector_store %arg6[%c0_15, %c0_16], %17 {strides = array<i32>} : memref<512x128xf32, #tpu.memory_space<vmem>>, vector<512x128xf32>,
    } else {
    }
    return
  }
  func.func @transform_0(%arg0: i32, %arg1: i32, %arg2: i32) -> (i32, i32) {
    %c0_i32 = arith.constant 0 : i32
    return %arg0, %arg2 : i32, i32
  }
  func.func @transform_1(%arg0: i32, %arg1: i32, %arg2: i32) -> (i32, i32) {
    %c0_i32 = arith.constant 0 : i32
    return %arg2, %arg1 : i32, i32
  }
  func.func @transform_2(%arg0: i32, %arg1: i32, %arg2: i32) -> (i32, i32) {
    %c0_i32 = arith.constant 0 : i32
    %c0_i32_0 = arith.constant 0 : i32
    return %c0_i32, %arg1 : i32, i32
  }
  func.func @transform_3(%arg0: i32, %arg1: i32, %arg2: i32) -> (i32, i32) {
    %c0_i32 = arith.constant 0 : i32
    return %arg0, %arg1 : i32, i32
  }
}

module attributes {stable_mosaic.version = 11 : i64} {
  func.func @_max_reduce_kernel(%arg0: i32, %arg1: i32, %arg2: memref<1x1x2048xf32, #tpu.memory_space<vmem>>, %arg3: memref<1x2048xf32, #tpu.memory_space<vmem>>, %arg4: memref<1x2048xf32, #tpu.memory_space<vmem>>) attributes {dimension_semantics = [#tpu.dimension_semantics<parallel>, #tpu.dimension_semantics<arbitrary>], iteration_bounds = array<i64: 1, 9>, scalar_prefetch = 0 : i64, scratch_operands = 1 : i64, tpu.core_type = #tpu.core_type<tc>, window_params = [{transform_indices = @transform_0, window_bounds = array<i64: 1, 1, 2048>}, {transform_indices = @transform_1, window_bounds = array<i64: 1, 2048>}]} {
    %c0_i32 = arith.constant 0 : i32
    %0 = arith.cmpi eq, %arg1, %c0_i32 : i32
    %1 = arith.extui %0 : i1 to i32
    %c0_i32_0 = arith.constant 0 : i32
    %2 = arith.cmpi ne, %1, %c0_i32_0 : i32
    scf.if %2 {
      %cst = arith.constant 0xFF800000 : f32
      %11 = vector.broadcast %cst : f32 to vector<1x2048xf32>
      %c0_8 = arith.constant 0 : index
      %c0_9 = arith.constant 0 : index
      %12 = vector.load %arg4[%c0_8, %c0_9] : memref<1x2048xf32, #tpu.memory_space<vmem>>, vector<1x2048xf32>
      tpu.vector_store %arg4[%c0_8, %c0_9], %11 {strides = array<i32>} : memref<1x2048xf32, #tpu.memory_space<vmem>>, vector<1x2048xf32>,
    } else {
    }
    %c0 = arith.constant 0 : index
    %c0_1 = arith.constant 0 : index
    %3 = vector.load %arg4[%c0, %c0_1] : memref<1x2048xf32, #tpu.memory_space<vmem>>, vector<1x2048xf32>
    %c0_2 = arith.constant 0 : index
    %c0_3 = arith.constant 0 : index
    %c0_4 = arith.constant 0 : index
    %4 = vector.load %arg2[%c0_2, %c0_3, %c0_4] : memref<1x1x2048xf32, #tpu.memory_space<vmem>>, vector<1x1x2048xf32>
    %5 = vector.shape_cast %4 : vector<1x1x2048xf32> to vector<1x2048xf32>
    %6 = arith.maximumf %3, %5 : vector<1x2048xf32>
    %c0_5 = arith.constant 0 : index
    %c0_6 = arith.constant 0 : index
    %7 = vector.load %arg4[%c0_5, %c0_6] : memref<1x2048xf32, #tpu.memory_space<vmem>>, vector<1x2048xf32>
    tpu.vector_store %arg4[%c0_5, %c0_6], %6 {strides = array<i32>} : memref<1x2048xf32, #tpu.memory_space<vmem>>, vector<1x2048xf32>,
    %c8_i32 = arith.constant 8 : i32
    %8 = arith.cmpi eq, %arg1, %c8_i32 : i32
    %9 = arith.extui %8 : i1 to i32
    %c0_i32_7 = arith.constant 0 : i32
    %10 = arith.cmpi ne, %9, %c0_i32_7 : i32
    scf.if %10 {
      %c0_8 = arith.constant 0 : index
      %c0_9 = arith.constant 0 : index
      %11 = vector.load %arg4[%c0_8, %c0_9] : memref<1x2048xf32, #tpu.memory_space<vmem>>, vector<1x2048xf32>
      %c0_10 = arith.constant 0 : index
      %c0_11 = arith.constant 0 : index
      %12 = vector.load %arg3[%c0_10, %c0_11] : memref<1x2048xf32, #tpu.memory_space<vmem>>, vector<1x2048xf32>
      tpu.vector_store %arg3[%c0_10, %c0_11], %11 {strides = array<i32>} : memref<1x2048xf32, #tpu.memory_space<vmem>>, vector<1x2048xf32>,
    } else {
    }
    return
  }
  func.func @transform_0(%arg0: i32, %arg1: i32) -> (i32, i32, i32) {
    %c0_i32 = arith.constant 0 : i32
    %c0_i32_0 = arith.constant 0 : i32
    return %arg1, %arg0, %c0_i32 : i32, i32, i32
  }
  func.func @transform_1(%arg0: i32, %arg1: i32) -> (i32, i32) {
    %c0_i32 = arith.constant 0 : i32
    %c0_i32_0 = arith.constant 0 : i32
    return %arg0, %c0_i32 : i32, i32
  }
}

module attributes {stable_mosaic.version = 11 : i64} {
  func.func @_matmul_bias_kernel(%arg0: i32, %arg1: i32, %arg2: i32, %arg3: memref<512x128xbf16, #tpu.memory_space<vmem>>, %arg4: memref<128x128xbf16, #tpu.memory_space<vmem>>, %arg5: memref<1x128xf32, #tpu.memory_space<vmem>>, %arg6: memref<512x128xf32, #tpu.memory_space<vmem>>, %arg7: memref<512x128xf32, #tpu.memory_space<vmem>>) attributes {dimension_semantics = [#tpu.dimension_semantics<parallel>, #tpu.dimension_semantics<parallel>, #tpu.dimension_semantics<arbitrary>], iteration_bounds = array<i64: 1, 1, 1>, scalar_prefetch = 0 : i64, scratch_operands = 1 : i64, tpu.core_type = #tpu.core_type<tc>, window_params = [{transform_indices = @transform_0, window_bounds = array<i64: 512, 128>}, {transform_indices = @transform_1, window_bounds = array<i64: 128, 128>}, {transform_indices = @transform_2, window_bounds = array<i64: 1, 128>}, {transform_indices = @transform_3, window_bounds = array<i64: 512, 128>}]} {
    %c0_i32 = arith.constant 0 : i32
    %0 = arith.cmpi eq, %arg2, %c0_i32 : i32
    %1 = arith.extui %0 : i1 to i32
    %c0_i32_0 = arith.constant 0 : i32
    %2 = arith.cmpi ne, %1, %c0_i32_0 : i32
    scf.if %2 {
      %cst_10 = arith.constant 0.000000e+00 : f32
      %12 = vector.broadcast %cst_10 : f32 to vector<512x128xf32>
      %c0_11 = arith.constant 0 : index
      %c0_12 = arith.constant 0 : index
      %13 = vector.load %arg7[%c0_11, %c0_12] : memref<512x128xf32, #tpu.memory_space<vmem>>, vector<512x128xf32>
      tpu.vector_store %arg7[%c0_11, %c0_12], %12 {strides = array<i32>} : memref<512x128xf32, #tpu.memory_space<vmem>>, vector<512x128xf32>,
    } else {
    }
    %c0 = arith.constant 0 : index
    %c0_1 = arith.constant 0 : index
    %3 = vector.load %arg7[%c0, %c0_1] : memref<512x128xf32, #tpu.memory_space<vmem>>, vector<512x128xf32>
    %c0_2 = arith.constant 0 : index
    %c0_3 = arith.constant 0 : index
    %4 = vector.load %arg3[%c0_2, %c0_3] : memref<512x128xbf16, #tpu.memory_space<vmem>>, vector<512x128xbf16>
    %c0_4 = arith.constant 0 : index
    %c0_5 = arith.constant 0 : index
    %5 = vector.load %arg4[%c0_4, %c0_5] : memref<128x128xbf16, #tpu.memory_space<vmem>>, vector<128x128xbf16>
    %cst = arith.constant dense<0.000000e+00> : vector<512x128xf32>
    %6 = tpu.matmul %4, %5, %cst {dimension_numbers = #tpu.dot_dimension_numbers<[1], [0], [0], [1], [0, 0, 1, 1], [], []>} : vector<512x128xbf16>, vector<128x128xbf16>, vector<512x128xf32> -> vector<512x128xf32>
    %7 = arith.addf %3, %6 : vector<512x128xf32>
    %c0_6 = arith.constant 0 : index
    %c0_7 = arith.constant 0 : index
    %8 = vector.load %arg7[%c0_6, %c0_7] : memref<512x128xf32, #tpu.memory_space<vmem>>, vector<512x128xf32>
    tpu.vector_store %arg7[%c0_6, %c0_7], %7 {strides = array<i32>} : memref<512x128xf32, #tpu.memory_space<vmem>>, vector<512x128xf32>,
    %c0_i32_8 = arith.constant 0 : i32
    %9 = arith.cmpi eq, %arg2, %c0_i32_8 : i32
    %10 = arith.extui %9 : i1 to i32
    %c0_i32_9 = arith.constant 0 : i32
    %11 = arith.cmpi ne, %10, %c0_i32_9 : i32
    scf.if %11 {
      %c0_10 = arith.constant 0 : index
      %c0_11 = arith.constant 0 : index
      %12 = vector.load %arg7[%c0_10, %c0_11] : memref<512x128xf32, #tpu.memory_space<vmem>>, vector<512x128xf32>
      %c0_12 = arith.constant 0 : index
      %c0_13 = arith.constant 0 : index
      %13 = vector.load %arg5[%c0_12, %c0_13] : memref<1x128xf32, #tpu.memory_space<vmem>>, vector<1x128xf32>
      %14 = vector.broadcast %13 : vector<1x128xf32> to vector<512x128xf32>
      %15 = arith.addf %12, %14 : vector<512x128xf32>
      %cst_14 = arith.constant 0.000000e+00 : f32
      %16 = vector.broadcast %cst_14 : f32 to vector<512x128xf32>
      %17 = arith.maximumf %15, %16 : vector<512x128xf32>
      %c0_15 = arith.constant 0 : index
      %c0_16 = arith.constant 0 : index
      %18 = vector.load %arg6[%c0_15, %c0_16] : memref<512x128xf32, #tpu.memory_space<vmem>>, vector<512x128xf32>
      tpu.vector_store %arg6[%c0_15, %c0_16], %17 {strides = array<i32>} : memref<512x128xf32, #tpu.memory_space<vmem>>, vector<512x128xf32>,
    } else {
    }
    return
  }
  func.func @transform_0(%arg0: i32, %arg1: i32, %arg2: i32) -> (i32, i32) {
    %c0_i32 = arith.constant 0 : i32
    return %arg0, %arg2 : i32, i32
  }
  func.func @transform_1(%arg0: i32, %arg1: i32, %arg2: i32) -> (i32, i32) {
    %c0_i32 = arith.constant 0 : i32
    return %arg2, %arg1 : i32, i32
  }
  func.func @transform_2(%arg0: i32, %arg1: i32, %arg2: i32) -> (i32, i32) {
    %c0_i32 = arith.constant 0 : i32
    %c0_i32_0 = arith.constant 0 : i32
    return %c0_i32, %arg1 : i32, i32
  }
  func.func @transform_3(%arg0: i32, %arg1: i32, %arg2: i32) -> (i32, i32) {
    %c0_i32 = arith.constant 0 : i32
    return %arg0, %arg1 : i32, i32
  }
}

module attributes {stable_mosaic.version = 11 : i64} {
  func.func @_matmul_bias_kernel(%arg0: i32, %arg1: i32, %arg2: i32, %arg3: memref<512x128xbf16, #tpu.memory_space<vmem>>, %arg4: memref<128x128xbf16, #tpu.memory_space<vmem>>, %arg5: memref<1x128xf32, #tpu.memory_space<vmem>>, %arg6: memref<512x128xf32, #tpu.memory_space<vmem>>, %arg7: memref<512x128xf32, #tpu.memory_space<vmem>>) attributes {dimension_semantics = [#tpu.dimension_semantics<parallel>, #tpu.dimension_semantics<parallel>, #tpu.dimension_semantics<arbitrary>], iteration_bounds = array<i64: 1, 1, 1>, scalar_prefetch = 0 : i64, scratch_operands = 1 : i64, tpu.core_type = #tpu.core_type<tc>, window_params = [{transform_indices = @transform_0, window_bounds = array<i64: 512, 128>}, {transform_indices = @transform_1, window_bounds = array<i64: 128, 128>}, {transform_indices = @transform_2, window_bounds = array<i64: 1, 128>}, {transform_indices = @transform_3, window_bounds = array<i64: 512, 128>}]} {
    %c0_i32 = arith.constant 0 : i32
    %0 = arith.cmpi eq, %arg2, %c0_i32 : i32
    %1 = arith.extui %0 : i1 to i32
    %c0_i32_0 = arith.constant 0 : i32
    %2 = arith.cmpi ne, %1, %c0_i32_0 : i32
    scf.if %2 {
      %cst_10 = arith.constant 0.000000e+00 : f32
      %12 = vector.broadcast %cst_10 : f32 to vector<512x128xf32>
      %c0_11 = arith.constant 0 : index
      %c0_12 = arith.constant 0 : index
      %13 = vector.load %arg7[%c0_11, %c0_12] : memref<512x128xf32, #tpu.memory_space<vmem>>, vector<512x128xf32>
      tpu.vector_store %arg7[%c0_11, %c0_12], %12 {strides = array<i32>} : memref<512x128xf32, #tpu.memory_space<vmem>>, vector<512x128xf32>,
    } else {
    }
    %c0 = arith.constant 0 : index
    %c0_1 = arith.constant 0 : index
    %3 = vector.load %arg7[%c0, %c0_1] : memref<512x128xf32, #tpu.memory_space<vmem>>, vector<512x128xf32>
    %c0_2 = arith.constant 0 : index
    %c0_3 = arith.constant 0 : index
    %4 = vector.load %arg3[%c0_2, %c0_3] : memref<512x128xbf16, #tpu.memory_space<vmem>>, vector<512x128xbf16>
    %c0_4 = arith.constant 0 : index
    %c0_5 = arith.constant 0 : index
    %5 = vector.load %arg4[%c0_4, %c0_5] : memref<128x128xbf16, #tpu.memory_space<vmem>>, vector<128x128xbf16>
    %cst = arith.constant dense<0.000000e+00> : vector<512x128xf32>
    %6 = tpu.matmul %4, %5, %cst {dimension_numbers = #tpu.dot_dimension_numbers<[1], [0], [0], [1], [0, 0, 1, 1], [], []>} : vector<512x128xbf16>, vector<128x128xbf16>, vector<512x128xf32> -> vector<512x128xf32>
    %7 = arith.addf %3, %6 : vector<512x128xf32>
    %c0_6 = arith.constant 0 : index
    %c0_7 = arith.constant 0 : index
    %8 = vector.load %arg7[%c0_6, %c0_7] : memref<512x128xf32, #tpu.memory_space<vmem>>, vector<512x128xf32>
    tpu.vector_store %arg7[%c0_6, %c0_7], %7 {strides = array<i32>} : memref<512x128xf32, #tpu.memory_space<vmem>>, vector<512x128xf32>,
    %c0_i32_8 = arith.constant 0 : i32
    %9 = arith.cmpi eq, %arg2, %c0_i32_8 : i32
    %10 = arith.extui %9 : i1 to i32
    %c0_i32_9 = arith.constant 0 : i32
    %11 = arith.cmpi ne, %10, %c0_i32_9 : i32
    scf.if %11 {
      %c0_10 = arith.constant 0 : index
      %c0_11 = arith.constant 0 : index
      %12 = vector.load %arg7[%c0_10, %c0_11] : memref<512x128xf32, #tpu.memory_space<vmem>>, vector<512x128xf32>
      %c0_12 = arith.constant 0 : index
      %c0_13 = arith.constant 0 : index
      %13 = vector.load %arg5[%c0_12, %c0_13] : memref<1x128xf32, #tpu.memory_space<vmem>>, vector<1x128xf32>
      %14 = vector.broadcast %13 : vector<1x128xf32> to vector<512x128xf32>
      %15 = arith.addf %12, %14 : vector<512x128xf32>
      %c0_14 = arith.constant 0 : index
      %c0_15 = arith.constant 0 : index
      %16 = vector.load %arg6[%c0_14, %c0_15] : memref<512x128xf32, #tpu.memory_space<vmem>>, vector<512x128xf32>
      tpu.vector_store %arg6[%c0_14, %c0_15], %15 {strides = array<i32>} : memref<512x128xf32, #tpu.memory_space<vmem>>, vector<512x128xf32>,
    } else {
    }
    return
  }
  func.func @transform_0(%arg0: i32, %arg1: i32, %arg2: i32) -> (i32, i32) {
    %c0_i32 = arith.constant 0 : i32
    return %arg0, %arg2 : i32, i32
  }
  func.func @transform_1(%arg0: i32, %arg1: i32, %arg2: i32) -> (i32, i32) {
    %c0_i32 = arith.constant 0 : i32
    return %arg2, %arg1 : i32, i32
  }
  func.func @transform_2(%arg0: i32, %arg1: i32, %arg2: i32) -> (i32, i32) {
    %c0_i32 = arith.constant 0 : i32
    %c0_i32_0 = arith.constant 0 : i32
    return %c0_i32, %arg1 : i32, i32
  }
  func.func @transform_3(%arg0: i32, %arg1: i32, %arg2: i32) -> (i32, i32) {
    %c0_i32 = arith.constant 0 : i32
    return %arg0, %arg1 : i32, i32
  }
}

module attributes {stable_mosaic.version = 11 : i64} {
  func.func @_add_relu_kernel(%arg0: i32, %arg1: memref<4x2048xf32, #tpu.memory_space<vmem>>, %arg2: memref<4x2048xf32, #tpu.memory_space<vmem>>, %arg3: memref<4x2048xf32, #tpu.memory_space<vmem>>) attributes {dimension_semantics = [#tpu.dimension_semantics<parallel>], iteration_bounds = array<i64: 1>, scalar_prefetch = 0 : i64, scratch_operands = 0 : i64, tpu.core_type = #tpu.core_type<tc>, window_params = [{transform_indices = @transform_0, window_bounds = array<i64: 4, 2048>}, {transform_indices = @transform_1, window_bounds = array<i64: 4, 2048>}, {transform_indices = @transform_2, window_bounds = array<i64: 4, 2048>}]} {
    %c0 = arith.constant 0 : index
    %c0_0 = arith.constant 0 : index
    %0 = vector.load %arg1[%c0, %c0_0] : memref<4x2048xf32, #tpu.memory_space<vmem>>, vector<4x2048xf32>
    %c0_1 = arith.constant 0 : index
    %c0_2 = arith.constant 0 : index
    %1 = vector.load %arg2[%c0_1, %c0_2] : memref<4x2048xf32, #tpu.memory_space<vmem>>, vector<4x2048xf32>
    %2 = arith.addf %0, %1 : vector<4x2048xf32>
    %cst = arith.constant 0.000000e+00 : f32
    %3 = vector.broadcast %cst : f32 to vector<4x2048xf32>
    %4 = arith.maximumf %2, %3 : vector<4x2048xf32>
    %c0_3 = arith.constant 0 : index
    %c0_4 = arith.constant 0 : index
    %5 = vector.load %arg3[%c0_3, %c0_4] : memref<4x2048xf32, #tpu.memory_space<vmem>>, vector<4x2048xf32>
    tpu.vector_store %arg3[%c0_3, %c0_4], %4 {strides = array<i32>} : memref<4x2048xf32, #tpu.memory_space<vmem>>, vector<4x2048xf32>,
    return
  }
  func.func @transform_0(%arg0: i32) -> (i32, i32) {
    %c0_i32 = arith.constant 0 : i32
    %c0_i32_0 = arith.constant 0 : i32
    return %arg0, %c0_i32 : i32, i32
  }
  func.func @transform_1(%arg0: i32) -> (i32, i32) {
    %c0_i32 = arith.constant 0 : i32
    %c0_i32_0 = arith.constant 0 : i32
    return %arg0, %c0_i32 : i32, i32
  }
  func.func @transform_2(%arg0: i32) -> (i32, i32) {
    %c0_i32 = arith.constant 0 : i32
    %c0_i32_0 = arith.constant 0 : i32
    return %arg0, %c0_i32 : i32, i32
  }
}

module attributes {stable_mosaic.version = 11 : i64} {
  func.func @_matmul_bias_kernel(%arg0: i32, %arg1: i32, %arg2: i32, %arg3: memref<128x128xbf16, #tpu.memory_space<vmem>>, %arg4: memref<128x128xbf16, #tpu.memory_space<vmem>>, %arg5: memref<1x128xf32, #tpu.memory_space<vmem>>, %arg6: memref<128x128xf32, #tpu.memory_space<vmem>>, %arg7: memref<128x128xf32, #tpu.memory_space<vmem>>) attributes {dimension_semantics = [#tpu.dimension_semantics<parallel>, #tpu.dimension_semantics<parallel>, #tpu.dimension_semantics<arbitrary>], iteration_bounds = array<i64: 1, 1, 1>, scalar_prefetch = 0 : i64, scratch_operands = 1 : i64, tpu.core_type = #tpu.core_type<tc>, window_params = [{transform_indices = @transform_0, window_bounds = array<i64: 128, 128>}, {transform_indices = @transform_1, window_bounds = array<i64: 128, 128>}, {transform_indices = @transform_2, window_bounds = array<i64: 1, 128>}, {transform_indices = @transform_3, window_bounds = array<i64: 128, 128>}]} {
    %c0_i32 = arith.constant 0 : i32
    %0 = arith.cmpi eq, %arg2, %c0_i32 : i32
    %1 = arith.extui %0 : i1 to i32
    %c0_i32_0 = arith.constant 0 : i32
    %2 = arith.cmpi ne, %1, %c0_i32_0 : i32
    scf.if %2 {
      %cst_10 = arith.constant 0.000000e+00 : f32
      %12 = vector.broadcast %cst_10 : f32 to vector<128x128xf32>
      %c0_11 = arith.constant 0 : index
      %c0_12 = arith.constant 0 : index
      %13 = vector.load %arg7[%c0_11, %c0_12] : memref<128x128xf32, #tpu.memory_space<vmem>>, vector<128x128xf32>
      tpu.vector_store %arg7[%c0_11, %c0_12], %12 {strides = array<i32>} : memref<128x128xf32, #tpu.memory_space<vmem>>, vector<128x128xf32>,
    } else {
    }
    %c0 = arith.constant 0 : index
    %c0_1 = arith.constant 0 : index
    %3 = vector.load %arg7[%c0, %c0_1] : memref<128x128xf32, #tpu.memory_space<vmem>>, vector<128x128xf32>
    %c0_2 = arith.constant 0 : index
    %c0_3 = arith.constant 0 : index
    %4 = vector.load %arg3[%c0_2, %c0_3] : memref<128x128xbf16, #tpu.memory_space<vmem>>, vector<128x128xbf16>
    %c0_4 = arith.constant 0 : index
    %c0_5 = arith.constant 0 : index
    %5 = vector.load %arg4[%c0_4, %c0_5] : memref<128x128xbf16, #tpu.memory_space<vmem>>, vector<128x128xbf16>
    %cst = arith.constant dense<0.000000e+00> : vector<128x128xf32>
    %6 = tpu.matmul %4, %5, %cst {dimension_numbers = #tpu.dot_dimension_numbers<[1], [0], [0], [1], [0, 0, 1, 1], [], []>} : vector<128x128xbf16>, vector<128x128xbf16>, vector<128x128xf32> -> vector<128x128xf32>
    %7 = arith.addf %3, %6 : vector<128x128xf32>
    %c0_6 = arith.constant 0 : index
    %c0_7 = arith.constant 0 : index
    %8 = vector.load %arg7[%c0_6, %c0_7] : memref<128x128xf32, #tpu.memory_space<vmem>>, vector<128x128xf32>
    tpu.vector_store %arg7[%c0_6, %c0_7], %7 {strides = array<i32>} : memref<128x128xf32, #tpu.memory_space<vmem>>, vector<128x128xf32>,
    %c0_i32_8 = arith.constant 0 : i32
    %9 = arith.cmpi eq, %arg2, %c0_i32_8 : i32
    %10 = arith.extui %9 : i1 to i32
    %c0_i32_9 = arith.constant 0 : i32
    %11 = arith.cmpi ne, %10, %c0_i32_9 : i32
    scf.if %11 {
      %c0_10 = arith.constant 0 : index
      %c0_11 = arith.constant 0 : index
      %12 = vector.load %arg7[%c0_10, %c0_11] : memref<128x128xf32, #tpu.memory_space<vmem>>, vector<128x128xf32>
      %c0_12 = arith.constant 0 : index
      %c0_13 = arith.constant 0 : index
      %13 = vector.load %arg5[%c0_12, %c0_13] : memref<1x128xf32, #tpu.memory_space<vmem>>, vector<1x128xf32>
      %14 = vector.broadcast %13 : vector<1x128xf32> to vector<128x128xf32>
      %15 = arith.addf %12, %14 : vector<128x128xf32>
      %cst_14 = arith.constant 0.000000e+00 : f32
      %16 = vector.broadcast %cst_14 : f32 to vector<128x128xf32>
      %17 = arith.maximumf %15, %16 : vector<128x128xf32>
      %c0_15 = arith.constant 0 : index
      %c0_16 = arith.constant 0 : index
      %18 = vector.load %arg6[%c0_15, %c0_16] : memref<128x128xf32, #tpu.memory_space<vmem>>, vector<128x128xf32>
      tpu.vector_store %arg6[%c0_15, %c0_16], %17 {strides = array<i32>} : memref<128x128xf32, #tpu.memory_space<vmem>>, vector<128x128xf32>,
    } else {
    }
    return
  }
  func.func @transform_0(%arg0: i32, %arg1: i32, %arg2: i32) -> (i32, i32) {
    %c0_i32 = arith.constant 0 : i32
    return %arg0, %arg2 : i32, i32
  }
  func.func @transform_1(%arg0: i32, %arg1: i32, %arg2: i32) -> (i32, i32) {
    %c0_i32 = arith.constant 0 : i32
    return %arg2, %arg1 : i32, i32
  }
  func.func @transform_2(%arg0: i32, %arg1: i32, %arg2: i32) -> (i32, i32) {
    %c0_i32 = arith.constant 0 : i32
    %c0_i32_0 = arith.constant 0 : i32
    return %c0_i32, %arg1 : i32, i32
  }
  func.func @transform_3(%arg0: i32, %arg1: i32, %arg2: i32) -> (i32, i32) {
    %c0_i32 = arith.constant 0 : i32
    return %arg0, %arg1 : i32, i32
  }
}

module attributes {stable_mosaic.version = 11 : i64} {
  func.func @_matmul_bias_kernel(%arg0: i32, %arg1: i32, %arg2: i32, %arg3: memref<128x128xbf16, #tpu.memory_space<vmem>>, %arg4: memref<128x128xbf16, #tpu.memory_space<vmem>>, %arg5: memref<1x128xf32, #tpu.memory_space<vmem>>, %arg6: memref<128x128xf32, #tpu.memory_space<vmem>>, %arg7: memref<128x128xf32, #tpu.memory_space<vmem>>) attributes {dimension_semantics = [#tpu.dimension_semantics<parallel>, #tpu.dimension_semantics<parallel>, #tpu.dimension_semantics<arbitrary>], iteration_bounds = array<i64: 1, 1, 1>, scalar_prefetch = 0 : i64, scratch_operands = 1 : i64, tpu.core_type = #tpu.core_type<tc>, window_params = [{transform_indices = @transform_0, window_bounds = array<i64: 128, 128>}, {transform_indices = @transform_1, window_bounds = array<i64: 128, 128>}, {transform_indices = @transform_2, window_bounds = array<i64: 1, 128>}, {transform_indices = @transform_3, window_bounds = array<i64: 128, 128>}]} {
    %c0_i32 = arith.constant 0 : i32
    %0 = arith.cmpi eq, %arg2, %c0_i32 : i32
    %1 = arith.extui %0 : i1 to i32
    %c0_i32_0 = arith.constant 0 : i32
    %2 = arith.cmpi ne, %1, %c0_i32_0 : i32
    scf.if %2 {
      %cst_10 = arith.constant 0.000000e+00 : f32
      %12 = vector.broadcast %cst_10 : f32 to vector<128x128xf32>
      %c0_11 = arith.constant 0 : index
      %c0_12 = arith.constant 0 : index
      %13 = vector.load %arg7[%c0_11, %c0_12] : memref<128x128xf32, #tpu.memory_space<vmem>>, vector<128x128xf32>
      tpu.vector_store %arg7[%c0_11, %c0_12], %12 {strides = array<i32>} : memref<128x128xf32, #tpu.memory_space<vmem>>, vector<128x128xf32>,
    } else {
    }
    %c0 = arith.constant 0 : index
    %c0_1 = arith.constant 0 : index
    %3 = vector.load %arg7[%c0, %c0_1] : memref<128x128xf32, #tpu.memory_space<vmem>>, vector<128x128xf32>
    %c0_2 = arith.constant 0 : index
    %c0_3 = arith.constant 0 : index
    %4 = vector.load %arg3[%c0_2, %c0_3] : memref<128x128xbf16, #tpu.memory_space<vmem>>, vector<128x128xbf16>
    %c0_4 = arith.constant 0 : index
    %c0_5 = arith.constant 0 : index
    %5 = vector.load %arg4[%c0_4, %c0_5] : memref<128x128xbf16, #tpu.memory_space<vmem>>, vector<128x128xbf16>
    %cst = arith.constant dense<0.000000e+00> : vector<128x128xf32>
    %6 = tpu.matmul %4, %5, %cst {dimension_numbers = #tpu.dot_dimension_numbers<[1], [0], [0], [1], [0, 0, 1, 1], [], []>} : vector<128x128xbf16>, vector<128x128xbf16>, vector<128x128xf32> -> vector<128x128xf32>
    %7 = arith.addf %3, %6 : vector<128x128xf32>
    %c0_6 = arith.constant 0 : index
    %c0_7 = arith.constant 0 : index
    %8 = vector.load %arg7[%c0_6, %c0_7] : memref<128x128xf32, #tpu.memory_space<vmem>>, vector<128x128xf32>
    tpu.vector_store %arg7[%c0_6, %c0_7], %7 {strides = array<i32>} : memref<128x128xf32, #tpu.memory_space<vmem>>, vector<128x128xf32>,
    %c0_i32_8 = arith.constant 0 : i32
    %9 = arith.cmpi eq, %arg2, %c0_i32_8 : i32
    %10 = arith.extui %9 : i1 to i32
    %c0_i32_9 = arith.constant 0 : i32
    %11 = arith.cmpi ne, %10, %c0_i32_9 : i32
    scf.if %11 {
      %c0_10 = arith.constant 0 : index
      %c0_11 = arith.constant 0 : index
      %12 = vector.load %arg7[%c0_10, %c0_11] : memref<128x128xf32, #tpu.memory_space<vmem>>, vector<128x128xf32>
      %c0_12 = arith.constant 0 : index
      %c0_13 = arith.constant 0 : index
      %13 = vector.load %arg5[%c0_12, %c0_13] : memref<1x128xf32, #tpu.memory_space<vmem>>, vector<1x128xf32>
      %14 = vector.broadcast %13 : vector<1x128xf32> to vector<128x128xf32>
      %15 = arith.addf %12, %14 : vector<128x128xf32>
      %c0_14 = arith.constant 0 : index
      %c0_15 = arith.constant 0 : index
      %16 = vector.load %arg6[%c0_14, %c0_15] : memref<128x128xf32, #tpu.memory_space<vmem>>, vector<128x128xf32>
      tpu.vector_store %arg6[%c0_14, %c0_15], %15 {strides = array<i32>} : memref<128x128xf32, #tpu.memory_space<vmem>>, vector<128x128xf32>,
    } else {
    }
    return
  }
  func.func @transform_0(%arg0: i32, %arg1: i32, %arg2: i32) -> (i32, i32) {
    %c0_i32 = arith.constant 0 : i32
    return %arg0, %arg2 : i32, i32
  }
  func.func @transform_1(%arg0: i32, %arg1: i32, %arg2: i32) -> (i32, i32) {
    %c0_i32 = arith.constant 0 : i32
    return %arg2, %arg1 : i32, i32
  }
  func.func @transform_2(%arg0: i32, %arg1: i32, %arg2: i32) -> (i32, i32) {
    %c0_i32 = arith.constant 0 : i32
    %c0_i32_0 = arith.constant 0 : i32
    return %c0_i32, %arg1 : i32, i32
  }
  func.func @transform_3(%arg0: i32, %arg1: i32, %arg2: i32) -> (i32, i32) {
    %c0_i32 = arith.constant 0 : i32
    return %arg0, %arg1 : i32, i32
  }
}

module attributes {stable_mosaic.version = 11 : i64} {
  func.func @_add_relu_kernel(%arg0: i32, %arg1: memref<2x2048xf32, #tpu.memory_space<vmem>>, %arg2: memref<2x2048xf32, #tpu.memory_space<vmem>>, %arg3: memref<2x2048xf32, #tpu.memory_space<vmem>>) attributes {dimension_semantics = [#tpu.dimension_semantics<parallel>], iteration_bounds = array<i64: 1>, scalar_prefetch = 0 : i64, scratch_operands = 0 : i64, tpu.core_type = #tpu.core_type<tc>, window_params = [{transform_indices = @transform_0, window_bounds = array<i64: 2, 2048>}, {transform_indices = @transform_1, window_bounds = array<i64: 2, 2048>}, {transform_indices = @transform_2, window_bounds = array<i64: 2, 2048>}]} {
    %c0 = arith.constant 0 : index
    %c0_0 = arith.constant 0 : index
    %0 = vector.load %arg1[%c0, %c0_0] : memref<2x2048xf32, #tpu.memory_space<vmem>>, vector<2x2048xf32>
    %c0_1 = arith.constant 0 : index
    %c0_2 = arith.constant 0 : index
    %1 = vector.load %arg2[%c0_1, %c0_2] : memref<2x2048xf32, #tpu.memory_space<vmem>>, vector<2x2048xf32>
    %2 = arith.addf %0, %1 : vector<2x2048xf32>
    %cst = arith.constant 0.000000e+00 : f32
    %3 = vector.broadcast %cst : f32 to vector<2x2048xf32>
    %4 = arith.maximumf %2, %3 : vector<2x2048xf32>
    %c0_3 = arith.constant 0 : index
    %c0_4 = arith.constant 0 : index
    %5 = vector.load %arg3[%c0_3, %c0_4] : memref<2x2048xf32, #tpu.memory_space<vmem>>, vector<2x2048xf32>
    tpu.vector_store %arg3[%c0_3, %c0_4], %4 {strides = array<i32>} : memref<2x2048xf32, #tpu.memory_space<vmem>>, vector<2x2048xf32>,
    return
  }
  func.func @transform_0(%arg0: i32) -> (i32, i32) {
    %c0_i32 = arith.constant 0 : i32
    %c0_i32_0 = arith.constant 0 : i32
    return %arg0, %c0_i32 : i32, i32
  }
  func.func @transform_1(%arg0: i32) -> (i32, i32) {
    %c0_i32 = arith.constant 0 : i32
    %c0_i32_0 = arith.constant 0 : i32
    return %arg0, %c0_i32 : i32, i32
  }
  func.func @transform_2(%arg0: i32) -> (i32, i32) {
    %c0_i32 = arith.constant 0 : i32
    %c0_i32_0 = arith.constant 0 : i32
    return %arg0, %c0_i32 : i32, i32
  }
}

module attributes {stable_mosaic.version = 11 : i64} {
  func.func @_matmul_bias_kernel(%arg0: i32, %arg1: i32, %arg2: i32, %arg3: memref<32x256xbf16, #tpu.memory_space<vmem>>, %arg4: memref<256x128xbf16, #tpu.memory_space<vmem>>, %arg5: memref<1x128xf32, #tpu.memory_space<vmem>>, %arg6: memref<32x128xf32, #tpu.memory_space<vmem>>, %arg7: memref<32x128xf32, #tpu.memory_space<vmem>>) attributes {dimension_semantics = [#tpu.dimension_semantics<parallel>, #tpu.dimension_semantics<parallel>, #tpu.dimension_semantics<arbitrary>], iteration_bounds = array<i64: 1, 1, 1>, scalar_prefetch = 0 : i64, scratch_operands = 1 : i64, tpu.core_type = #tpu.core_type<tc>, window_params = [{transform_indices = @transform_0, window_bounds = array<i64: 32, 256>}, {transform_indices = @transform_1, window_bounds = array<i64: 256, 128>}, {transform_indices = @transform_2, window_bounds = array<i64: 1, 128>}, {transform_indices = @transform_3, window_bounds = array<i64: 32, 128>}]} {
    %c0_i32 = arith.constant 0 : i32
    %0 = arith.cmpi eq, %arg2, %c0_i32 : i32
    %1 = arith.extui %0 : i1 to i32
    %c0_i32_0 = arith.constant 0 : i32
    %2 = arith.cmpi ne, %1, %c0_i32_0 : i32
    scf.if %2 {
      %cst_10 = arith.constant 0.000000e+00 : f32
      %12 = vector.broadcast %cst_10 : f32 to vector<32x128xf32>
      %c0_11 = arith.constant 0 : index
      %c0_12 = arith.constant 0 : index
      %13 = vector.load %arg7[%c0_11, %c0_12] : memref<32x128xf32, #tpu.memory_space<vmem>>, vector<32x128xf32>
      tpu.vector_store %arg7[%c0_11, %c0_12], %12 {strides = array<i32>} : memref<32x128xf32, #tpu.memory_space<vmem>>, vector<32x128xf32>,
    } else {
    }
    %c0 = arith.constant 0 : index
    %c0_1 = arith.constant 0 : index
    %3 = vector.load %arg7[%c0, %c0_1] : memref<32x128xf32, #tpu.memory_space<vmem>>, vector<32x128xf32>
    %c0_2 = arith.constant 0 : index
    %c0_3 = arith.constant 0 : index
    %4 = vector.load %arg3[%c0_2, %c0_3] : memref<32x256xbf16, #tpu.memory_space<vmem>>, vector<32x256xbf16>
    %c0_4 = arith.constant 0 : index
    %c0_5 = arith.constant 0 : index
    %5 = vector.load %arg4[%c0_4, %c0_5] : memref<256x128xbf16, #tpu.memory_space<vmem>>, vector<256x128xbf16>
    %cst = arith.constant dense<0.000000e+00> : vector<32x128xf32>
    %6 = tpu.matmul %4, %5, %cst {dimension_numbers = #tpu.dot_dimension_numbers<[1], [0], [0], [1], [0, 0, 1, 1], [], []>} : vector<32x256xbf16>, vector<256x128xbf16>, vector<32x128xf32> -> vector<32x128xf32>
    %7 = arith.addf %3, %6 : vector<32x128xf32>
    %c0_6 = arith.constant 0 : index
    %c0_7 = arith.constant 0 : index
    %8 = vector.load %arg7[%c0_6, %c0_7] : memref<32x128xf32, #tpu.memory_space<vmem>>, vector<32x128xf32>
    tpu.vector_store %arg7[%c0_6, %c0_7], %7 {strides = array<i32>} : memref<32x128xf32, #tpu.memory_space<vmem>>, vector<32x128xf32>,
    %c0_i32_8 = arith.constant 0 : i32
    %9 = arith.cmpi eq, %arg2, %c0_i32_8 : i32
    %10 = arith.extui %9 : i1 to i32
    %c0_i32_9 = arith.constant 0 : i32
    %11 = arith.cmpi ne, %10, %c0_i32_9 : i32
    scf.if %11 {
      %c0_10 = arith.constant 0 : index
      %c0_11 = arith.constant 0 : index
      %12 = vector.load %arg7[%c0_10, %c0_11] : memref<32x128xf32, #tpu.memory_space<vmem>>, vector<32x128xf32>
      %c0_12 = arith.constant 0 : index
      %c0_13 = arith.constant 0 : index
      %13 = vector.load %arg5[%c0_12, %c0_13] : memref<1x128xf32, #tpu.memory_space<vmem>>, vector<1x128xf32>
      %14 = vector.broadcast %13 : vector<1x128xf32> to vector<32x128xf32>
      %15 = arith.addf %12, %14 : vector<32x128xf32>
      %cst_14 = arith.constant 0.000000e+00 : f32
      %16 = vector.broadcast %cst_14 : f32 to vector<32x128xf32>
      %17 = arith.maximumf %15, %16 : vector<32x128xf32>
      %c0_15 = arith.constant 0 : index
      %c0_16 = arith.constant 0 : index
      %18 = vector.load %arg6[%c0_15, %c0_16] : memref<32x128xf32, #tpu.memory_space<vmem>>, vector<32x128xf32>
      tpu.vector_store %arg6[%c0_15, %c0_16], %17 {strides = array<i32>} : memref<32x128xf32, #tpu.memory_space<vmem>>, vector<32x128xf32>,
    } else {
    }
    return
  }
  func.func @transform_0(%arg0: i32, %arg1: i32, %arg2: i32) -> (i32, i32) {
    %c0_i32 = arith.constant 0 : i32
    return %arg0, %arg2 : i32, i32
  }
  func.func @transform_1(%arg0: i32, %arg1: i32, %arg2: i32) -> (i32, i32) {
    %c0_i32 = arith.constant 0 : i32
    return %arg2, %arg1 : i32, i32
  }
  func.func @transform_2(%arg0: i32, %arg1: i32, %arg2: i32) -> (i32, i32) {
    %c0_i32 = arith.constant 0 : i32
    %c0_i32_0 = arith.constant 0 : i32
    return %c0_i32, %arg1 : i32, i32
  }
  func.func @transform_3(%arg0: i32, %arg1: i32, %arg2: i32) -> (i32, i32) {
    %c0_i32 = arith.constant 0 : i32
    return %arg0, %arg1 : i32, i32
  }
}

module attributes {stable_mosaic.version = 11 : i64} {
  func.func @_matmul_bias_kernel(%arg0: i32, %arg1: i32, %arg2: i32, %arg3: memref<32x128xbf16, #tpu.memory_space<vmem>>, %arg4: memref<128x128xbf16, #tpu.memory_space<vmem>>, %arg5: memref<1x128xf32, #tpu.memory_space<vmem>>, %arg6: memref<32x128xf32, #tpu.memory_space<vmem>>, %arg7: memref<32x128xf32, #tpu.memory_space<vmem>>) attributes {dimension_semantics = [#tpu.dimension_semantics<parallel>, #tpu.dimension_semantics<parallel>, #tpu.dimension_semantics<arbitrary>], iteration_bounds = array<i64: 1, 1, 1>, scalar_prefetch = 0 : i64, scratch_operands = 1 : i64, tpu.core_type = #tpu.core_type<tc>, window_params = [{transform_indices = @transform_0, window_bounds = array<i64: 32, 128>}, {transform_indices = @transform_1, window_bounds = array<i64: 128, 128>}, {transform_indices = @transform_2, window_bounds = array<i64: 1, 128>}, {transform_indices = @transform_3, window_bounds = array<i64: 32, 128>}]} {
    %c0_i32 = arith.constant 0 : i32
    %0 = arith.cmpi eq, %arg2, %c0_i32 : i32
    %1 = arith.extui %0 : i1 to i32
    %c0_i32_0 = arith.constant 0 : i32
    %2 = arith.cmpi ne, %1, %c0_i32_0 : i32
    scf.if %2 {
      %cst_10 = arith.constant 0.000000e+00 : f32
      %12 = vector.broadcast %cst_10 : f32 to vector<32x128xf32>
      %c0_11 = arith.constant 0 : index
      %c0_12 = arith.constant 0 : index
      %13 = vector.load %arg7[%c0_11, %c0_12] : memref<32x128xf32, #tpu.memory_space<vmem>>, vector<32x128xf32>
      tpu.vector_store %arg7[%c0_11, %c0_12], %12 {strides = array<i32>} : memref<32x128xf32, #tpu.memory_space<vmem>>, vector<32x128xf32>,
    } else {
    }
    %c0 = arith.constant 0 : index
    %c0_1 = arith.constant 0 : index
    %3 = vector.load %arg7[%c0, %c0_1] : memref<32x128xf32, #tpu.memory_space<vmem>>, vector<32x128xf32>
    %c0_2 = arith.constant 0 : index
    %c0_3 = arith.constant 0 : index
    %4 = vector.load %arg3[%c0_2, %c0_3] : memref<32x128xbf16, #tpu.memory_space<vmem>>, vector<32x128xbf16>
    %c0_4 = arith.constant 0 : index
    %c0_5 = arith.constant 0 : index
    %5 = vector.load %arg4[%c0_4, %c0_5] : memref<128x128xbf16, #tpu.memory_space<vmem>>, vector<128x128xbf16>
    %cst = arith.constant dense<0.000000e+00> : vector<32x128xf32>
    %6 = tpu.matmul %4, %5, %cst {dimension_numbers = #tpu.dot_dimension_numbers<[1], [0], [0], [1], [0, 0, 1, 1], [], []>} : vector<32x128xbf16>, vector<128x128xbf16>, vector<32x128xf32> -> vector<32x128xf32>
    %7 = arith.addf %3, %6 : vector<32x128xf32>
    %c0_6 = arith.constant 0 : index
    %c0_7 = arith.constant 0 : index
    %8 = vector.load %arg7[%c0_6, %c0_7] : memref<32x128xf32, #tpu.memory_space<vmem>>, vector<32x128xf32>
    tpu.vector_store %arg7[%c0_6, %c0_7], %7 {strides = array<i32>} : memref<32x128xf32, #tpu.memory_space<vmem>>, vector<32x128xf32>,
    %c0_i32_8 = arith.constant 0 : i32
    %9 = arith.cmpi eq, %arg2, %c0_i32_8 : i32
    %10 = arith.extui %9 : i1 to i32
    %c0_i32_9 = arith.constant 0 : i32
    %11 = arith.cmpi ne, %10, %c0_i32_9 : i32
    scf.if %11 {
      %c0_10 = arith.constant 0 : index
      %c0_11 = arith.constant 0 : index
      %12 = vector.load %arg7[%c0_10, %c0_11] : memref<32x128xf32, #tpu.memory_space<vmem>>, vector<32x128xf32>
      %c0_12 = arith.constant 0 : index
      %c0_13 = arith.constant 0 : index
      %13 = vector.load %arg5[%c0_12, %c0_13] : memref<1x128xf32, #tpu.memory_space<vmem>>, vector<1x128xf32>
      %14 = vector.broadcast %13 : vector<1x128xf32> to vector<32x128xf32>
      %15 = arith.addf %12, %14 : vector<32x128xf32>
      %c0_14 = arith.constant 0 : index
      %c0_15 = arith.constant 0 : index
      %16 = vector.load %arg6[%c0_14, %c0_15] : memref<32x128xf32, #tpu.memory_space<vmem>>, vector<32x128xf32>
      tpu.vector_store %arg6[%c0_14, %c0_15], %15 {strides = array<i32>} : memref<32x128xf32, #tpu.memory_space<vmem>>, vector<32x128xf32>,
    } else {
    }
    return
  }
  func.func @transform_0(%arg0: i32, %arg1: i32, %arg2: i32) -> (i32, i32) {
    %c0_i32 = arith.constant 0 : i32
    return %arg0, %arg2 : i32, i32
  }
  func.func @transform_1(%arg0: i32, %arg1: i32, %arg2: i32) -> (i32, i32) {
    %c0_i32 = arith.constant 0 : i32
    return %arg2, %arg1 : i32, i32
  }
  func.func @transform_2(%arg0: i32, %arg1: i32, %arg2: i32) -> (i32, i32) {
    %c0_i32 = arith.constant 0 : i32
    %c0_i32_0 = arith.constant 0 : i32
    return %c0_i32, %arg1 : i32, i32
  }
  func.func @transform_3(%arg0: i32, %arg1: i32, %arg2: i32) -> (i32, i32) {
    %c0_i32 = arith.constant 0 : i32
    return %arg0, %arg1 : i32, i32
  }
}

module attributes {stable_mosaic.version = 11 : i64} {
  func.func @_add_relu_kernel(%arg0: i32, %arg1: memref<1x2048xf32, #tpu.memory_space<vmem>>, %arg2: memref<1x2048xf32, #tpu.memory_space<vmem>>, %arg3: memref<1x2048xf32, #tpu.memory_space<vmem>>) attributes {dimension_semantics = [#tpu.dimension_semantics<parallel>], iteration_bounds = array<i64: 1>, scalar_prefetch = 0 : i64, scratch_operands = 0 : i64, tpu.core_type = #tpu.core_type<tc>, window_params = [{transform_indices = @transform_0, window_bounds = array<i64: 1, 2048>}, {transform_indices = @transform_1, window_bounds = array<i64: 1, 2048>}, {transform_indices = @transform_2, window_bounds = array<i64: 1, 2048>}]} {
    %c0 = arith.constant 0 : index
    %c0_0 = arith.constant 0 : index
    %0 = vector.load %arg1[%c0, %c0_0] : memref<1x2048xf32, #tpu.memory_space<vmem>>, vector<1x2048xf32>
    %c0_1 = arith.constant 0 : index
    %c0_2 = arith.constant 0 : index
    %1 = vector.load %arg2[%c0_1, %c0_2] : memref<1x2048xf32, #tpu.memory_space<vmem>>, vector<1x2048xf32>
    %2 = arith.addf %0, %1 : vector<1x2048xf32>
    %cst = arith.constant 0.000000e+00 : f32
    %3 = vector.broadcast %cst : f32 to vector<1x2048xf32>
    %4 = arith.maximumf %2, %3 : vector<1x2048xf32>
    %c0_3 = arith.constant 0 : index
    %c0_4 = arith.constant 0 : index
    %5 = vector.load %arg3[%c0_3, %c0_4] : memref<1x2048xf32, #tpu.memory_space<vmem>>, vector<1x2048xf32>
    tpu.vector_store %arg3[%c0_3, %c0_4], %4 {strides = array<i32>} : memref<1x2048xf32, #tpu.memory_space<vmem>>, vector<1x2048xf32>,
    return
  }
  func.func @transform_0(%arg0: i32) -> (i32, i32) {
    %c0_i32 = arith.constant 0 : i32
    %c0_i32_0 = arith.constant 0 : i32
    return %arg0, %c0_i32 : i32, i32
  }
  func.func @transform_1(%arg0: i32) -> (i32, i32) {
    %c0_i32 = arith.constant 0 : i32
    %c0_i32_0 = arith.constant 0 : i32
    return %arg0, %c0_i32 : i32, i32
  }
  func.func @transform_2(%arg0: i32) -> (i32, i32) {
    %c0_i32 = arith.constant 0 : i32
    %c0_i32_0 = arith.constant 0 : i32
    return %arg0, %c0_i32 : i32, i32
  }
}

module attributes {stable_mosaic.version = 11 : i64} {
  func.func @_matmul_bias_kernel(%arg0: i32, %arg1: i32, %arg2: i32, %arg3: memref<32x128xbf16, #tpu.memory_space<vmem>>, %arg4: memref<128x128xbf16, #tpu.memory_space<vmem>>, %arg5: memref<1x128xf32, #tpu.memory_space<vmem>>, %arg6: memref<32x128xf32, #tpu.memory_space<vmem>>, %arg7: memref<32x128xf32, #tpu.memory_space<vmem>>) attributes {dimension_semantics = [#tpu.dimension_semantics<parallel>, #tpu.dimension_semantics<parallel>, #tpu.dimension_semantics<arbitrary>], iteration_bounds = array<i64: 1, 1, 1>, scalar_prefetch = 0 : i64, scratch_operands = 1 : i64, tpu.core_type = #tpu.core_type<tc>, window_params = [{transform_indices = @transform_0, window_bounds = array<i64: 32, 128>}, {transform_indices = @transform_1, window_bounds = array<i64: 128, 128>}, {transform_indices = @transform_2, window_bounds = array<i64: 1, 128>}, {transform_indices = @transform_3, window_bounds = array<i64: 32, 128>}]} {
    %c0_i32 = arith.constant 0 : i32
    %0 = arith.cmpi eq, %arg2, %c0_i32 : i32
    %1 = arith.extui %0 : i1 to i32
    %c0_i32_0 = arith.constant 0 : i32
    %2 = arith.cmpi ne, %1, %c0_i32_0 : i32
    scf.if %2 {
      %cst_10 = arith.constant 0.000000e+00 : f32
      %12 = vector.broadcast %cst_10 : f32 to vector<32x128xf32>
      %c0_11 = arith.constant 0 : index
      %c0_12 = arith.constant 0 : index
      %13 = vector.load %arg7[%c0_11, %c0_12] : memref<32x128xf32, #tpu.memory_space<vmem>>, vector<32x128xf32>
      tpu.vector_store %arg7[%c0_11, %c0_12], %12 {strides = array<i32>} : memref<32x128xf32, #tpu.memory_space<vmem>>, vector<32x128xf32>,
    } else {
    }
    %c0 = arith.constant 0 : index
    %c0_1 = arith.constant 0 : index
    %3 = vector.load %arg7[%c0, %c0_1] : memref<32x128xf32, #tpu.memory_space<vmem>>, vector<32x128xf32>
    %c0_2 = arith.constant 0 : index
    %c0_3 = arith.constant 0 : index
    %4 = vector.load %arg3[%c0_2, %c0_3] : memref<32x128xbf16, #tpu.memory_space<vmem>>, vector<32x128xbf16>
    %c0_4 = arith.constant 0 : index
    %c0_5 = arith.constant 0 : index
    %5 = vector.load %arg4[%c0_4, %c0_5] : memref<128x128xbf16, #tpu.memory_space<vmem>>, vector<128x128xbf16>
    %cst = arith.constant dense<0.000000e+00> : vector<32x128xf32>
    %6 = tpu.matmul %4, %5, %cst {dimension_numbers = #tpu.dot_dimension_numbers<[1], [0], [0], [1], [0, 0, 1, 1], [], []>} : vector<32x128xbf16>, vector<128x128xbf16>, vector<32x128xf32> -> vector<32x128xf32>
    %7 = arith.addf %3, %6 : vector<32x128xf32>
    %c0_6 = arith.constant 0 : index
    %c0_7 = arith.constant 0 : index
    %8 = vector.load %arg7[%c0_6, %c0_7] : memref<32x128xf32, #tpu.memory_space<vmem>>, vector<32x128xf32>
    tpu.vector_store %arg7[%c0_6, %c0_7], %7 {strides = array<i32>} : memref<32x128xf32, #tpu.memory_space<vmem>>, vector<32x128xf32>,
    %c0_i32_8 = arith.constant 0 : i32
    %9 = arith.cmpi eq, %arg2, %c0_i32_8 : i32
    %10 = arith.extui %9 : i1 to i32
    %c0_i32_9 = arith.constant 0 : i32
    %11 = arith.cmpi ne, %10, %c0_i32_9 : i32
    scf.if %11 {
      %c0_10 = arith.constant 0 : index
      %c0_11 = arith.constant 0 : index
      %12 = vector.load %arg7[%c0_10, %c0_11] : memref<32x128xf32, #tpu.memory_space<vmem>>, vector<32x128xf32>
      %c0_12 = arith.constant 0 : index
      %c0_13 = arith.constant 0 : index
      %13 = vector.load %arg5[%c0_12, %c0_13] : memref<1x128xf32, #tpu.memory_space<vmem>>, vector<1x128xf32>
      %14 = vector.broadcast %13 : vector<1x128xf32> to vector<32x128xf32>
      %15 = arith.addf %12, %14 : vector<32x128xf32>
      %cst_14 = arith.constant 0.000000e+00 : f32
      %16 = vector.broadcast %cst_14 : f32 to vector<32x128xf32>
      %17 = arith.maximumf %15, %16 : vector<32x128xf32>
      %c0_15 = arith.constant 0 : index
      %c0_16 = arith.constant 0 : index
      %18 = vector.load %arg6[%c0_15, %c0_16] : memref<32x128xf32, #tpu.memory_space<vmem>>, vector<32x128xf32>
      tpu.vector_store %arg6[%c0_15, %c0_16], %17 {strides = array<i32>} : memref<32x128xf32, #tpu.memory_space<vmem>>, vector<32x128xf32>,
    } else {
    }
    return
  }
  func.func @transform_0(%arg0: i32, %arg1: i32, %arg2: i32) -> (i32, i32) {
    %c0_i32 = arith.constant 0 : i32
    return %arg0, %arg2 : i32, i32
  }
  func.func @transform_1(%arg0: i32, %arg1: i32, %arg2: i32) -> (i32, i32) {
    %c0_i32 = arith.constant 0 : i32
    return %arg2, %arg1 : i32, i32
  }
  func.func @transform_2(%arg0: i32, %arg1: i32, %arg2: i32) -> (i32, i32) {
    %c0_i32 = arith.constant 0 : i32
    %c0_i32_0 = arith.constant 0 : i32
    return %c0_i32, %arg1 : i32, i32
  }
  func.func @transform_3(%arg0: i32, %arg1: i32, %arg2: i32) -> (i32, i32) {
    %c0_i32 = arith.constant 0 : i32
    return %arg0, %arg1 : i32, i32
  }
}

module attributes {stable_mosaic.version = 11 : i64} {
  func.func @_matmul_bias_kernel(%arg0: i32, %arg1: i32, %arg2: i32, %arg3: memref<8x128xbf16, #tpu.memory_space<vmem>>, %arg4: memref<128x128xbf16, #tpu.memory_space<vmem>>, %arg5: memref<1x128xf32, #tpu.memory_space<vmem>>, %arg6: memref<8x128xf32, #tpu.memory_space<vmem>>, %arg7: memref<8x128xf32, #tpu.memory_space<vmem>>) attributes {dimension_semantics = [#tpu.dimension_semantics<parallel>, #tpu.dimension_semantics<parallel>, #tpu.dimension_semantics<arbitrary>], iteration_bounds = array<i64: 1, 1, 3>, scalar_prefetch = 0 : i64, scratch_operands = 1 : i64, tpu.core_type = #tpu.core_type<tc>, window_params = [{transform_indices = @transform_0, window_bounds = array<i64: 8, 128>}, {transform_indices = @transform_1, window_bounds = array<i64: 128, 128>}, {transform_indices = @transform_2, window_bounds = array<i64: 1, 128>}, {transform_indices = @transform_3, window_bounds = array<i64: 8, 128>}]} {
    %c0_i32 = arith.constant 0 : i32
    %0 = arith.cmpi eq, %arg2, %c0_i32 : i32
    %1 = arith.extui %0 : i1 to i32
    %c0_i32_0 = arith.constant 0 : i32
    %2 = arith.cmpi ne, %1, %c0_i32_0 : i32
    scf.if %2 {
      %cst_9 = arith.constant 0.000000e+00 : f32
      %12 = vector.broadcast %cst_9 : f32 to vector<8x128xf32>
      %c0_10 = arith.constant 0 : index
      %c0_11 = arith.constant 0 : index
      %13 = vector.load %arg7[%c0_10, %c0_11] : memref<8x128xf32, #tpu.memory_space<vmem>>, vector<8x128xf32>
      tpu.vector_store %arg7[%c0_10, %c0_11], %12 {strides = array<i32>} : memref<8x128xf32, #tpu.memory_space<vmem>>, vector<8x128xf32>,
    } else {
    }
    %c0 = arith.constant 0 : index
    %c0_1 = arith.constant 0 : index
    %3 = vector.load %arg7[%c0, %c0_1] : memref<8x128xf32, #tpu.memory_space<vmem>>, vector<8x128xf32>
    %c0_2 = arith.constant 0 : index
    %c0_3 = arith.constant 0 : index
    %4 = vector.load %arg3[%c0_2, %c0_3] : memref<8x128xbf16, #tpu.memory_space<vmem>>, vector<8x128xbf16>
    %c0_4 = arith.constant 0 : index
    %c0_5 = arith.constant 0 : index
    %5 = vector.load %arg4[%c0_4, %c0_5] : memref<128x128xbf16, #tpu.memory_space<vmem>>, vector<128x128xbf16>
    %cst = arith.constant dense<0.000000e+00> : vector<8x128xf32>
    %6 = tpu.matmul %4, %5, %cst {dimension_numbers = #tpu.dot_dimension_numbers<[1], [0], [0], [1], [0, 0, 1, 1], [], []>} : vector<8x128xbf16>, vector<128x128xbf16>, vector<8x128xf32> -> vector<8x128xf32>
    %7 = arith.addf %3, %6 : vector<8x128xf32>
    %c0_6 = arith.constant 0 : index
    %c0_7 = arith.constant 0 : index
    %8 = vector.load %arg7[%c0_6, %c0_7] : memref<8x128xf32, #tpu.memory_space<vmem>>, vector<8x128xf32>
    tpu.vector_store %arg7[%c0_6, %c0_7], %7 {strides = array<i32>} : memref<8x128xf32, #tpu.memory_space<vmem>>, vector<8x128xf32>,
    %c2_i32 = arith.constant 2 : i32
    %9 = arith.cmpi eq, %arg2, %c2_i32 : i32
    %10 = arith.extui %9 : i1 to i32
    %c0_i32_8 = arith.constant 0 : i32
    %11 = arith.cmpi ne, %10, %c0_i32_8 : i32
    scf.if %11 {
      %c0_9 = arith.constant 0 : index
      %c0_10 = arith.constant 0 : index
      %12 = vector.load %arg7[%c0_9, %c0_10] : memref<8x128xf32, #tpu.memory_space<vmem>>, vector<8x128xf32>
      %c0_11 = arith.constant 0 : index
      %c0_12 = arith.constant 0 : index
      %13 = vector.load %arg5[%c0_11, %c0_12] : memref<1x128xf32, #tpu.memory_space<vmem>>, vector<1x128xf32>
      %14 = vector.broadcast %13 : vector<1x128xf32> to vector<8x128xf32>
      %15 = arith.addf %12, %14 : vector<8x128xf32>
      %cst_13 = arith.constant 0.000000e+00 : f32
      %16 = vector.broadcast %cst_13 : f32 to vector<8x128xf32>
      %17 = arith.maximumf %15, %16 : vector<8x128xf32>
      %c0_14 = arith.constant 0 : index
      %c0_15 = arith.constant 0 : index
      %18 = vector.load %arg6[%c0_14, %c0_15] : memref<8x128xf32, #tpu.memory_space<vmem>>, vector<8x128xf32>
      tpu.vector_store %arg6[%c0_14, %c0_15], %17 {strides = array<i32>} : memref<8x128xf32, #tpu.memory_space<vmem>>, vector<8x128xf32>,
    } else {
    }
    return
  }
  func.func @transform_0(%arg0: i32, %arg1: i32, %arg2: i32) -> (i32, i32) {
    %c0_i32 = arith.constant 0 : i32
    return %arg0, %arg2 : i32, i32
  }
  func.func @transform_1(%arg0: i32, %arg1: i32, %arg2: i32) -> (i32, i32) {
    %c0_i32 = arith.constant 0 : i32
    return %arg2, %arg1 : i32, i32
  }
  func.func @transform_2(%arg0: i32, %arg1: i32, %arg2: i32) -> (i32, i32) {
    %c0_i32 = arith.constant 0 : i32
    %c0_i32_0 = arith.constant 0 : i32
    return %c0_i32, %arg1 : i32, i32
  }
  func.func @transform_3(%arg0: i32, %arg1: i32, %arg2: i32) -> (i32, i32) {
    %c0_i32 = arith.constant 0 : i32
    return %arg0, %arg1 : i32, i32
  }
}

module attributes {stable_mosaic.version = 11 : i64} {
  func.func @_matmul_bias_kernel(%arg0: i32, %arg1: i32, %arg2: i32, %arg3: memref<8x128xbf16, #tpu.memory_space<vmem>>, %arg4: memref<128x128xbf16, #tpu.memory_space<vmem>>, %arg5: memref<1x128xf32, #tpu.memory_space<vmem>>, %arg6: memref<8x128xf32, #tpu.memory_space<vmem>>, %arg7: memref<8x128xf32, #tpu.memory_space<vmem>>) attributes {dimension_semantics = [#tpu.dimension_semantics<parallel>, #tpu.dimension_semantics<parallel>, #tpu.dimension_semantics<arbitrary>], iteration_bounds = array<i64: 1, 1, 1>, scalar_prefetch = 0 : i64, scratch_operands = 1 : i64, tpu.core_type = #tpu.core_type<tc>, window_params = [{transform_indices = @transform_0, window_bounds = array<i64: 8, 128>}, {transform_indices = @transform_1, window_bounds = array<i64: 128, 128>}, {transform_indices = @transform_2, window_bounds = array<i64: 1, 128>}, {transform_indices = @transform_3, window_bounds = array<i64: 8, 128>}]} {
    %c0_i32 = arith.constant 0 : i32
    %0 = arith.cmpi eq, %arg2, %c0_i32 : i32
    %1 = arith.extui %0 : i1 to i32
    %c0_i32_0 = arith.constant 0 : i32
    %2 = arith.cmpi ne, %1, %c0_i32_0 : i32
    scf.if %2 {
      %cst_10 = arith.constant 0.000000e+00 : f32
      %12 = vector.broadcast %cst_10 : f32 to vector<8x128xf32>
      %c0_11 = arith.constant 0 : index
      %c0_12 = arith.constant 0 : index
      %13 = vector.load %arg7[%c0_11, %c0_12] : memref<8x128xf32, #tpu.memory_space<vmem>>, vector<8x128xf32>
      tpu.vector_store %arg7[%c0_11, %c0_12], %12 {strides = array<i32>} : memref<8x128xf32, #tpu.memory_space<vmem>>, vector<8x128xf32>,
    } else {
    }
    %c0 = arith.constant 0 : index
    %c0_1 = arith.constant 0 : index
    %3 = vector.load %arg7[%c0, %c0_1] : memref<8x128xf32, #tpu.memory_space<vmem>>, vector<8x128xf32>
    %c0_2 = arith.constant 0 : index
    %c0_3 = arith.constant 0 : index
    %4 = vector.load %arg3[%c0_2, %c0_3] : memref<8x128xbf16, #tpu.memory_space<vmem>>, vector<8x128xbf16>
    %c0_4 = arith.constant 0 : index
    %c0_5 = arith.constant 0 : index
    %5 = vector.load %arg4[%c0_4, %c0_5] : memref<128x128xbf16, #tpu.memory_space<vmem>>, vector<128x128xbf16>
    %cst = arith.constant dense<0.000000e+00> : vector<8x128xf32>
    %6 = tpu.matmul %4, %5, %cst {dimension_numbers = #tpu.dot_dimension_numbers<[1], [0], [0], [1], [0, 0, 1, 1], [], []>} : vector<8x128xbf16>, vector<128x128xbf16>, vector<8x128xf32> -> vector<8x128xf32>
    %7 = arith.addf %3, %6 : vector<8x128xf32>
    %c0_6 = arith.constant 0 : index
    %c0_7 = arith.constant 0 : index
    %8 = vector.load %arg7[%c0_6, %c0_7] : memref<8x128xf32, #tpu.memory_space<vmem>>, vector<8x128xf32>
    tpu.vector_store %arg7[%c0_6, %c0_7], %7 {strides = array<i32>} : memref<8x128xf32, #tpu.memory_space<vmem>>, vector<8x128xf32>,
    %c0_i32_8 = arith.constant 0 : i32
    %9 = arith.cmpi eq, %arg2, %c0_i32_8 : i32
    %10 = arith.extui %9 : i1 to i32
    %c0_i32_9 = arith.constant 0 : i32
    %11 = arith.cmpi ne, %10, %c0_i32_9 : i32
    scf.if %11 {
      %c0_10 = arith.constant 0 : index
      %c0_11 = arith.constant 0 : index
      %12 = vector.load %arg7[%c0_10, %c0_11] : memref<8x128xf32, #tpu.memory_space<vmem>>, vector<8x128xf32>
      %c0_12 = arith.constant 0 : index
      %c0_13 = arith.constant 0 : index
      %13 = vector.load %arg5[%c0_12, %c0_13] : memref<1x128xf32, #tpu.memory_space<vmem>>, vector<1x128xf32>
      %14 = vector.broadcast %13 : vector<1x128xf32> to vector<8x128xf32>
      %15 = arith.addf %12, %14 : vector<8x128xf32>
      %c0_14 = arith.constant 0 : index
      %c0_15 = arith.constant 0 : index
      %16 = vector.load %arg6[%c0_14, %c0_15] : memref<8x128xf32, #tpu.memory_space<vmem>>, vector<8x128xf32>
      tpu.vector_store %arg6[%c0_14, %c0_15], %15 {strides = array<i32>} : memref<8x128xf32, #tpu.memory_space<vmem>>, vector<8x128xf32>,
    } else {
    }
    return
  }
  func.func @transform_0(%arg0: i32, %arg1: i32, %arg2: i32) -> (i32, i32) {
    %c0_i32 = arith.constant 0 : i32
    return %arg0, %arg2 : i32, i32
  }
  func.func @transform_1(%arg0: i32, %arg1: i32, %arg2: i32) -> (i32, i32) {
    %c0_i32 = arith.constant 0 : i32
    return %arg2, %arg1 : i32, i32
  }
  func.func @transform_2(%arg0: i32, %arg1: i32, %arg2: i32) -> (i32, i32) {
    %c0_i32 = arith.constant 0 : i32
    %c0_i32_0 = arith.constant 0 : i32
    return %c0_i32, %arg1 : i32, i32
  }
  func.func @transform_3(%arg0: i32, %arg1: i32, %arg2: i32) -> (i32, i32) {
    %c0_i32 = arith.constant 0 : i32
    return %arg0, %arg1 : i32, i32
  }
}

module attributes {stable_mosaic.version = 11 : i64} {
  func.func @_add_relu_kernel(%arg0: i32, %arg1: memref<1x1024xf32, #tpu.memory_space<vmem>>, %arg2: memref<1x1024xf32, #tpu.memory_space<vmem>>, %arg3: memref<1x1024xf32, #tpu.memory_space<vmem>>) attributes {dimension_semantics = [#tpu.dimension_semantics<parallel>], iteration_bounds = array<i64: 1>, scalar_prefetch = 0 : i64, scratch_operands = 0 : i64, tpu.core_type = #tpu.core_type<tc>, window_params = [{transform_indices = @transform_0, window_bounds = array<i64: 1, 1024>}, {transform_indices = @transform_1, window_bounds = array<i64: 1, 1024>}, {transform_indices = @transform_2, window_bounds = array<i64: 1, 1024>}]} {
    %c0 = arith.constant 0 : index
    %c0_0 = arith.constant 0 : index
    %0 = vector.load %arg1[%c0, %c0_0] : memref<1x1024xf32, #tpu.memory_space<vmem>>, vector<1x1024xf32>
    %c0_1 = arith.constant 0 : index
    %c0_2 = arith.constant 0 : index
    %1 = vector.load %arg2[%c0_1, %c0_2] : memref<1x1024xf32, #tpu.memory_space<vmem>>, vector<1x1024xf32>
    %2 = arith.addf %0, %1 : vector<1x1024xf32>
    %cst = arith.constant 0.000000e+00 : f32
    %3 = vector.broadcast %cst : f32 to vector<1x1024xf32>
    %4 = arith.maximumf %2, %3 : vector<1x1024xf32>
    %c0_3 = arith.constant 0 : index
    %c0_4 = arith.constant 0 : index
    %5 = vector.load %arg3[%c0_3, %c0_4] : memref<1x1024xf32, #tpu.memory_space<vmem>>, vector<1x1024xf32>
    tpu.vector_store %arg3[%c0_3, %c0_4], %4 {strides = array<i32>} : memref<1x1024xf32, #tpu.memory_space<vmem>>, vector<1x1024xf32>,
    return
  }
  func.func @transform_0(%arg0: i32) -> (i32, i32) {
    %c0_i32 = arith.constant 0 : i32
    %c0_i32_0 = arith.constant 0 : i32
    return %arg0, %c0_i32 : i32, i32
  }
  func.func @transform_1(%arg0: i32) -> (i32, i32) {
    %c0_i32 = arith.constant 0 : i32
    %c0_i32_0 = arith.constant 0 : i32
    return %arg0, %c0_i32 : i32, i32
  }
  func.func @transform_2(%arg0: i32) -> (i32, i32) {
    %c0_i32 = arith.constant 0 : i32
    %c0_i32_0 = arith.constant 0 : i32
    return %arg0, %c0_i32 : i32, i32
  }
}

module attributes {stable_mosaic.version = 11 : i64} {
  func.func @_matmul_bias_kernel(%arg0: i32, %arg1: i32, %arg2: i32, %arg3: memref<16x128xbf16, #tpu.memory_space<vmem>>, %arg4: memref<128x128xbf16, #tpu.memory_space<vmem>>, %arg5: memref<1x128xf32, #tpu.memory_space<vmem>>, %arg6: memref<16x128xf32, #tpu.memory_space<vmem>>, %arg7: memref<16x128xf32, #tpu.memory_space<vmem>>) attributes {dimension_semantics = [#tpu.dimension_semantics<parallel>, #tpu.dimension_semantics<parallel>, #tpu.dimension_semantics<arbitrary>], iteration_bounds = array<i64: 1, 1, 1>, scalar_prefetch = 0 : i64, scratch_operands = 1 : i64, tpu.core_type = #tpu.core_type<tc>, window_params = [{transform_indices = @transform_0, window_bounds = array<i64: 16, 128>}, {transform_indices = @transform_1, window_bounds = array<i64: 128, 128>}, {transform_indices = @transform_2, window_bounds = array<i64: 1, 128>}, {transform_indices = @transform_3, window_bounds = array<i64: 16, 128>}]} {
    %c0_i32 = arith.constant 0 : i32
    %0 = arith.cmpi eq, %arg2, %c0_i32 : i32
    %1 = arith.extui %0 : i1 to i32
    %c0_i32_0 = arith.constant 0 : i32
    %2 = arith.cmpi ne, %1, %c0_i32_0 : i32
    scf.if %2 {
      %cst_10 = arith.constant 0.000000e+00 : f32
      %12 = vector.broadcast %cst_10 : f32 to vector<16x128xf32>
      %c0_11 = arith.constant 0 : index
      %c0_12 = arith.constant 0 : index
      %13 = vector.load %arg7[%c0_11, %c0_12] : memref<16x128xf32, #tpu.memory_space<vmem>>, vector<16x128xf32>
      tpu.vector_store %arg7[%c0_11, %c0_12], %12 {strides = array<i32>} : memref<16x128xf32, #tpu.memory_space<vmem>>, vector<16x128xf32>,
    } else {
    }
    %c0 = arith.constant 0 : index
    %c0_1 = arith.constant 0 : index
    %3 = vector.load %arg7[%c0, %c0_1] : memref<16x128xf32, #tpu.memory_space<vmem>>, vector<16x128xf32>
    %c0_2 = arith.constant 0 : index
    %c0_3 = arith.constant 0 : index
    %4 = vector.load %arg3[%c0_2, %c0_3] : memref<16x128xbf16, #tpu.memory_space<vmem>>, vector<16x128xbf16>
    %c0_4 = arith.constant 0 : index
    %c0_5 = arith.constant 0 : index
    %5 = vector.load %arg4[%c0_4, %c0_5] : memref<128x128xbf16, #tpu.memory_space<vmem>>, vector<128x128xbf16>
    %cst = arith.constant dense<0.000000e+00> : vector<16x128xf32>
    %6 = tpu.matmul %4, %5, %cst {dimension_numbers = #tpu.dot_dimension_numbers<[1], [0], [0], [1], [0, 0, 1, 1], [], []>} : vector<16x128xbf16>, vector<128x128xbf16>, vector<16x128xf32> -> vector<16x128xf32>
    %7 = arith.addf %3, %6 : vector<16x128xf32>
    %c0_6 = arith.constant 0 : index
    %c0_7 = arith.constant 0 : index
    %8 = vector.load %arg7[%c0_6, %c0_7] : memref<16x128xf32, #tpu.memory_space<vmem>>, vector<16x128xf32>
    tpu.vector_store %arg7[%c0_6, %c0_7], %7 {strides = array<i32>} : memref<16x128xf32, #tpu.memory_space<vmem>>, vector<16x128xf32>,
    %c0_i32_8 = arith.constant 0 : i32
    %9 = arith.cmpi eq, %arg2, %c0_i32_8 : i32
    %10 = arith.extui %9 : i1 to i32
    %c0_i32_9 = arith.constant 0 : i32
    %11 = arith.cmpi ne, %10, %c0_i32_9 : i32
    scf.if %11 {
      %c0_10 = arith.constant 0 : index
      %c0_11 = arith.constant 0 : index
      %12 = vector.load %arg7[%c0_10, %c0_11] : memref<16x128xf32, #tpu.memory_space<vmem>>, vector<16x128xf32>
      %c0_12 = arith.constant 0 : index
      %c0_13 = arith.constant 0 : index
      %13 = vector.load %arg5[%c0_12, %c0_13] : memref<1x128xf32, #tpu.memory_space<vmem>>, vector<1x128xf32>
      %14 = vector.broadcast %13 : vector<1x128xf32> to vector<16x128xf32>
      %15 = arith.addf %12, %14 : vector<16x128xf32>
      %c0_14 = arith.constant 0 : index
      %c0_15 = arith.constant 0 : index
      %16 = vector.load %arg6[%c0_14, %c0_15] : memref<16x128xf32, #tpu.memory_space<vmem>>, vector<16x128xf32>
      tpu.vector_store %arg6[%c0_14, %c0_15], %15 {strides = array<i32>} : memref<16x128xf32, #tpu.memory_space<vmem>>, vector<16x128xf32>,
    } else {
    }
    return
  }
  func.func @transform_0(%arg0: i32, %arg1: i32, %arg2: i32) -> (i32, i32) {
    %c0_i32 = arith.constant 0 : i32
    return %arg0, %arg2 : i32, i32
  }
  func.func @transform_1(%arg0: i32, %arg1: i32, %arg2: i32) -> (i32, i32) {
    %c0_i32 = arith.constant 0 : i32
    return %arg2, %arg1 : i32, i32
  }
  func.func @transform_2(%arg0: i32, %arg1: i32, %arg2: i32) -> (i32, i32) {
    %c0_i32 = arith.constant 0 : i32
    %c0_i32_0 = arith.constant 0 : i32
    return %c0_i32, %arg1 : i32, i32
  }
  func.func @transform_3(%arg0: i32, %arg1: i32, %arg2: i32) -> (i32, i32) {
    %c0_i32 = arith.constant 0 : i32
    return %arg0, %arg1 : i32, i32
  }
}

module attributes {stable_mosaic.version = 11 : i64} {
  func.func @_attn_pool_kernel(%arg0: i32, %arg1: memref<1x4x1x32xbf16, #tpu.memory_space<vmem>>, %arg2: memref<1x4x5x32xbf16, #tpu.memory_space<vmem>>, %arg3: memref<1x4x5x32xbf16, #tpu.memory_space<vmem>>, %arg4: memref<1x4x1x32xf32, #tpu.memory_space<vmem>>) attributes {dimension_semantics = [#tpu.dimension_semantics<parallel>], iteration_bounds = array<i64: 2>, scalar_prefetch = 0 : i64, scratch_operands = 0 : i64, tpu.core_type = #tpu.core_type<tc>, window_params = [{transform_indices = @transform_0, window_bounds = array<i64: 1, 4, 1, 32>}, {transform_indices = @transform_1, window_bounds = array<i64: 1, 4, 5, 32>}, {transform_indices = @transform_2, window_bounds = array<i64: 1, 4, 5, 32>}, {transform_indices = @transform_3, window_bounds = array<i64: 1, 4, 1, 32>}]} {
    %c0 = arith.constant 0 : index
    %c0_0 = arith.constant 0 : index
    %c0_1 = arith.constant 0 : index
    %c0_2 = arith.constant 0 : index
    %0 = vector.load %arg1[%c0, %c0_0, %c0_1, %c0_2] : memref<1x4x1x32xbf16, #tpu.memory_space<vmem>>, vector<1x4x1x32xbf16>
    %1 = vector.shape_cast %0 : vector<1x4x1x32xbf16> to vector<4x1x32xbf16>
    %c0_3 = arith.constant 0 : index
    %c0_4 = arith.constant 0 : index
    %c0_5 = arith.constant 0 : index
    %c0_6 = arith.constant 0 : index
    %2 = vector.load %arg2[%c0_3, %c0_4, %c0_5, %c0_6] : memref<1x4x5x32xbf16, #tpu.memory_space<vmem>>, vector<1x4x5x32xbf16>
    %3 = vector.shape_cast %2 : vector<1x4x5x32xbf16> to vector<4x5x32xbf16>
    %c0_7 = arith.constant 0 : index
    %c0_8 = arith.constant 0 : index
    %c0_9 = arith.constant 0 : index
    %c0_10 = arith.constant 0 : index
    %4 = vector.load %arg3[%c0_7, %c0_8, %c0_9, %c0_10] : memref<1x4x5x32xbf16, #tpu.memory_space<vmem>>, vector<1x4x5x32xbf16>
    %5 = vector.shape_cast %4 : vector<1x4x5x32xbf16> to vector<4x5x32xbf16>
    "tpu.trace_start"() <{level = 10 : i32, message = "hqd,hkd->hqk"}> : () -> ()
    %cst = arith.constant dense<0.000000e+00> : vector<4x1x5xf32>
    %6 = tpu.matmul %1, %3, %cst {dimension_numbers = #tpu.dot_dimension_numbers<[2], [2], [1], [1], [0, 0, 0, 1, 1, 1], [0], [0]>} : vector<4x1x32xbf16>, vector<4x5x32xbf16>, vector<4x1x5xf32> -> vector<4x1x5xf32>
    "tpu.trace_stop"() : () -> ()
    %cst_11 = arith.constant 0.176776692 : f32
    %7 = vector.broadcast %cst_11 : f32 to vector<4x1x5xf32>
    %8 = arith.mulf %6, %7 : vector<4x1x5xf32>
    %cst_12 = arith.constant dense<0xFF800000> : vector<4x1xf32>
    %9 = vector.multi_reduction <maximumf>, %8, %cst_12 [2] : vector<4x1x5xf32> to vector<4x1xf32>
    %10 = vector.shape_cast %9 : vector<4x1xf32> to vector<4x1x1xf32>
    %11 = vector.broadcast %10 : vector<4x1x1xf32> to vector<4x1x5xf32>
    %12 = arith.subf %8, %11 : vector<4x1x5xf32>
    %13 = math.exp %12 : vector<4x1x5xf32>
    %cst_13 = arith.constant dense<0.000000e+00> : vector<4x1xf32>
    %14 = vector.multi_reduction <add>, %13, %cst_13 [2] : vector<4x1x5xf32> to vector<4x1xf32>
    %15 = vector.shape_cast %14 : vector<4x1xf32> to vector<4x1x1xf32>
    %16 = tpu.reciprocal %15 {approx = true} : vector<4x1x1xf32> -> vector<4x1x1xf32>
    %17 = vector.broadcast %16 : vector<4x1x1xf32> to vector<4x1x5xf32>
    %18 = arith.mulf %13, %17 : vector<4x1x5xf32>
    %19 = arith.truncf %18 : vector<4x1x5xf32> to vector<4x1x5xbf16>
    "tpu.trace_start"() <{level = 10 : i32, message = "hqk,hkd->hqd"}> : () -> ()
    %cst_14 = arith.constant dense<0.000000e+00> : vector<4x1x32xf32>
    %20 = tpu.matmul %19, %5, %cst_14 {dimension_numbers = #tpu.dot_dimension_numbers<[2], [1], [1], [2], [0, 0, 0, 1, 1, 2], [0], [0]>} : vector<4x1x5xbf16>, vector<4x5x32xbf16>, vector<4x1x32xf32> -> vector<4x1x32xf32>
    "tpu.trace_stop"() : () -> ()
    %c0_15 = arith.constant 0 : index
    %c0_16 = arith.constant 0 : index
    %c0_17 = arith.constant 0 : index
    %c0_18 = arith.constant 0 : index
    %21 = vector.load %arg4[%c0_15, %c0_16, %c0_17, %c0_18] : memref<1x4x1x32xf32, #tpu.memory_space<vmem>>, vector<1x4x1x32xf32>
    %22 = vector.shape_cast %21 : vector<1x4x1x32xf32> to vector<4x1x32xf32>
    %23 = vector.shape_cast %20 : vector<4x1x32xf32> to vector<1x4x1x32xf32>
    tpu.vector_store %arg4[%c0_15, %c0_16, %c0_17, %c0_18], %23 {strides = array<i32>} : memref<1x4x1x32xf32, #tpu.memory_space<vmem>>, vector<1x4x1x32xf32>,
    return
  }
  func.func @transform_0(%arg0: i32) -> (i32, i32, i32, i32) {
    %c0_i32 = arith.constant 0 : i32
    %c0_i32_0 = arith.constant 0 : i32
    %c0_i32_1 = arith.constant 0 : i32
    %c0_i32_2 = arith.constant 0 : i32
    return %arg0, %c0_i32, %c0_i32_0, %c0_i32_1 : i32, i32, i32, i32
  }
  func.func @transform_1(%arg0: i32) -> (i32, i32, i32, i32) {
    %c0_i32 = arith.constant 0 : i32
    %c0_i32_0 = arith.constant 0 : i32
    %c0_i32_1 = arith.constant 0 : i32
    %c0_i32_2 = arith.constant 0 : i32
    return %arg0, %c0_i32, %c0_i32_0, %c0_i32_1 : i32, i32, i32, i32
  }
  func.func @transform_2(%arg0: i32) -> (i32, i32, i32, i32) {
    %c0_i32 = arith.constant 0 : i32
    %c0_i32_0 = arith.constant 0 : i32
    %c0_i32_1 = arith.constant 0 : i32
    %c0_i32_2 = arith.constant 0 : i32
    return %arg0, %c0_i32, %c0_i32_0, %c0_i32_1 : i32, i32, i32, i32
  }
  func.func @transform_3(%arg0: i32) -> (i32, i32, i32, i32) {
    %c0_i32 = arith.constant 0 : i32
    %c0_i32_0 = arith.constant 0 : i32
    %c0_i32_1 = arith.constant 0 : i32
    %c0_i32_2 = arith.constant 0 : i32
    return %arg0, %c0_i32, %c0_i32_0, %c0_i32_1 : i32, i32, i32, i32
  }
}

module attributes {stable_mosaic.version = 11 : i64} {
  func.func @_l2norm_kernel(%arg0: memref<2x32xf32, #tpu.memory_space<vmem>>, %arg1: memref<2x32xf32, #tpu.memory_space<vmem>>) attributes {dimension_semantics = [], scalar_prefetch = 0 : i64, scratch_operands = 0 : i64, tpu.core_type = #tpu.core_type<tc>} {
    %c0 = arith.constant 0 : index
    %c0_0 = arith.constant 0 : index
    %0 = vector.load %arg0[%c0, %c0_0] : memref<2x32xf32, #tpu.memory_space<vmem>>, vector<2x32xf32>
    %1 = arith.mulf %0, %0 : vector<2x32xf32>
    %cst = arith.constant dense<0.000000e+00> : vector<2xf32>
    %2 = vector.multi_reduction <add>, %1, %cst [1] : vector<2x32xf32> to vector<2xf32>
    %3 = vector.shape_cast %2 : vector<2xf32> to vector<2x1xf32>
    %cst_1 = arith.constant 9.99999996E-13 : f32
    %4 = vector.broadcast %cst_1 : f32 to vector<2x1xf32>
    %5 = arith.addf %3, %4 : vector<2x1xf32>
    %6 = math.rsqrt %5 : vector<2x1xf32>
    %7 = vector.broadcast %6 : vector<2x1xf32> to vector<2x32xf32>
    %8 = arith.mulf %0, %7 : vector<2x32xf32>
    %c0_2 = arith.constant 0 : index
    %c0_3 = arith.constant 0 : index
    %9 = vector.load %arg1[%c0_2, %c0_3] : memref<2x32xf32, #tpu.memory_space<vmem>>, vector<2x32xf32>
    tpu.vector_store %arg1[%c0_2, %c0_3], %8 {strides = array<i32>} : memref<2x32xf32, #tpu.memory_space<vmem>>, vector<2x32xf32>,
    return
  }
}

</mosaic_0001>

<bundles_post_ra>
// kernel: image_encoder_attnpool_forward.28
= control target key start
LH: loop header
LB: loop body
LE: loop exit
PB: predicated region body
PF: predicated region fallthrough
CT: control target
= control target key end

     0   :  { %s2019_s12 = smov 0   ;;  %s2021_s13 = smov 0   ;;  %s2340_s0 = inlined_call_operand.vmem [shape: bf16[2048,256], index: 0, kind: input, shape index: {}]   ;;  %s2341_s1 = inlined_call_operand.vmem [shape: bf16[256,128], index: 1, kind: input, shape index: {}]   ;;  %s2342_s2 = inlined_call_operand.vmem [shape: f32[1,128], index: 2, kind: input, shape index: {}]   ;;  %s2343_s3 = inlined_call_operand.vmem [shape: f32[2048,128], index: 3, kind: output, shape index: {}]  }
   0x1   :  { %s2023_s14 = smov 0  }
   0x2 LB: > { %s32_s15 = sadd.s32 1, %s1992_s13  ;;  %p1715_p0 = scmp.ge.s32.totalorder %s1996_s14, 1  ;;  %s1996_s14 = sphi %s2023_s14, %s13_s14   ;;  %s1992_s13 = sphi %s2021_s13, %s2345_s13   ;;  %s1988_s12 = sphi %s2019_s12, %s2344_s12  }
   0x3   : > { %p34_p1 = scmp.ge.s32.totalorder %s32_s15, 4  ;;  %p191_p2 = scmp.lt.s32.totalorder %s1996_s14, 5 }
   0x5   : > { %s2347_s15 = smov (%p34_p1, %s32_s15), 0  ;;  %p192_p3 = pnand %p1715_p0, %p191_p2 }
   0x6   : > { %v1862_v0 = vld [vmem:[%s2341_s1] sm:$0xff] (!%p192_p3)   ;;  %v1998_v1 = vmov (!%p192_p3), 0   ;;  %s1716_s18 = sshll.u32 (!%p192_p3), %s1988_s12, 6  ;;  %v1863_v2 = vld [vmem:[%s2341_s1 + $0x8] sm:$0xff] (!%p192_p3)   ;;  %v1864_v3 = vld [vmem:[%s2341_s1 + $0x10] sm:$0xff] (!%p192_p3)  }
   0x7   : > { %195 = sbr.rel (%p192_p3) target bundleno = 410 (0x19a), region = 32  ;;  %912 = vmatprep.subr.bf16.mxu0 (!%p192_p3), %v1998_v1  ;;  %1805 = vmatprep.subr.bf16.mxu1 (!%p192_p3), %v1998_v1  ;;  %p236_p4 = scmp.lt.s32.totalorder (!%p192_p3), %s1716_s18, 255  ;;  %v1865_v4 = vld [vmem:[%s2341_s1 + $0x18] sm:$0xff] (!%p192_p3)   ;;  %v1866_v5 = vld [vmem:[%s2341_s1 + $0x20] sm:$0xff] (!%p192_p3)   ;;  %v1867_v7 = vld [vmem:[%s2341_s1 + $0x28] sm:$0xff] (!%p192_p3)  }
   0x8   : > { %913 = vmatpush1.bf16.msra.mxu0 (!%p192_p3), %v1862_v0  ;;  %1821 = vmatpush1.bf16.msra.mxu1 (!%p192_p3), %v1862_v0  ;;  %v1868_v9 = vld [vmem:[%s2341_s1 + $0x30] sm:$0xff] (!%p192_p3)   ;;  %v1869_v10 = vld [vmem:[%s2341_s1 + $0x38] sm:$0xff] (!%p192_p3)   ;;  %v1870_v11 = vld [vmem:[%s2341_s1 + $0x40] sm:$0xff] (!%p192_p3)  }
   0x9   : > { %914 = vmatprep.subr.bf16.mxu0 (!%p192_p3), %v1998_v1  ;;  %1806 = vmatprep.subr.bf16.mxu1 (!%p192_p3), %v1998_v1  ;;  %v1871_v12 = vld [vmem:[%s2341_s1 + $0x48] sm:$0xff] (!%p192_p3)   ;;  %v1872_v13 = vld [vmem:[%s2341_s1 + $0x50] sm:$0xff] (!%p192_p3)   ;;  %v1873_v14 = vld [vmem:[%s2341_s1 + $0x58] sm:$0xff] (!%p192_p3)  }
   0xa   : > { %v1874_v15 = vld [vmem:[%s2341_s1 + $0x60] sm:$0xff] (!%p192_p3)   ;;  %v1875_v16 = vld [vmem:[%s2341_s1 + $0x68] sm:$0xff] (!%p192_p3)   ;;  %v1876_v17 = vld [vmem:[%s2341_s1 + $0x70] sm:$0xff] (!%p192_p3)  }
   0xb   : > { %v1877_v18 = vld [vmem:[%s2341_s1 + $0x78] sm:$0xff] (!%p192_p3)  }
   0xc   : > { %915 = vmatpush1.bf16.msra.mxu0 (!%p192_p3), %v1863_v2  ;;  %1822 = vmatpush1.bf16.msra.mxu1 (!%p192_p3), %v1863_v2 }
   0xd   : > { %916 = vmatprep.subr.bf16.mxu0 (!%p192_p3), %v1998_v1  ;;  %1807 = vmatprep.subr.bf16.mxu1 (!%p192_p3), %v1998_v1 }
   0xe   : > { %s2349_s18 = smov (!%p236_p4, %s1716_s18), 255 }
   0xf   : > { %s1804_s25 = sshll.u32 %s2349_s18, 3 }
  0x10   : > { %917 = vmatpush1.bf16.msra.mxu0 %v1864_v3  ;;  %1823 = vmatpush1.bf16.msra.mxu1 %v1864_v3  ;;  %s2068_s30 = scalar_lea.vmem %s2340_s0, %s1804_s25 }
  0x11   : > { %918 = vmatprep.subr.bf16.mxu0 %v1998_v1  ;;  %1808 = vmatprep.subr.bf16.mxu1 %v1998_v1  ;;  %v1880_v6 = vld [vmem:[%s2068_s30 + $0x4] ss:$8 sps:$4 sm:$0xff]   ;;  %v1878_v19 = vld [vmem:[%s2068_s30] ss:$8 sps:$4 sm:$0xff]   ;;  %v1884_v21 = vld [vmem:[%s2068_s30 + $0x14] ss:$8 sps:$4 sm:$0xff]  }
  0x12   : > { %v1883_v8 = vld [vmem:[%s2068_s30 + $0x104] ss:$8 sps:$4 sm:$0xff]   ;;  %944 = vmatprep.mubr.bf16.mxu0 %v1880_v6  ;;  %v1881_v20 = vld [vmem:[%s2068_s30 + $0x100] ss:$8 sps:$4 sm:$0xff]   ;;  %v1886_v22 = vld [vmem:[%s2068_s30 + $0x114] ss:$8 sps:$4 sm:$0xff]  }
  0x13   : > { %1072 = vmatprep.mubr.bf16.mxu1 %v1883_v8  ;;  %v1888_v23 = vld [vmem:[%s2068_s30 + $0x10] ss:$8 sps:$4 sm:$0xff]   ;;  %v1890_v25 = vld [vmem:[%s2068_s30 + $0x24] ss:$8 sps:$4 sm:$0xff]   ;;  %v1894_v27 = vld [vmem:[%s2068_s30 + $0x20] ss:$8 sps:$4 sm:$0xff]  }
  0x14   : > { %919 = vmatpush1.bf16.msra.mxu0 %v1865_v4  ;;  %1824 = vmatpush1.bf16.msra.mxu1 %v1865_v4  ;;  %v1889_v24 = vld [vmem:[%s2068_s30 + $0x110] ss:$8 sps:$4 sm:$0xff]   ;;  %v1892_v26 = vld [vmem:[%s2068_s30 + $0x124] ss:$8 sps:$4 sm:$0xff]   ;;  %v1895_v28 = vld [vmem:[%s2068_s30 + $0x120] ss:$8 sps:$4 sm:$0xff]  }
  0x15   : > { %920 = vmatprep.subr.bf16.mxu0 %v1998_v1  ;;  %1809 = vmatprep.subr.bf16.mxu1 %v1998_v1  ;;  %v1896_v29 = vld [vmem:[%s2068_s30 + $0x34] ss:$8 sps:$4 sm:$0xff]   ;;  %v1900_v31 = vld [vmem:[%s2068_s30 + $0x30] ss:$8 sps:$4 sm:$0xff]   ;;  %v1902_v33 = vld [vmem:[%s2068_s30 + $0x44] ss:$8 sps:$4 sm:$0xff]  }
  0x16   : > { %v1898_v30 = vld [vmem:[%s2068_s30 + $0x134] ss:$8 sps:$4 sm:$0xff]   ;;  %v1901_v32 = vld [vmem:[%s2068_s30 + $0x130] ss:$8 sps:$4 sm:$0xff]   ;;  %v1904_v34 = vld [vmem:[%s2068_s30 + $0x144] ss:$8 sps:$4 sm:$0xff]  }
  0x17   : > { %v1906_v35 = vld [vmem:[%s2068_s30 + $0x40] ss:$8 sps:$4 sm:$0xff]   ;;  %v1908_v37 = vld [vmem:[%s2068_s30 + $0x54] ss:$8 sps:$4 sm:$0xff]   ;;  %v1912_v39 = vld [vmem:[%s2068_s30 + $0x50] ss:$8 sps:$4 sm:$0xff]  }
  0x18   : > { %921 = vmatpush1.bf16.msra.mxu0 %v1866_v5  ;;  %1825 = vmatpush1.bf16.msra.mxu1 %v1866_v5  ;;  %v1907_v36 = vld [vmem:[%s2068_s30 + $0x140] ss:$8 sps:$4 sm:$0xff]   ;;  %v1910_v38 = vld [vmem:[%s2068_s30 + $0x154] ss:$8 sps:$4 sm:$0xff]   ;;  %v1913_v40 = vld [vmem:[%s2068_s30 + $0x150] ss:$8 sps:$4 sm:$0xff]  }
  0x19   : > { %922 = vmatprep.subr.bf16.mxu0 %v1998_v1  ;;  %1810 = vmatprep.subr.bf16.mxu1 %v1998_v1  ;;  %v1914_v41 = vld [vmem:[%s2068_s30 + $0x64] ss:$8 sps:$4 sm:$0xff]   ;;  %v1918_v43 = vld [vmem:[%s2068_s30 + $0x60] ss:$8 sps:$4 sm:$0xff]   ;;  %v1920_v45 = vld [vmem:[%s2068_s30 + $0x74] ss:$8 sps:$4 sm:$0xff]  }
  0x1a   : > { %v1916_v42 = vld [vmem:[%s2068_s30 + $0x164] ss:$8 sps:$4 sm:$0xff]   ;;  %v1919_v44 = vld [vmem:[%s2068_s30 + $0x160] ss:$8 sps:$4 sm:$0xff]   ;;  %v1922_v46 = vld [vmem:[%s2068_s30 + $0x174] ss:$8 sps:$4 sm:$0xff]  }
  0x1b   : > { %v1924_v47 = vld [vmem:[%s2068_s30 + $0x70] ss:$8 sps:$4 sm:$0xff]   ;;  %v1926_v49 = vld [vmem:[%s2068_s30 + $0x84] ss:$8 sps:$4 sm:$0xff]   ;;  %v1930_v51 = vld [vmem:[%s2068_s30 + $0x80] ss:$8 sps:$4 sm:$0xff]  }
  0x1c   : > { %923 = vmatpush1.bf16.msra.mxu0 %v1867_v7  ;;  %1826 = vmatpush1.bf16.msra.mxu1 %v1867_v7  ;;  %v1925_v48 = vld [vmem:[%s2068_s30 + $0x170] ss:$8 sps:$4 sm:$0xff]   ;;  %v1928_v50 = vld [vmem:[%s2068_s30 + $0x184] ss:$8 sps:$4 sm:$0xff]   ;;  %v1931_v52 = vld [vmem:[%s2068_s30 + $0x180] ss:$8 sps:$4 sm:$0xff]  }
  0x1d   : > { %924 = vmatprep.subr.bf16.mxu0 %v1998_v1  ;;  %1811 = vmatprep.subr.bf16.mxu1 %v1998_v1  ;;  %v1932_v53 = vld [vmem:[%s2068_s30 + $0x94] ss:$8 sps:$4 sm:$0xff]   ;;  %v1936_v55 = vld [vmem:[%s2068_s30 + $0x90] ss:$8 sps:$4 sm:$0xff]   ;;  %v1938_v57 = vld [vmem:[%s2068_s30 + $0xa4] ss:$8 sps:$4 sm:$0xff]  }
  0x1e   : > { %v1934_v54 = vld [vmem:[%s2068_s30 + $0x194] ss:$8 sps:$4 sm:$0xff]   ;;  %v1937_v56 = vld [vmem:[%s2068_s30 + $0x190] ss:$8 sps:$4 sm:$0xff]   ;;  %v1940_v58 = vld [vmem:[%s2068_s30 + $0x1a4] ss:$8 sps:$4 sm:$0xff]  }
  0x1f   : > { %v1942_v59 = vld [vmem:[%s2068_s30 + $0xa0] ss:$8 sps:$4 sm:$0xff]   ;;  %v1944_v61 = vld [vmem:[%s2068_s30 + $0xb4] ss:$8 sps:$4 sm:$0xff]   ;;  %v1948_v63 = vld [vmem:[%s2068_s30 + $0xb0] ss:$8 sps:$4 sm:$0xff]  }
  0x20   : > { %925 = vmatpush1.bf16.msra.mxu0 %v1868_v9  ;;  %1827 = vmatpush1.bf16.msra.mxu1 %v1868_v9  ;;  %v1943_v60 = vld [vmem:[%s2068_s30 + $0x1a0] ss:$8 sps:$4 sm:$0xff]   ;;  %v1946_v62 = vld [vmem:[%s2068_s30 + $0x1b4] ss:$8 sps:$4 sm:$0xff]   ;;  %v1949_v0 = vld [vmem:[%s2068_s30 + $0x1b0] ss:$8 sps:$4 sm:$0xff]  }
  0x21   : > { %926 = vmatprep.subr.bf16.mxu0 %v1998_v1  ;;  %1812 = vmatprep.subr.bf16.mxu1 %v1998_v1  ;;  %v1952_v2 = vld [vmem:[%s2068_s30 + $0x1c4] ss:$8 sps:$4 sm:$0xff]   ;;  %v1954_v3 = vld [vmem:[%s2068_s30 + $0xc0] ss:$8 sps:$4 sm:$0xff]   ;;  %v1956_v5 = vld [vmem:[%s2068_s30 + $0xd4] ss:$8 sps:$4 sm:$0xff]  }
  0x22   : > { %v1955_v4 = vld [vmem:[%s2068_s30 + $0x1c0] ss:$8 sps:$4 sm:$0xff]   ;;  %v1958_v6 = vld [vmem:[%s2068_s30 + $0x1d4] ss:$8 sps:$4 sm:$0xff]   ;;  %v1960_v7 = vld [vmem:[%s2068_s30 + $0xd0] ss:$8 sps:$4 sm:$0xff]  }
  0x23   : > { %v1961_v8 = vld [vmem:[%s2068_s30 + $0x1d0] ss:$8 sps:$4 sm:$0xff]   ;;  %v1962_v9 = vld [vmem:[%s2068_s30 + $0xe4] ss:$8 sps:$4 sm:$0xff]  }
  0x24   : > { %927 = vmatpush1.bf16.msra.mxu0 %v1869_v10  ;;  %1828 = vmatpush1.bf16.msra.mxu1 %v1869_v10  ;;  %v1964_v10 = vld [vmem:[%s2068_s30 + $0x1e4] ss:$8 sps:$4 sm:$0xff]  }
  0x25   : > { %928 = vmatprep.subr.bf16.mxu0 %v1998_v1  ;;  %1813 = vmatprep.subr.bf16.mxu1 %v1998_v1 }
  0x28   : > { %929 = vmatpush1.bf16.msra.mxu0 %v1870_v11  ;;  %1829 = vmatpush1.bf16.msra.mxu1 %v1870_v11  ;;  %v1966_v11 = vld [vmem:[%s2068_s30 + $0xe0] ss:$8 sps:$4 sm:$0xff]  }
  0x29   : > { %930 = vmatprep.subr.bf16.mxu0 %v1998_v1  ;;  %1814 = vmatprep.subr.bf16.mxu1 %v1998_v1 }
  0x2c   : > { %931 = vmatpush1.bf16.msra.mxu0 %v1871_v12  ;;  %1830 = vmatpush1.bf16.msra.mxu1 %v1871_v12  ;;  %v1967_v12 = vld [vmem:[%s2068_s30 + $0x1e0] ss:$8 sps:$4 sm:$0xff]  }
  0x2d   : > { %932 = vmatprep.subr.bf16.mxu0 %v1998_v1  ;;  %1815 = vmatprep.subr.bf16.mxu1 %v1998_v1 }
  0x30   : > { %933 = vmatpush1.bf16.msra.mxu0 %v1872_v13  ;;  %1831 = vmatpush1.bf16.msra.mxu1 %v1872_v13  ;;  %v1968_v13 = vld [vmem:[%s2068_s30 + $0xf4] ss:$8 sps:$4 sm:$0xff]  }
  0x31   : > { %934 = vmatprep.subr.bf16.mxu0 %v1998_v1  ;;  %1816 = vmatprep.subr.bf16.mxu1 %v1998_v1 }
  0x34   : > { %935 = vmatpush1.bf16.msra.mxu0 %v1873_v14  ;;  %1832 = vmatpush1.bf16.msra.mxu1 %v1873_v14  ;;  %v1970_v14 = vld [vmem:[%s2068_s30 + $0x1f4] ss:$8 sps:$4 sm:$0xff]  }
  0x35   : > { %936 = vmatprep.subr.bf16.mxu0 %v1998_v1  ;;  %1817 = vmatprep.subr.bf16.mxu1 %v1998_v1 }
  0x38   : > { %937 = vmatpush1.bf16.msra.mxu0 %v1874_v15  ;;  %1833 = vmatpush1.bf16.msra.mxu1 %v1874_v15  ;;  %v1972_v15 = vld [vmem:[%s2068_s30 + $0xf0] ss:$8 sps:$4 sm:$0xff]  }
  0x39   : > { %938 = vmatprep.subr.bf16.mxu0 %v1998_v1  ;;  %1818 = vmatprep.subr.bf16.mxu1 %v1998_v1 }
  0x3c   : > { %939 = vmatpush1.bf16.msra.mxu0 %v1875_v16  ;;  %1834 = vmatpush1.bf16.msra.mxu1 %v1875_v16  ;;  %v1973_v16 = vld [vmem:[%s2068_s30 + $0x1f0] ss:$8 sps:$4 sm:$0xff]  }
  0x3d   : > { %940 = vmatprep.subr.bf16.mxu0 %v1998_v1  ;;  %1819 = vmatprep.subr.bf16.mxu1 %v1998_v1 }
  0x40   : > { %941 = vmatpush1.bf16.msra.mxu0 %v1876_v17  ;;  %1835 = vmatpush1.bf16.msra.mxu1 %v1876_v17  ;;  %v2194_v17 = vld [vmem:[%s2342_s2] ss:$0 sm:$0xff] }
  0x41   : > { %942 = vmatprep.subr.bf16.mxu0 %v1998_v1  ;;  %1820 = vmatprep.subr.bf16.mxu1 %v1998_v1  ;;  %v1950_v1 = vld [vmem:[%s2068_s30 + $0xc4] ss:$8 sps:$4 sm:$0xff]   ;;  %s2203_s30 = scalar_lea.vmem %s2343_s3, %s1804_s25 }
  0x44   : > { %943 = vmatpush1.bf16.msra.mxu0 %v1877_v18  ;;  %1836 = vmatpush1.bf16.msra.mxu1 %v1877_v18 }
  0x47   : > { %945 = vmatmul.mubr.bf16.vlgmr.msra.gmra.mrb[0].mxu0 %v1878_v19  ;;  %1073 = vmatmul.mubr.bf16.vlgmr.msra.gmra.mrb[0].mxu1 %v1881_v20 }
  0x48   : > { %952 = vmatprep.mubr.bf16.mxu0 %v1884_v21  ;;  %1080 = vmatprep.mubr.bf16.mxu1 %v1886_v22 }
  0x4f   : > { %953 = vmatmul.mubr.bf16.gmra.mrb[4].mxu0 %v1888_v23  ;;  %1081 = vmatmul.mubr.bf16.gmra.mrb[4].mxu1 %v1889_v24 }
  0x50   : > { %960 = vmatprep.mubr.bf16.mxu0 %v1890_v25  ;;  %1088 = vmatprep.mubr.bf16.mxu1 %v1892_v26 }
  0x57   : > { %961 = vmatmul.mubr.bf16.gmra.mrb[8].mxu0 %v1894_v27  ;;  %1089 = vmatmul.mubr.bf16.gmra.mrb[8].mxu1 %v1895_v28 }
  0x58   : > { %968 = vmatprep.mubr.bf16.mxu0 %v1896_v29  ;;  %1096 = vmatprep.mubr.bf16.mxu1 %v1898_v30 }
  0x5f   : > { %969 = vmatmul.mubr.bf16.gmra.mrb[12].mxu0 %v1900_v31  ;;  %1097 = vmatmul.mubr.bf16.gmra.mrb[12].mxu1 %v1901_v32 }
  0x60   : > { %976 = vmatprep.mubr.bf16.mxu0 %v1902_v33  ;;  %1104 = vmatprep.mubr.bf16.mxu1 %v1904_v34 }
  0x67   : > { %977 = vmatmul.mubr.bf16.gmra.mrb[16].mxu0 %v1906_v35  ;;  %1105 = vmatmul.mubr.bf16.gmra.mrb[16].mxu1 %v1907_v36 }
  0x68   : > { %984 = vmatprep.mubr.bf16.mxu0 %v1908_v37  ;;  %1112 = vmatprep.mubr.bf16.mxu1 %v1910_v38 }
  0x6f   : > { %985 = vmatmul.mubr.bf16.gmra.mrb[20].mxu0 %v1912_v39  ;;  %1113 = vmatmul.mubr.bf16.gmra.mrb[20].mxu1 %v1913_v40 }
  0x70   : > { %992 = vmatprep.mubr.bf16.mxu0 %v1914_v41  ;;  %1120 = vmatprep.mubr.bf16.mxu1 %v1916_v42 }
  0x77   : > { %993 = vmatmul.mubr.bf16.gmra.mrb[24].mxu0 %v1918_v43  ;;  %1121 = vmatmul.mubr.bf16.gmra.mrb[24].mxu1 %v1919_v44 }
  0x78   : > { %1000 = vmatprep.mubr.bf16.mxu0 %v1920_v45  ;;  %1128 = vmatprep.mubr.bf16.mxu1 %v1922_v46 }
  0x7f   : > { %1001 = vmatmul.mubr.bf16.gmra.mrb[28].mxu0 %v1924_v47  ;;  %1129 = vmatmul.mubr.bf16.gmra.mrb[28].mxu1 %v1925_v48 }
  0x80   : > { %1008 = vmatprep.mubr.bf16.mxu0 %v1926_v49  ;;  %1136 = vmatprep.mubr.bf16.mxu1 %v1928_v50 }
  0x87   : > { %1009 = vmatmul.mubr.bf16.gmra.mrb[32].mxu0 %v1930_v51  ;;  %1137 = vmatmul.mubr.bf16.gmra.mrb[32].mxu1 %v1931_v52 }
  0x88   : > { %1016 = vmatprep.mubr.bf16.mxu0 %v1932_v53  ;;  %1144 = vmatprep.mubr.bf16.mxu1 %v1934_v54 }
  0x8f   : > { %1017 = vmatmul.mubr.bf16.gmra.mrb[36].mxu0 %v1936_v55  ;;  %1145 = vmatmul.mubr.bf16.gmra.mrb[36].mxu1 %v1937_v56 }
  0x90   : > { %1024 = vmatprep.mubr.bf16.mxu0 %v1938_v57  ;;  %1152 = vmatprep.mubr.bf16.mxu1 %v1940_v58 }
  0x97   : > { %1025 = vmatmul.mubr.bf16.gmra.mrb[40].mxu0 %v1942_v59  ;;  %1153 = vmatmul.mubr.bf16.gmra.mrb[40].mxu1 %v1943_v60 }
  0x98   : > { %1032 = vmatprep.mubr.bf16.mxu0 %v1944_v61  ;;  %1160 = vmatprep.mubr.bf16.mxu1 %v1946_v62 }
  0x9f   : > { %1033 = vmatmul.mubr.bf16.gmra.mrb[44].mxu0 %v1948_v63  ;;  %1161 = vmatmul.mubr.bf16.gmra.mrb[44].mxu1 %v1949_v0 }
  0xa0   : > { %1040 = vmatprep.mubr.bf16.mxu0 %v1950_v1  ;;  %1168 = vmatprep.mubr.bf16.mxu1 %v1952_v2 }
  0xa7   : > { %1041 = vmatmul.mubr.bf16.gmra.mrb[48].mxu0 %v1954_v3  ;;  %1169 = vmatmul.mubr.bf16.gmra.mrb[48].mxu1 %v1955_v4 }
  0xa8   : > { %1048 = vmatprep.mubr.bf16.mxu0 %v1956_v5  ;;  %1176 = vmatprep.mubr.bf16.mxu1 %v1958_v6 }
  0xaf   : > { %1049 = vmatmul.mubr.bf16.gmra.mrb[52].mxu0 %v1960_v7  ;;  %1177 = vmatmul.mubr.bf16.gmra.mrb[52].mxu1 %v1961_v8 }
  0xb0   : > { %1056 = vmatprep.mubr.bf16.mxu0 %v1962_v9  ;;  %1184 = vmatprep.mubr.bf16.mxu1 %v1964_v10 }
  0xb7   : > { %1057 = vmatmul.mubr.bf16.gmra.mrb[56].mxu0 %v1966_v11  ;;  %1185 = vmatmul.mubr.bf16.gmra.mrb[56].mxu1 %v1967_v12 }
  0xb8   : > { %1064 = vmatprep.mubr.bf16.mxu0 %v1968_v13  ;;  %1192 = vmatprep.mubr.bf16.mxu1 %v1970_v14 }
  0xbf   : > { %1065 = vmatmul.mubr.bf16.gmra.mrb[60].mxu0 %v1972_v15  ;;  %1193 = vmatmul.mubr.bf16.gmra.mrb[60].mxu1 %v1973_v16 }
 0x11a   : > { %v946_v18 = vpop.f32.mrb[0].mxu0  ;;  %v1074_v19 = vpop.f32.mrb[0].mxu1 }
 0x11b   : > { %v1403_v20 = vadd.f32 %v2194_v17, %v946_v18  ;;  %v1435_v21 = vadd.f32 %v2194_v17, %v1074_v19  ;;  %v948_v22 = vpop.f32.mrb[1].mxu0  ;;  %v1076_v23 = vpop.f32.mrb[1].mxu1 }
 0x11c   : > { %v949_v24 = vpop.f32.mrb[2].mxu0  ;;  %v1077_v25 = vpop.f32.mrb[2].mxu1 }
 0x11d   : > { %v1467_v26 = vmax.f32 %v1403_v20, 0.0  ;;  %v1499_v27 = vmax.f32 %v1435_v21, 0.0  ;;  %v1404_v28 = vadd.f32 %v2194_v17, %v949_v24  ;;  %v1436_v29 = vadd.f32 %v2194_v17, %v1077_v25  ;;  %v951_v30 = vpop.f32.mrb[3].mxu0  ;;  %v1079_v31 = vpop.f32.mrb[3].mxu1 }
 0x11f   : > { %1531 = vst [vmem:[%s2203_s30] sm:$0xff] %v1467_v26  ;;  %1563 = vst [vmem:[%s2203_s30 + $0x100] sm:$0xff] %v1499_v27  ;;  %v1468_v32 = vmax.f32 %v1404_v28, 0.0  ;;  %v1500_v33 = vmax.f32 %v1436_v29, 0.0 }
 0x121   : > { %1532 = vst [vmem:[%s2203_s30 + $0x8] sm:$0xff] %v1468_v32  ;;  %1564 = vst [vmem:[%s2203_s30 + $0x108] sm:$0xff] %v1500_v33 }
 0x122   : > { %v954_v34 = vpop.f32.mrb[4].mxu0  ;;  %v1082_v35 = vpop.f32.mrb[4].mxu1 }
 0x123   : > { %v1405_v36 = vadd.f32 %v2194_v17, %v954_v34  ;;  %v1437_v37 = vadd.f32 %v2194_v17, %v1082_v35  ;;  %v956_v38 = vpop.f32.mrb[5].mxu0  ;;  %v1084_v39 = vpop.f32.mrb[5].mxu1 }
 0x124   : > { %v957_v40 = vpop.f32.mrb[6].mxu0  ;;  %v1085_v41 = vpop.f32.mrb[6].mxu1 }
 0x125   : > { %v1469_v42 = vmax.f32 %v1405_v36, 0.0  ;;  %v1501_v43 = vmax.f32 %v1437_v37, 0.0  ;;  %v1406_v44 = vadd.f32 %v2194_v17, %v957_v40  ;;  %v1438_v45 = vadd.f32 %v2194_v17, %v1085_v41  ;;  %v959_v46 = vpop.f32.mrb[7].mxu0  ;;  %v1087_v47 = vpop.f32.mrb[7].mxu1 }
 0x127   : > { %1533 = vst [vmem:[%s2203_s30 + $0x10] sm:$0xff] %v1469_v42  ;;  %1565 = vst [vmem:[%s2203_s30 + $0x110] sm:$0xff] %v1501_v43  ;;  %v1470_v48 = vmax.f32 %v1406_v44, 0.0  ;;  %v1502_v49 = vmax.f32 %v1438_v45, 0.0 }
 0x129   : > { %1534 = vst [vmem:[%s2203_s30 + $0x18] sm:$0xff] %v1470_v48  ;;  %1566 = vst [vmem:[%s2203_s30 + $0x118] sm:$0xff] %v1502_v49 }
 0x12a   : > { %v962_v50 = vpop.f32.mrb[8].mxu0  ;;  %v1090_v51 = vpop.f32.mrb[8].mxu1 }
 0x12b   : > { %v1407_v52 = vadd.f32 %v2194_v17, %v962_v50  ;;  %v1439_v53 = vadd.f32 %v2194_v17, %v1090_v51  ;;  %v964_v54 = vpop.f32.mrb[9].mxu0  ;;  %v1092_v55 = vpop.f32.mrb[9].mxu1 }
 0x12c   : > { %v965_v56 = vpop.f32.mrb[10].mxu0  ;;  %v1093_v57 = vpop.f32.mrb[10].mxu1 }
 0x12d   : > { %v1471_v58 = vmax.f32 %v1407_v52, 0.0  ;;  %v1503_v59 = vmax.f32 %v1439_v53, 0.0  ;;  %v1408_v60 = vadd.f32 %v2194_v17, %v965_v56  ;;  %v1440_v61 = vadd.f32 %v2194_v17, %v1093_v57  ;;  %v967_v62 = vpop.f32.mrb[11].mxu0  ;;  %v1095_v63 = vpop.f32.mrb[11].mxu1 }
 0x12f   : > { %1535 = vst [vmem:[%s2203_s30 + $0x20] sm:$0xff] %v1471_v58  ;;  %1567 = vst [vmem:[%s2203_s30 + $0x120] sm:$0xff] %v1503_v59  ;;  %v1472_v0 = vmax.f32 %v1408_v60, 0.0  ;;  %v1504_v1 = vmax.f32 %v1440_v61, 0.0 }
 0x131   : > { %1536 = vst [vmem:[%s2203_s30 + $0x28] sm:$0xff] %v1472_v0  ;;  %1568 = vst [vmem:[%s2203_s30 + $0x128] sm:$0xff] %v1504_v1 }
 0x132   : > { %v970_v2 = vpop.f32.mrb[12].mxu0  ;;  %v1098_v3 = vpop.f32.mrb[12].mxu1 }
 0x133   : > { %v1409_v4 = vadd.f32 %v2194_v17, %v970_v2  ;;  %v1441_v5 = vadd.f32 %v2194_v17, %v1098_v3  ;;  %v972_v6 = vpop.f32.mrb[13].mxu0  ;;  %v1100_v7 = vpop.f32.mrb[13].mxu1 }
 0x134   : > { %v973_v8 = vpop.f32.mrb[14].mxu0  ;;  %v1101_v9 = vpop.f32.mrb[14].mxu1 }
 0x135   : > { %v1473_v10 = vmax.f32 %v1409_v4, 0.0  ;;  %v1505_v11 = vmax.f32 %v1441_v5, 0.0  ;;  %v1410_v12 = vadd.f32 %v2194_v17, %v973_v8  ;;  %v1442_v13 = vadd.f32 %v2194_v17, %v1101_v9  ;;  %v975_v14 = vpop.f32.mrb[15].mxu0  ;;  %v1103_v15 = vpop.f32.mrb[15].mxu1 }
 0x137   : > { %1537 = vst [vmem:[%s2203_s30 + $0x30] sm:$0xff] %v1473_v10  ;;  %1569 = vst [vmem:[%s2203_s30 + $0x130] sm:$0xff] %v1505_v11  ;;  %v1474_v16 = vmax.f32 %v1410_v12, 0.0  ;;  %v1506_v18 = vmax.f32 %v1442_v13, 0.0 }
 0x139   : > { %1538 = vst [vmem:[%s2203_s30 + $0x38] sm:$0xff] %v1474_v16  ;;  %1570 = vst [vmem:[%s2203_s30 + $0x138] sm:$0xff] %v1506_v18 }
 0x13a   : > { %v978_v19 = vpop.f32.mrb[16].mxu0  ;;  %v1106_v20 = vpop.f32.mrb[16].mxu1 }
 0x13b   : > { %v1411_v21 = vadd.f32 %v2194_v17, %v978_v19  ;;  %v1443_v22 = vadd.f32 %v2194_v17, %v1106_v20  ;;  %v980_v23 = vpop.f32.mrb[17].mxu0  ;;  %v1108_v24 = vpop.f32.mrb[17].mxu1 }
 0x13c   : > { %v981_v25 = vpop.f32.mrb[18].mxu0  ;;  %v1109_v26 = vpop.f32.mrb[18].mxu1 }
 0x13d   : > { %v1475_v27 = vmax.f32 %v1411_v21, 0.0  ;;  %v1507_v28 = vmax.f32 %v1443_v22, 0.0  ;;  %v1412_v29 = vadd.f32 %v2194_v17, %v981_v25  ;;  %v1444_v30 = vadd.f32 %v2194_v17, %v1109_v26  ;;  %v983_v31 = vpop.f32.mrb[19].mxu0  ;;  %v1111_v32 = vpop.f32.mrb[19].mxu1 }
 0x13f   : > { %1539 = vst [vmem:[%s2203_s30 + $0x40] sm:$0xff] %v1475_v27  ;;  %1571 = vst [vmem:[%s2203_s30 + $0x140] sm:$0xff] %v1507_v28  ;;  %v1476_v33 = vmax.f32 %v1412_v29, 0.0  ;;  %v1508_v34 = vmax.f32 %v1444_v30, 0.0 }
 0x141   : > { %1540 = vst [vmem:[%s2203_s30 + $0x48] sm:$0xff] %v1476_v33  ;;  %1572 = vst [vmem:[%s2203_s30 + $0x148] sm:$0xff] %v1508_v34 }
 0x142   : > { %v986_v35 = vpop.f32.mrb[20].mxu0  ;;  %v1114_v36 = vpop.f32.mrb[20].mxu1 }
 0x143   : > { %v1413_v37 = vadd.f32 %v2194_v17, %v986_v35  ;;  %v1445_v38 = vadd.f32 %v2194_v17, %v1114_v36  ;;  %v988_v39 = vpop.f32.mrb[21].mxu0  ;;  %v1116_v40 = vpop.f32.mrb[21].mxu1 }
 0x144   : > { %v989_v41 = vpop.f32.mrb[22].mxu0  ;;  %v1117_v42 = vpop.f32.mrb[22].mxu1 }
 0x145   : > { %v1477_v43 = vmax.f32 %v1413_v37, 0.0  ;;  %v1509_v44 = vmax.f32 %v1445_v38, 0.0  ;;  %v1414_v45 = vadd.f32 %v2194_v17, %v989_v41  ;;  %v1446_v46 = vadd.f32 %v2194_v17, %v1117_v42  ;;  %v991_v47 = vpop.f32.mrb[23].mxu0  ;;  %v1119_v48 = vpop.f32.mrb[23].mxu1 }
 0x147   : > { %1541 = vst [vmem:[%s2203_s30 + $0x50] sm:$0xff] %v1477_v43  ;;  %1573 = vst [vmem:[%s2203_s30 + $0x150] sm:$0xff] %v1509_v44  ;;  %v1478_v49 = vmax.f32 %v1414_v45, 0.0  ;;  %v1510_v50 = vmax.f32 %v1446_v46, 0.0 }
 0x149   : > { %1542 = vst [vmem:[%s2203_s30 + $0x58] sm:$0xff] %v1478_v49  ;;  %1574 = vst [vmem:[%s2203_s30 + $0x158] sm:$0xff] %v1510_v50 }
 0x14a   : > { %v994_v51 = vpop.f32.mrb[24].mxu0  ;;  %v1122_v52 = vpop.f32.mrb[24].mxu1 }
 0x14b   : > { %v1415_v53 = vadd.f32 %v2194_v17, %v994_v51  ;;  %v1447_v54 = vadd.f32 %v2194_v17, %v1122_v52  ;;  %v996_v55 = vpop.f32.mrb[25].mxu0  ;;  %v1124_v56 = vpop.f32.mrb[25].mxu1 }
 0x14c   : > { %v997_v57 = vpop.f32.mrb[26].mxu0  ;;  %v1125_v58 = vpop.f32.mrb[26].mxu1 }
 0x14d   : > { %v1479_v59 = vmax.f32 %v1415_v53, 0.0  ;;  %v1511_v60 = vmax.f32 %v1447_v54, 0.0  ;;  %v1416_v61 = vadd.f32 %v2194_v17, %v997_v57  ;;  %v1448_v62 = vadd.f32 %v2194_v17, %v1125_v58  ;;  %v999_v63 = vpop.f32.mrb[27].mxu0  ;;  %v1127_v0 = vpop.f32.mrb[27].mxu1 }
 0x14f   : > { %1543 = vst [vmem:[%s2203_s30 + $0x60] sm:$0xff] %v1479_v59  ;;  %1575 = vst [vmem:[%s2203_s30 + $0x160] sm:$0xff] %v1511_v60  ;;  %v1480_v1 = vmax.f32 %v1416_v61, 0.0  ;;  %v1512_v2 = vmax.f32 %v1448_v62, 0.0 }
 0x151   : > { %1544 = vst [vmem:[%s2203_s30 + $0x68] sm:$0xff] %v1480_v1  ;;  %1576 = vst [vmem:[%s2203_s30 + $0x168] sm:$0xff] %v1512_v2 }
 0x152   : > { %v1002_v3 = vpop.f32.mrb[28].mxu0  ;;  %v1130_v4 = vpop.f32.mrb[28].mxu1 }
 0x153   : > { %v1417_v5 = vadd.f32 %v2194_v17, %v1002_v3  ;;  %v1449_v6 = vadd.f32 %v2194_v17, %v1130_v4  ;;  %v1004_v7 = vpop.f32.mrb[29].mxu0  ;;  %v1132_v8 = vpop.f32.mrb[29].mxu1 }
 0x154   : > { %v1005_v9 = vpop.f32.mrb[30].mxu0  ;;  %v1133_v10 = vpop.f32.mrb[30].mxu1 }
 0x155   : > { %v1481_v11 = vmax.f32 %v1417_v5, 0.0  ;;  %v1513_v12 = vmax.f32 %v1449_v6, 0.0  ;;  %v1418_v13 = vadd.f32 %v2194_v17, %v1005_v9  ;;  %v1450_v14 = vadd.f32 %v2194_v17, %v1133_v10  ;;  %v1007_v15 = vpop.f32.mrb[31].mxu0  ;;  %v1135_v16 = vpop.f32.mrb[31].mxu1 }
 0x157   : > { %1545 = vst [vmem:[%s2203_s30 + $0x70] sm:$0xff] %v1481_v11  ;;  %1577 = vst [vmem:[%s2203_s30 + $0x170] sm:$0xff] %v1513_v12  ;;  %v1482_v18 = vmax.f32 %v1418_v13, 0.0  ;;  %v1514_v19 = vmax.f32 %v1450_v14, 0.0 }
 0x159   : > { %1546 = vst [vmem:[%s2203_s30 + $0x78] sm:$0xff] %v1482_v18  ;;  %1578 = vst [vmem:[%s2203_s30 + $0x178] sm:$0xff] %v1514_v19 }
 0x15a   : > { %v1010_v20 = vpop.f32.mrb[32].mxu0  ;;  %v1138_v21 = vpop.f32.mrb[32].mxu1 }
 0x15b   : > { %v1419_v22 = vadd.f32 %v2194_v17, %v1010_v20  ;;  %v1451_v23 = vadd.f32 %v2194_v17, %v1138_v21  ;;  %v1012_v24 = vpop.f32.mrb[33].mxu0  ;;  %v1140_v25 = vpop.f32.mrb[33].mxu1 }
 0x15c   : > { %v1013_v26 = vpop.f32.mrb[34].mxu0  ;;  %v1141_v27 = vpop.f32.mrb[34].mxu1 }
 0x15d   : > { %v1483_v28 = vmax.f32 %v1419_v22, 0.0  ;;  %v1515_v29 = vmax.f32 %v1451_v23, 0.0  ;;  %v1420_v30 = vadd.f32 %v2194_v17, %v1013_v26  ;;  %v1452_v31 = vadd.f32 %v2194_v17, %v1141_v27  ;;  %v1015_v32 = vpop.f32.mrb[35].mxu0  ;;  %v1143_v33 = vpop.f32.mrb[35].mxu1 }
 0x15f   : > { %1547 = vst [vmem:[%s2203_s30 + $0x80] sm:$0xff] %v1483_v28  ;;  %1579 = vst [vmem:[%s2203_s30 + $0x180] sm:$0xff] %v1515_v29  ;;  %v1484_v34 = vmax.f32 %v1420_v30, 0.0  ;;  %v1516_v35 = vmax.f32 %v1452_v31, 0.0 }
 0x161   : > { %1548 = vst [vmem:[%s2203_s30 + $0x88] sm:$0xff] %v1484_v34  ;;  %1580 = vst [vmem:[%s2203_s30 + $0x188] sm:$0xff] %v1516_v35 }
 0x162   : > { %v1018_v36 = vpop.f32.mrb[36].mxu0  ;;  %v1146_v37 = vpop.f32.mrb[36].mxu1 }
 0x163   : > { %v1421_v38 = vadd.f32 %v2194_v17, %v1018_v36  ;;  %v1453_v39 = vadd.f32 %v2194_v17, %v1146_v37  ;;  %v1020_v40 = vpop.f32.mrb[37].mxu0  ;;  %v1148_v41 = vpop.f32.mrb[37].mxu1 }
 0x164   : > { %v1021_v42 = vpop.f32.mrb[38].mxu0  ;;  %v1149_v43 = vpop.f32.mrb[38].mxu1 }
 0x165   : > { %v1485_v44 = vmax.f32 %v1421_v38, 0.0  ;;  %v1517_v45 = vmax.f32 %v1453_v39, 0.0  ;;  %v1422_v46 = vadd.f32 %v2194_v17, %v1021_v42  ;;  %v1454_v47 = vadd.f32 %v2194_v17, %v1149_v43  ;;  %v1023_v48 = vpop.f32.mrb[39].mxu0  ;;  %v1151_v49 = vpop.f32.mrb[39].mxu1 }
 0x167   : > { %1549 = vst [vmem:[%s2203_s30 + $0x90] sm:$0xff] %v1485_v44  ;;  %1581 = vst [vmem:[%s2203_s30 + $0x190] sm:$0xff] %v1517_v45  ;;  %v1486_v50 = vmax.f32 %v1422_v46, 0.0  ;;  %v1518_v51 = vmax.f32 %v1454_v47, 0.0 }
 0x169   : > { %1550 = vst [vmem:[%s2203_s30 + $0x98] sm:$0xff] %v1486_v50  ;;  %1582 = vst [vmem:[%s2203_s30 + $0x198] sm:$0xff] %v1518_v51 }
 0x16a   : > { %v1026_v52 = vpop.f32.mrb[40].mxu0  ;;  %v1154_v53 = vpop.f32.mrb[40].mxu1 }
 0x16b   : > { %v1423_v54 = vadd.f32 %v2194_v17, %v1026_v52  ;;  %v1455_v55 = vadd.f32 %v2194_v17, %v1154_v53  ;;  %v1028_v56 = vpop.f32.mrb[41].mxu0  ;;  %v1156_v57 = vpop.f32.mrb[41].mxu1 }
 0x16c   : > { %v1029_v58 = vpop.f32.mrb[42].mxu0  ;;  %v1157_v59 = vpop.f32.mrb[42].mxu1 }
 0x16d   : > { %v1487_v60 = vmax.f32 %v1423_v54, 0.0  ;;  %v1519_v61 = vmax.f32 %v1455_v55, 0.0  ;;  %v1424_v62 = vadd.f32 %v2194_v17, %v1029_v58  ;;  %v1456_v63 = vadd.f32 %v2194_v17, %v1157_v59  ;;  %v1031_v0 = vpop.f32.mrb[43].mxu0  ;;  %v1159_v1 = vpop.f32.mrb[43].mxu1 }
 0x16f   : > { %1551 = vst [vmem:[%s2203_s30 + $0xa0] sm:$0xff] %v1487_v60  ;;  %1583 = vst [vmem:[%s2203_s30 + $0x1a0] sm:$0xff] %v1519_v61  ;;  %v1488_v2 = vmax.f32 %v1424_v62, 0.0  ;;  %v1520_v3 = vmax.f32 %v1456_v63, 0.0 }
 0x171   : > { %1552 = vst [vmem:[%s2203_s30 + $0xa8] sm:$0xff] %v1488_v2  ;;  %1584 = vst [vmem:[%s2203_s30 + $0x1a8] sm:$0xff] %v1520_v3 }
 0x172   : > { %v1034_v4 = vpop.f32.mrb[44].mxu0  ;;  %v1162_v5 = vpop.f32.mrb[44].mxu1 }
 0x173   : > { %v1425_v6 = vadd.f32 %v2194_v17, %v1034_v4  ;;  %v1457_v7 = vadd.f32 %v2194_v17, %v1162_v5  ;;  %v1036_v8 = vpop.f32.mrb[45].mxu0  ;;  %v1164_v9 = vpop.f32.mrb[45].mxu1 }
 0x174   : > { %v1037_v10 = vpop.f32.mrb[46].mxu0  ;;  %v1165_v11 = vpop.f32.mrb[46].mxu1 }
 0x175   : > { %v1489_v12 = vmax.f32 %v1425_v6, 0.0  ;;  %v1521_v13 = vmax.f32 %v1457_v7, 0.0  ;;  %v1426_v14 = vadd.f32 %v2194_v17, %v1037_v10  ;;  %v1458_v15 = vadd.f32 %v2194_v17, %v1165_v11  ;;  %v1039_v16 = vpop.f32.mrb[47].mxu0  ;;  %v1167_v18 = vpop.f32.mrb[47].mxu1 }
 0x177   : > { %1553 = vst [vmem:[%s2203_s30 + $0xb0] sm:$0xff] %v1489_v12  ;;  %1585 = vst [vmem:[%s2203_s30 + $0x1b0] sm:$0xff] %v1521_v13  ;;  %v1490_v19 = vmax.f32 %v1426_v14, 0.0  ;;  %v1522_v20 = vmax.f32 %v1458_v15, 0.0 }
 0x179   : > { %1554 = vst [vmem:[%s2203_s30 + $0xb8] sm:$0xff] %v1490_v19  ;;  %1586 = vst [vmem:[%s2203_s30 + $0x1b8] sm:$0xff] %v1522_v20 }
 0x17a   : > { %v1042_v21 = vpop.f32.mrb[48].mxu0  ;;  %v1170_v22 = vpop.f32.mrb[48].mxu1 }
 0x17b   : > { %v1427_v23 = vadd.f32 %v2194_v17, %v1042_v21  ;;  %v1459_v24 = vadd.f32 %v2194_v17, %v1170_v22  ;;  %v1044_v25 = vpop.f32.mrb[49].mxu0  ;;  %v1172_v26 = vpop.f32.mrb[49].mxu1 }
 0x17c   : > { %v1045_v27 = vpop.f32.mrb[50].mxu0  ;;  %v1173_v28 = vpop.f32.mrb[50].mxu1 }
 0x17d   : > { %v1491_v29 = vmax.f32 %v1427_v23, 0.0  ;;  %v1523_v30 = vmax.f32 %v1459_v24, 0.0  ;;  %v1428_v31 = vadd.f32 %v2194_v17, %v1045_v27  ;;  %v1460_v32 = vadd.f32 %v2194_v17, %v1173_v28  ;;  %v1047_v33 = vpop.f32.mrb[51].mxu0  ;;  %v1175_v34 = vpop.f32.mrb[51].mxu1 }
 0x17f   : > { %1555 = vst [vmem:[%s2203_s30 + $0xc0] sm:$0xff] %v1491_v29  ;;  %1587 = vst [vmem:[%s2203_s30 + $0x1c0] sm:$0xff] %v1523_v30  ;;  %v1492_v35 = vmax.f32 %v1428_v31, 0.0  ;;  %v1524_v36 = vmax.f32 %v1460_v32, 0.0 }
 0x181   : > { %1556 = vst [vmem:[%s2203_s30 + $0xc8] sm:$0xff] %v1492_v35  ;;  %1588 = vst [vmem:[%s2203_s30 + $0x1c8] sm:$0xff] %v1524_v36 }
 0x182   : > { %v1050_v37 = vpop.f32.mrb[52].mxu0  ;;  %v1178_v38 = vpop.f32.mrb[52].mxu1 }
 0x183   : > { %v1429_v39 = vadd.f32 %v2194_v17, %v1050_v37  ;;  %v1461_v40 = vadd.f32 %v2194_v17, %v1178_v38  ;;  %v1052_v41 = vpop.f32.mrb[53].mxu0  ;;  %v1180_v42 = vpop.f32.mrb[53].mxu1 }
 0x184   : > { %v1053_v43 = vpop.f32.mrb[54].mxu0  ;;  %v1181_v44 = vpop.f32.mrb[54].mxu1 }
 0x185   : > { %v1493_v45 = vmax.f32 %v1429_v39, 0.0  ;;  %v1525_v46 = vmax.f32 %v1461_v40, 0.0  ;;  %v1430_v47 = vadd.f32 %v2194_v17, %v1053_v43  ;;  %v1462_v48 = vadd.f32 %v2194_v17, %v1181_v44  ;;  %v1055_v49 = vpop.f32.mrb[55].mxu0  ;;  %v1183_v50 = vpop.f32.mrb[55].mxu1 }
 0x187   : > { %1557 = vst [vmem:[%s2203_s30 + $0xd0] sm:$0xff] %v1493_v45  ;;  %1589 = vst [vmem:[%s2203_s30 + $0x1d0] sm:$0xff] %v1525_v46  ;;  %v1494_v51 = vmax.f32 %v1430_v47, 0.0  ;;  %v1526_v52 = vmax.f32 %v1462_v48, 0.0 }
 0x189   : > { %1558 = vst [vmem:[%s2203_s30 + $0xd8] sm:$0xff] %v1494_v51  ;;  %1590 = vst [vmem:[%s2203_s30 + $0x1d8] sm:$0xff] %v1526_v52 }
 0x18a   : > { %v1058_v53 = vpop.f32.mrb[56].mxu0  ;;  %v1186_v54 = vpop.f32.mrb[56].mxu1 }
 0x18b   : > { %v1431_v55 = vadd.f32 %v2194_v17, %v1058_v53  ;;  %v1463_v56 = vadd.f32 %v2194_v17, %v1186_v54  ;;  %v1060_v57 = vpop.f32.mrb[57].mxu0  ;;  %v1188_v58 = vpop.f32.mrb[57].mxu1 }
 0x18c   : > { %v1061_v59 = vpop.f32.mrb[58].mxu0  ;;  %v1189_v60 = vpop.f32.mrb[58].mxu1 }
 0x18d   : > { %v1495_v61 = vmax.f32 %v1431_v55, 0.0  ;;  %v1527_v62 = vmax.f32 %v1463_v56, 0.0  ;;  %v1432_v63 = vadd.f32 %v2194_v17, %v1061_v59  ;;  %v1464_v0 = vadd.f32 %v2194_v17, %v1189_v60  ;;  %v1063_v1 = vpop.f32.mrb[59].mxu0  ;;  %v1191_v2 = vpop.f32.mrb[59].mxu1 }
 0x18f   : > { %1559 = vst [vmem:[%s2203_s30 + $0xe0] sm:$0xff] %v1495_v61  ;;  %1591 = vst [vmem:[%s2203_s30 + $0x1e0] sm:$0xff] %v1527_v62  ;;  %v1496_v3 = vmax.f32 %v1432_v63, 0.0  ;;  %v1528_v4 = vmax.f32 %v1464_v0, 0.0 }
 0x191   : > { %1560 = vst [vmem:[%s2203_s30 + $0xe8] sm:$0xff] %v1496_v3  ;;  %1592 = vst [vmem:[%s2203_s30 + $0x1e8] sm:$0xff] %v1528_v4 }
 0x192   : > { %v1066_v5 = vpop.f32.mrb[60].mxu0  ;;  %v1194_v6 = vpop.f32.mrb[60].mxu1 }
 0x193   : > { %v1433_v7 = vadd.f32 %v2194_v17, %v1066_v5  ;;  %v1465_v8 = vadd.f32 %v2194_v17, %v1194_v6  ;;  %v1068_v9 = vpop.f32.mrb[61].mxu0  ;;  %v1196_v10 = vpop.f32.mrb[61].mxu1 }
 0x194   : > { %v1069_v11 = vpop.f32.mrb[62].mxu0  ;;  %v1197_v12 = vpop.f32.mrb[62].mxu1 }
 0x195   : > { %v1497_v13 = vmax.f32 %v1433_v7, 0.0  ;;  %v1529_v14 = vmax.f32 %v1465_v8, 0.0  ;;  %v1434_v15 = vadd.f32 %v2194_v17, %v1069_v11  ;;  %v1466_v16 = vadd.f32 %v2194_v17, %v1197_v12  ;;  %v1071_v18 = vpop.f32.mrb[63].mxu0  ;;  %v1199_v19 = vpop.f32.mrb[63].mxu1 }
 0x197   : > { %1561 = vst [vmem:[%s2203_s30 + $0xf0] sm:$0xff] %v1497_v13  ;;  %1593 = vst [vmem:[%s2203_s30 + $0x1f0] sm:$0xff] %v1529_v14  ;;  %v1498_v20 = vmax.f32 %v1434_v15, 0.0  ;;  %v1530_v21 = vmax.f32 %v1466_v16, 0.0 }
 0x199   : > { %1562 = vst [vmem:[%s2203_s30 + $0xf8] sm:$0xff] %v1498_v20  ;;  %1594 = vst [vmem:[%s2203_s30 + $0x1f8] sm:$0xff] %v1530_v21 }
 0x19a PF: > { %s13_s14 = sadd.s32 1, %s1996_s14   ;;  %s2344_s12 = smov %s1992_s13 }
 0x19b   : > { %p10_p5 = scmp.ge.s32.totalorder %s13_s14, 6   ;;  %s2345_s13 = smov %s2347_s15 }
 0x19d   :  { %12 = sbr.rel (!%p10_p5) target bundleno = 2 (0x2), region = 76 }

// kernel: image_encoder_attnpool_forward.29
= control target key start
LH: loop header
LB: loop body
LE: loop exit
PB: predicated region body
PF: predicated region fallthrough
CT: control target
= control target key end

     0   :  { %s295_s6 = smov 0   ;;  %s297_s7 = smov 0   ;;  %s331_s0 = inlined_call_operand.vmem [shape: f32[9,1,2048], index: 0, kind: input, shape index: {}]   ;;  %s332_s1 = inlined_call_operand.vmem [shape: f32[1,2048], index: 1, kind: output, shape index: {}]  }
   0x1   :  { %s299_s8 = smov 0  }
   0x2 LB: > { %s20_s9 = sadd.s32 1, %s278_s7  ;;  %p228_p0 = scmp.ge.s32.totalorder %s282_s8, 1  ;;  %s282_s8 = sphi %s299_s8, %s11_s8   ;;  %s278_s7 = sphi %s297_s7, %s334_s7   ;;  %s274_s6 = sphi %s295_s6, %s333_s6  }
   0x3   : > { %p21_p1 = scmp.ge.s32.totalorder %s20_s9, 9  ;;  %p104_p2 = scmp.lt.s32.totalorder %s282_s8, 10 }
   0x5   : > { %s336_s9 = smov (%p21_p1, %s20_s9), 0  ;;  %p105_p3 = pnand %p228_p0, %p104_p2 }
   0x6   : > { %p126_p4 = scmp.lt.s32.totalorder (!%p105_p3), %s274_s6, 8  ;;  %p230_p5 = scmp.ne.s32.totalorder (!%p105_p3), %s274_s6, 0 }
   0x7   : > { %108 = sbr.rel (%p105_p3) target bundleno = 35 (0x23), region = 24 }
   0xe   : > { %s127_s10 = scalar_select %p126_p4, %s274_s6, 8 }
   0xf   : > { %141 = sbr.rel (%p230_p5) target bundleno = 22 (0x16), region = 28  ;;  %v284_v0 = vmov (!%p230_p5), -inf  }
  0x10   : > { %s229_s11 = sshll.u32 %s127_s10, 4  ;;  %142 = vst [vmem:[#allocation2] sm:$0xff] (!%p230_p5), %v284_v0  ;;  %143 = vst [vmem:[#allocation2 + $0x8] sm:$0xff] (!%p230_p5), %v284_v0 }
  0x11   : > { %s133_s14 = scalar_lea.vmem %s331_s0, %s229_s11 }
  0x16 PF: > { %v146_v2 = vld [vmem:[%s133_s14] sm:$0xff]  ;;  %v147_v5 = vld [vmem:[%s133_s14 + $0x8] sm:$0xff]  ;;  %p231_p6 = scmp.ne.s32.totalorder %s274_s6, 8 }
  0x17   : > { %v144_v1 = vld [vmem:[#allocation2] sm:$0xff]  ;;  %v145_v3 = vld [vmem:[#allocation2 + $0x8] sm:$0xff] }
  0x18   : > { %v148_v4 = vmax.f32 %v144_v1, %v146_v2  ;;  %v149_v6 = vmax.f32 %v145_v3, %v147_v5  ;;  %155 = sbr.rel (%p231_p6) target bundleno = 35 (0x23), region = 32 }
  0x1a   : > { %150 = vst [vmem:[#allocation2] sm:$0xff] %v148_v4  ;;  %151 = vst [vmem:[#allocation2 + $0x8] sm:$0xff] %v149_v6 }
  0x21   : > { %v156_v7 = vld [vmem:[#allocation2] sm:$0xff]  ;;  %v157_v8 = vld [vmem:[#allocation2 + $0x8] sm:$0xff] }
  0x22   : > { %158 = vst [vmem:[%s332_s1] sm:$0xff] %v156_v7  ;;  %159 = vst [vmem:[%s332_s1 + $0x8] sm:$0xff] %v157_v8 }
  0x23 PF: > { %s11_s8 = sadd.s32 1, %s282_s8   ;;  %s333_s6 = smov %s278_s7 }
  0x24   : > { %p8_p7 = scmp.ge.s32.totalorder %s11_s8, 11   ;;  %s334_s7 = smov %s336_s9 }
  0x26   :  { %10 = sbr.rel (!%p8_p7) target bundleno = 2 (0x2), region = 62 }

// kernel: image_encoder_attnpool_forward.30
= control target key start
LH: loop header
LB: loop body
LE: loop exit
PB: predicated region body
PF: predicated region fallthrough
CT: control target
= control target key end

     0   :  { %s1772_s1 = inlined_call_operand.vmem [shape: bf16[128,128], index: 1, kind: input, shape index: {}]   ;;  %s1773_s0 = inlined_call_operand.vmem [shape: bf16[512,128], index: 0, kind: input, shape index: {}]   ;;  %s1774_s2 = inlined_call_operand.vmem [shape: f32[1,128], index: 2, kind: input, shape index: {}]   ;;  %s1775_s3 = inlined_call_operand.vmem [shape: f32[512,128], index: 3, kind: output, shape index: {}]  }
   0x1   :  { %v1331_v0 = vld [vmem:[%s1772_s1] sm:$0xff]   ;;  %v1332_v1 = vld [vmem:[%s1772_s1 + $0x8] sm:$0xff]   ;;  %v1333_v2 = vld [vmem:[%s1772_s1 + $0x10] sm:$0xff]  }
   0x2   :  { %1235 = vmatprep.subr.bf16.mxu0 %v1331_v0  ;;  %1315 = vmatprep.subr.bf16.mxu1 %v1331_v0  ;;  %v1334_v3 = vld [vmem:[%s1772_s1 + $0x18] sm:$0xff]   ;;  %v1339_v4 = vld [vmem:[%s1773_s0] sm:$0xff]   ;;  %v1336_v7 = vld [vmem:[%s1772_s1 + $0x28] sm:$0xff]  }
   0x3   :  { %1236 = vmatpush3.bf16.msra.mxu0 %v1331_v0  ;;  %1323 = vmatpush3.bf16.msra.mxu1 %v1331_v0  ;;  %v1340_v5 = vld [vmem:[%s1773_s0 + $0x80] sm:$0xff]   ;;  %v1337_v8 = vld [vmem:[%s1772_s1 + $0x30] sm:$0xff]   ;;  %v1338_v9 = vld [vmem:[%s1772_s1 + $0x38] sm:$0xff]  }
   0x4   :  { %1237 = vmatprep.subr.bf16.mxu0 %v1332_v1  ;;  %1316 = vmatprep.subr.bf16.mxu1 %v1332_v1  ;;  %v1335_v6 = vld [vmem:[%s1772_s1 + $0x20] sm:$0xff]   ;;  %v1341_v10 = vld [vmem:[%s1773_s0 + $0x8] sm:$0xff]   ;;  %v1343_v12 = vld [vmem:[%s1773_s0 + $0x10] sm:$0xff]  }
   0x5   :  { %1251 = vmatprep.mubr.bf16.mxu0 %v1339_v4  ;;  %1283 = vmatprep.mubr.bf16.mxu1 %v1340_v5  ;;  %v1342_v11 = vld [vmem:[%s1773_s0 + $0x88] sm:$0xff]   ;;  %v1344_v13 = vld [vmem:[%s1773_s0 + $0x90] sm:$0xff]   ;;  %v1345_v14 = vld [vmem:[%s1773_s0 + $0x18] sm:$0xff]  }
   0x6   :  { %v1346_v15 = vld [vmem:[%s1773_s0 + $0x98] sm:$0xff]   ;;  %v1347_v16 = vld [vmem:[%s1773_s0 + $0x20] sm:$0xff]   ;;  %v1349_v18 = vld [vmem:[%s1773_s0 + $0x28] sm:$0xff]  }
   0x7   :  { %1238 = vmatpush3.bf16.msra.mxu0 %v1332_v1  ;;  %1324 = vmatpush3.bf16.msra.mxu1 %v1332_v1  ;;  %v1348_v17 = vld [vmem:[%s1773_s0 + $0xa0] sm:$0xff]   ;;  %v1350_v19 = vld [vmem:[%s1773_s0 + $0xa8] sm:$0xff]   ;;  %v1351_v20 = vld [vmem:[%s1773_s0 + $0x30] sm:$0xff]  }
   0x8   :  { %1239 = vmatprep.subr.bf16.mxu0 %v1333_v2  ;;  %1317 = vmatprep.subr.bf16.mxu1 %v1333_v2  ;;  %v1352_v21 = vld [vmem:[%s1773_s0 + $0xb0] sm:$0xff]   ;;  %v1353_v22 = vld [vmem:[%s1773_s0 + $0x38] sm:$0xff]   ;;  %v1355_v24 = vld [vmem:[%s1773_s0 + $0x40] sm:$0xff]  }
   0x9   :  { %v1354_v23 = vld [vmem:[%s1773_s0 + $0xb8] sm:$0xff]   ;;  %v1356_v25 = vld [vmem:[%s1773_s0 + $0xc0] sm:$0xff]   ;;  %v1357_v26 = vld [vmem:[%s1773_s0 + $0x48] sm:$0xff]  }
   0xa   :  { %v1358_v27 = vld [vmem:[%s1773_s0 + $0xc8] sm:$0xff]   ;;  %v1359_v28 = vld [vmem:[%s1773_s0 + $0x50] sm:$0xff]   ;;  %v1361_v30 = vld [vmem:[%s1773_s0 + $0x58] sm:$0xff]  }
   0xb   :  { %1240 = vmatpush3.bf16.msra.mxu0 %v1333_v2  ;;  %1325 = vmatpush3.bf16.msra.mxu1 %v1333_v2  ;;  %v1360_v29 = vld [vmem:[%s1773_s0 + $0xd0] sm:$0xff]   ;;  %v1362_v31 = vld [vmem:[%s1773_s0 + $0xd8] sm:$0xff]   ;;  %v1363_v32 = vld [vmem:[%s1773_s0 + $0x60] sm:$0xff]  }
   0xc   :  { %1241 = vmatprep.subr.bf16.mxu0 %v1334_v3  ;;  %1318 = vmatprep.subr.bf16.mxu1 %v1334_v3  ;;  %v1364_v33 = vld [vmem:[%s1773_s0 + $0xe0] sm:$0xff]   ;;  %v1365_v34 = vld [vmem:[%s1773_s0 + $0x68] sm:$0xff]   ;;  %v1367_v36 = vld [vmem:[%s1773_s0 + $0x70] sm:$0xff]  }
   0xd   :  { %v1366_v35 = vld [vmem:[%s1773_s0 + $0xe8] sm:$0xff]   ;;  %v1368_v37 = vld [vmem:[%s1773_s0 + $0xf0] sm:$0xff]   ;;  %v1369_v38 = vld [vmem:[%s1773_s0 + $0x78] sm:$0xff]  }
   0xe   :  { %v1370_v39 = vld [vmem:[%s1773_s0 + $0xf8] sm:$0xff]   ;;  %v1514_v40 = vld [vmem:[%s1774_s2] ss:$0 sm:$0xff] }
   0xf   :  { %1242 = vmatpush3.bf16.msra.mxu0 %v1334_v3  ;;  %1326 = vmatpush3.bf16.msra.mxu1 %v1334_v3 }
  0x10   :  { %1243 = vmatprep.subr.bf16.mxu0 %v1335_v6  ;;  %1319 = vmatprep.subr.bf16.mxu1 %v1335_v6 }
  0x13   :  { %1244 = vmatpush3.bf16.msra.mxu0 %v1335_v6  ;;  %1327 = vmatpush3.bf16.msra.mxu1 %v1335_v6 }
  0x14   :  { %1245 = vmatprep.subr.bf16.mxu0 %v1336_v7  ;;  %1320 = vmatprep.subr.bf16.mxu1 %v1336_v7 }
  0x17   :  { %1246 = vmatpush3.bf16.msra.mxu0 %v1336_v7  ;;  %1328 = vmatpush3.bf16.msra.mxu1 %v1336_v7 }
  0x18   :  { %1247 = vmatprep.subr.bf16.mxu0 %v1337_v8  ;;  %1321 = vmatprep.subr.bf16.mxu1 %v1337_v8 }
  0x1b   :  { %1248 = vmatpush3.bf16.msra.mxu0 %v1337_v8  ;;  %1329 = vmatpush3.bf16.msra.mxu1 %v1337_v8 }
  0x1c   :  { %1249 = vmatprep.subr.bf16.mxu0 %v1338_v9  ;;  %1322 = vmatprep.subr.bf16.mxu1 %v1338_v9 }
  0x1f   :  { %1250 = vmatpush3.bf16.msra.mxu0 %v1338_v9  ;;  %1330 = vmatpush3.bf16.msra.mxu1 %v1338_v9 }
  0x22   :  { %1252 = vmatmul.mubr.bf16.vlgmr.msra.gmra.mrb[0].mxu0 %v1341_v10  ;;  %1284 = vmatmul.mubr.bf16.vlgmr.msra.gmra.mrb[0].mxu1 %v1342_v11 }
  0x23   :  { %1255 = vmatprep.mubr.bf16.mxu0 %v1343_v12  ;;  %1287 = vmatprep.mubr.bf16.mxu1 %v1344_v13 }
  0x2a   :  { %1256 = vmatmul.mubr.bf16.gmra.mrb[4].mxu0 %v1345_v14  ;;  %1288 = vmatmul.mubr.bf16.gmra.mrb[4].mxu1 %v1346_v15 }
  0x2b   :  { %1259 = vmatprep.mubr.bf16.mxu0 %v1347_v16  ;;  %1291 = vmatprep.mubr.bf16.mxu1 %v1348_v17 }
  0x32   :  { %1260 = vmatmul.mubr.bf16.gmra.mrb[8].mxu0 %v1349_v18  ;;  %1292 = vmatmul.mubr.bf16.gmra.mrb[8].mxu1 %v1350_v19 }
  0x33   :  { %1263 = vmatprep.mubr.bf16.mxu0 %v1351_v20  ;;  %1295 = vmatprep.mubr.bf16.mxu1 %v1352_v21 }
  0x3a   :  { %1264 = vmatmul.mubr.bf16.gmra.mrb[12].mxu0 %v1353_v22  ;;  %1296 = vmatmul.mubr.bf16.gmra.mrb[12].mxu1 %v1354_v23 }
  0x3b   :  { %1267 = vmatprep.mubr.bf16.mxu0 %v1355_v24  ;;  %1299 = vmatprep.mubr.bf16.mxu1 %v1356_v25 }
  0x42   :  { %1268 = vmatmul.mubr.bf16.gmra.mrb[16].mxu0 %v1357_v26  ;;  %1300 = vmatmul.mubr.bf16.gmra.mrb[16].mxu1 %v1358_v27 }
  0x43   :  { %1271 = vmatprep.mubr.bf16.mxu0 %v1359_v28  ;;  %1303 = vmatprep.mubr.bf16.mxu1 %v1360_v29 }
  0x4a   :  { %1272 = vmatmul.mubr.bf16.gmra.mrb[20].mxu0 %v1361_v30  ;;  %1304 = vmatmul.mubr.bf16.gmra.mrb[20].mxu1 %v1362_v31 }
  0x4b   :  { %1275 = vmatprep.mubr.bf16.mxu0 %v1363_v32  ;;  %1307 = vmatprep.mubr.bf16.mxu1 %v1364_v33 }
  0x52   :  { %1276 = vmatmul.mubr.bf16.gmra.mrb[24].mxu0 %v1365_v34  ;;  %1308 = vmatmul.mubr.bf16.gmra.mrb[24].mxu1 %v1366_v35 }
  0x53   :  { %1279 = vmatprep.mubr.bf16.mxu0 %v1367_v36  ;;  %1311 = vmatprep.mubr.bf16.mxu1 %v1368_v37 }
  0x5a   :  { %1280 = vmatmul.mubr.bf16.gmra.mrb[28].mxu0 %v1369_v38  ;;  %1312 = vmatmul.mubr.bf16.gmra.mrb[28].mxu1 %v1370_v39 }
  0xf5   :  { %v1253_v41 = vpop.f32.mrb[0].mxu0  ;;  %v1285_v42 = vpop.f32.mrb[0].mxu1 }
  0xf6   :  { %v960_v43 = vadd.f32 %v1253_v41, %v1514_v40  ;;  %v992_v44 = vadd.f32 %v1285_v42, %v1514_v40  ;;  %v501_v45 = vpop.f32.mrb[1].mxu0  ;;  %v629_v46 = vpop.f32.mrb[1].mxu1 }
  0xf7   :  { %v958_v47 = vadd.f32 %v1514_v40, %v501_v45  ;;  %v990_v48 = vadd.f32 %v1514_v40, %v629_v46  ;;  %v1254_v49 = vpop.f32.mrb[2].mxu0  ;;  %v1286_v50 = vpop.f32.mrb[2].mxu1 }
  0xf8   :  { %v1024_v51 = vmax.f32 %v960_v43, 0.0  ;;  %v1056_v52 = vmax.f32 %v992_v44, 0.0  ;;  %v961_v53 = vadd.f32 %v1254_v49, %v1514_v40  ;;  %v993_v54 = vadd.f32 %v1286_v50, %v1514_v40  ;;  %v504_v55 = vpop.f32.mrb[3].mxu0  ;;  %v632_v56 = vpop.f32.mrb[3].mxu1 }
  0xf9   :  { %v1022_v57 = vmax.f32 %v958_v47, 0.0  ;;  %v1054_v58 = vmax.f32 %v990_v48, 0.0  ;;  %v959_v59 = vadd.f32 %v1514_v40, %v504_v55  ;;  %v991_v60 = vadd.f32 %v1514_v40, %v632_v56 }
  0xfa   :  { %1088 = vst [vmem:[%s1775_s3 + $0x10] sm:$0xff] %v1024_v51  ;;  %1120 = vst [vmem:[%s1775_s3 + $0x110] sm:$0xff] %v1056_v52  ;;  %v1025_v61 = vmax.f32 %v961_v53, 0.0  ;;  %v1057_v62 = vmax.f32 %v993_v54, 0.0 }
  0xfb   :  { %1086 = vst [vmem:[%s1775_s3] sm:$0xff] %v1022_v57  ;;  %1118 = vst [vmem:[%s1775_s3 + $0x100] sm:$0xff] %v1054_v58  ;;  %v1023_v63 = vmax.f32 %v959_v59, 0.0  ;;  %v1055_v0 = vmax.f32 %v991_v60, 0.0 }
  0xfc   :  { %1089 = vst [vmem:[%s1775_s3 + $0x18] sm:$0xff] %v1025_v61  ;;  %1121 = vst [vmem:[%s1775_s3 + $0x118] sm:$0xff] %v1057_v62 }
  0xfd   :  { %1087 = vst [vmem:[%s1775_s3 + $0x8] sm:$0xff] %v1023_v63  ;;  %1119 = vst [vmem:[%s1775_s3 + $0x108] sm:$0xff] %v1055_v0  ;;  %v1257_v1 = vpop.f32.mrb[4].mxu0  ;;  %v1289_v2 = vpop.f32.mrb[4].mxu1 }
  0xfe   :  { %v964_v3 = vadd.f32 %v1257_v1, %v1514_v40  ;;  %v996_v4 = vadd.f32 %v1289_v2, %v1514_v40  ;;  %v517_v5 = vpop.f32.mrb[5].mxu0  ;;  %v645_v6 = vpop.f32.mrb[5].mxu1 }
  0xff   :  { %v962_v7 = vadd.f32 %v1514_v40, %v517_v5  ;;  %v994_v8 = vadd.f32 %v1514_v40, %v645_v6  ;;  %v1258_v9 = vpop.f32.mrb[6].mxu0  ;;  %v1290_v10 = vpop.f32.mrb[6].mxu1 }
 0x100   :  { %v1028_v11 = vmax.f32 %v964_v3, 0.0  ;;  %v1060_v12 = vmax.f32 %v996_v4, 0.0  ;;  %v965_v13 = vadd.f32 %v1258_v9, %v1514_v40  ;;  %v997_v14 = vadd.f32 %v1290_v10, %v1514_v40  ;;  %v520_v15 = vpop.f32.mrb[7].mxu0  ;;  %v648_v16 = vpop.f32.mrb[7].mxu1 }
 0x101   :  { %v1026_v17 = vmax.f32 %v962_v7, 0.0  ;;  %v1058_v18 = vmax.f32 %v994_v8, 0.0  ;;  %v963_v19 = vadd.f32 %v1514_v40, %v520_v15  ;;  %v995_v20 = vadd.f32 %v1514_v40, %v648_v16 }
 0x102   :  { %1092 = vst [vmem:[%s1775_s3 + $0x30] sm:$0xff] %v1028_v11  ;;  %1124 = vst [vmem:[%s1775_s3 + $0x130] sm:$0xff] %v1060_v12  ;;  %v1029_v21 = vmax.f32 %v965_v13, 0.0  ;;  %v1061_v22 = vmax.f32 %v997_v14, 0.0 }
 0x103   :  { %1090 = vst [vmem:[%s1775_s3 + $0x20] sm:$0xff] %v1026_v17  ;;  %1122 = vst [vmem:[%s1775_s3 + $0x120] sm:$0xff] %v1058_v18  ;;  %v1027_v23 = vmax.f32 %v963_v19, 0.0  ;;  %v1059_v24 = vmax.f32 %v995_v20, 0.0 }
 0x104   :  { %1093 = vst [vmem:[%s1775_s3 + $0x38] sm:$0xff] %v1029_v21  ;;  %1125 = vst [vmem:[%s1775_s3 + $0x138] sm:$0xff] %v1061_v22 }
 0x105   :  { %1091 = vst [vmem:[%s1775_s3 + $0x28] sm:$0xff] %v1027_v23  ;;  %1123 = vst [vmem:[%s1775_s3 + $0x128] sm:$0xff] %v1059_v24  ;;  %v1261_v25 = vpop.f32.mrb[8].mxu0  ;;  %v1293_v26 = vpop.f32.mrb[8].mxu1 }
 0x106   :  { %v968_v27 = vadd.f32 %v1261_v25, %v1514_v40  ;;  %v1000_v28 = vadd.f32 %v1293_v26, %v1514_v40  ;;  %v533_v29 = vpop.f32.mrb[9].mxu0  ;;  %v661_v30 = vpop.f32.mrb[9].mxu1 }
 0x107   :  { %v966_v31 = vadd.f32 %v1514_v40, %v533_v29  ;;  %v998_v32 = vadd.f32 %v1514_v40, %v661_v30  ;;  %v1262_v33 = vpop.f32.mrb[10].mxu0  ;;  %v1294_v34 = vpop.f32.mrb[10].mxu1 }
 0x108   :  { %v1032_v35 = vmax.f32 %v968_v27, 0.0  ;;  %v1064_v36 = vmax.f32 %v1000_v28, 0.0  ;;  %v969_v37 = vadd.f32 %v1262_v33, %v1514_v40  ;;  %v1001_v38 = vadd.f32 %v1294_v34, %v1514_v40  ;;  %v536_v39 = vpop.f32.mrb[11].mxu0  ;;  %v664_v41 = vpop.f32.mrb[11].mxu1 }
 0x109   :  { %v1030_v42 = vmax.f32 %v966_v31, 0.0  ;;  %v1062_v43 = vmax.f32 %v998_v32, 0.0  ;;  %v967_v44 = vadd.f32 %v1514_v40, %v536_v39  ;;  %v999_v45 = vadd.f32 %v1514_v40, %v664_v41 }
 0x10a   :  { %1096 = vst [vmem:[%s1775_s3 + $0x50] sm:$0xff] %v1032_v35  ;;  %1128 = vst [vmem:[%s1775_s3 + $0x150] sm:$0xff] %v1064_v36  ;;  %v1033_v46 = vmax.f32 %v969_v37, 0.0  ;;  %v1065_v47 = vmax.f32 %v1001_v38, 0.0 }
 0x10b   :  { %1094 = vst [vmem:[%s1775_s3 + $0x40] sm:$0xff] %v1030_v42  ;;  %1126 = vst [vmem:[%s1775_s3 + $0x140] sm:$0xff] %v1062_v43  ;;  %v1031_v48 = vmax.f32 %v967_v44, 0.0  ;;  %v1063_v49 = vmax.f32 %v999_v45, 0.0 }
 0x10c   :  { %1097 = vst [vmem:[%s1775_s3 + $0x58] sm:$0xff] %v1033_v46  ;;  %1129 = vst [vmem:[%s1775_s3 + $0x158] sm:$0xff] %v1065_v47 }
 0x10d   :  { %1095 = vst [vmem:[%s1775_s3 + $0x48] sm:$0xff] %v1031_v48  ;;  %1127 = vst [vmem:[%s1775_s3 + $0x148] sm:$0xff] %v1063_v49  ;;  %v1265_v50 = vpop.f32.mrb[12].mxu0  ;;  %v1297_v51 = vpop.f32.mrb[12].mxu1 }
 0x10e   :  { %v972_v52 = vadd.f32 %v1265_v50, %v1514_v40  ;;  %v1004_v53 = vadd.f32 %v1297_v51, %v1514_v40  ;;  %v549_v54 = vpop.f32.mrb[13].mxu0  ;;  %v677_v55 = vpop.f32.mrb[13].mxu1 }
 0x10f   :  { %v970_v56 = vadd.f32 %v1514_v40, %v549_v54  ;;  %v1002_v57 = vadd.f32 %v1514_v40, %v677_v55  ;;  %v1266_v58 = vpop.f32.mrb[14].mxu0  ;;  %v1298_v59 = vpop.f32.mrb[14].mxu1 }
 0x110   :  { %v1036_v60 = vmax.f32 %v972_v52, 0.0  ;;  %v1068_v61 = vmax.f32 %v1004_v53, 0.0  ;;  %v973_v62 = vadd.f32 %v1266_v58, %v1514_v40  ;;  %v1005_v63 = vadd.f32 %v1298_v59, %v1514_v40  ;;  %v552_v0 = vpop.f32.mrb[15].mxu0  ;;  %v680_v1 = vpop.f32.mrb[15].mxu1 }
 0x111   :  { %v1034_v2 = vmax.f32 %v970_v56, 0.0  ;;  %v1066_v3 = vmax.f32 %v1002_v57, 0.0  ;;  %v971_v4 = vadd.f32 %v1514_v40, %v552_v0  ;;  %v1003_v5 = vadd.f32 %v1514_v40, %v680_v1 }
 0x112   :  { %1100 = vst [vmem:[%s1775_s3 + $0x70] sm:$0xff] %v1036_v60  ;;  %1132 = vst [vmem:[%s1775_s3 + $0x170] sm:$0xff] %v1068_v61  ;;  %v1037_v6 = vmax.f32 %v973_v62, 0.0  ;;  %v1069_v7 = vmax.f32 %v1005_v63, 0.0 }
 0x113   :  { %1098 = vst [vmem:[%s1775_s3 + $0x60] sm:$0xff] %v1034_v2  ;;  %1130 = vst [vmem:[%s1775_s3 + $0x160] sm:$0xff] %v1066_v3  ;;  %v1035_v8 = vmax.f32 %v971_v4, 0.0  ;;  %v1067_v9 = vmax.f32 %v1003_v5, 0.0 }
 0x114   :  { %1101 = vst [vmem:[%s1775_s3 + $0x78] sm:$0xff] %v1037_v6  ;;  %1133 = vst [vmem:[%s1775_s3 + $0x178] sm:$0xff] %v1069_v7 }
 0x115   :  { %1099 = vst [vmem:[%s1775_s3 + $0x68] sm:$0xff] %v1035_v8  ;;  %1131 = vst [vmem:[%s1775_s3 + $0x168] sm:$0xff] %v1067_v9  ;;  %v1269_v10 = vpop.f32.mrb[16].mxu0  ;;  %v1301_v11 = vpop.f32.mrb[16].mxu1 }
 0x116   :  { %v976_v12 = vadd.f32 %v1269_v10, %v1514_v40  ;;  %v1008_v13 = vadd.f32 %v1301_v11, %v1514_v40  ;;  %v565_v14 = vpop.f32.mrb[17].mxu0  ;;  %v693_v15 = vpop.f32.mrb[17].mxu1 }
 0x117   :  { %v974_v16 = vadd.f32 %v1514_v40, %v565_v14  ;;  %v1006_v17 = vadd.f32 %v1514_v40, %v693_v15  ;;  %v1270_v18 = vpop.f32.mrb[18].mxu0  ;;  %v1302_v19 = vpop.f32.mrb[18].mxu1 }
 0x118   :  { %v1040_v20 = vmax.f32 %v976_v12, 0.0  ;;  %v1072_v21 = vmax.f32 %v1008_v13, 0.0  ;;  %v977_v22 = vadd.f32 %v1270_v18, %v1514_v40  ;;  %v1009_v23 = vadd.f32 %v1302_v19, %v1514_v40  ;;  %v568_v24 = vpop.f32.mrb[19].mxu0  ;;  %v696_v25 = vpop.f32.mrb[19].mxu1 }
 0x119   :  { %v1038_v26 = vmax.f32 %v974_v16, 0.0  ;;  %v1070_v27 = vmax.f32 %v1006_v17, 0.0  ;;  %v975_v28 = vadd.f32 %v1514_v40, %v568_v24  ;;  %v1007_v29 = vadd.f32 %v1514_v40, %v696_v25 }
 0x11a   :  { %1104 = vst [vmem:[%s1775_s3 + $0x90] sm:$0xff] %v1040_v20  ;;  %1136 = vst [vmem:[%s1775_s3 + $0x190] sm:$0xff] %v1072_v21  ;;  %v1041_v30 = vmax.f32 %v977_v22, 0.0  ;;  %v1073_v31 = vmax.f32 %v1009_v23, 0.0 }
 0x11b   :  { %1102 = vst [vmem:[%s1775_s3 + $0x80] sm:$0xff] %v1038_v26  ;;  %1134 = vst [vmem:[%s1775_s3 + $0x180] sm:$0xff] %v1070_v27  ;;  %v1039_v32 = vmax.f32 %v975_v28, 0.0  ;;  %v1071_v33 = vmax.f32 %v1007_v29, 0.0 }
 0x11c   :  { %1105 = vst [vmem:[%s1775_s3 + $0x98] sm:$0xff] %v1041_v30  ;;  %1137 = vst [vmem:[%s1775_s3 + $0x198] sm:$0xff] %v1073_v31 }
 0x11d   :  { %1103 = vst [vmem:[%s1775_s3 + $0x88] sm:$0xff] %v1039_v32  ;;  %1135 = vst [vmem:[%s1775_s3 + $0x188] sm:$0xff] %v1071_v33  ;;  %v1273_v34 = vpop.f32.mrb[20].mxu0  ;;  %v1305_v35 = vpop.f32.mrb[20].mxu1 }
 0x11e   :  { %v980_v36 = vadd.f32 %v1273_v34, %v1514_v40  ;;  %v1012_v37 = vadd.f32 %v1305_v35, %v1514_v40  ;;  %v581_v38 = vpop.f32.mrb[21].mxu0  ;;  %v709_v39 = vpop.f32.mrb[21].mxu1 }
 0x11f   :  { %v978_v41 = vadd.f32 %v1514_v40, %v581_v38  ;;  %v1010_v42 = vadd.f32 %v1514_v40, %v709_v39  ;;  %v1274_v43 = vpop.f32.mrb[22].mxu0  ;;  %v1306_v44 = vpop.f32.mrb[22].mxu1 }
 0x120   :  { %v1044_v45 = vmax.f32 %v980_v36, 0.0  ;;  %v1076_v46 = vmax.f32 %v1012_v37, 0.0  ;;  %v981_v47 = vadd.f32 %v1274_v43, %v1514_v40  ;;  %v1013_v48 = vadd.f32 %v1306_v44, %v1514_v40  ;;  %v584_v49 = vpop.f32.mrb[23].mxu0  ;;  %v712_v50 = vpop.f32.mrb[23].mxu1 }
 0x121   :  { %v1042_v51 = vmax.f32 %v978_v41, 0.0  ;;  %v1074_v52 = vmax.f32 %v1010_v42, 0.0  ;;  %v979_v53 = vadd.f32 %v1514_v40, %v584_v49  ;;  %v1011_v54 = vadd.f32 %v1514_v40, %v712_v50 }
 0x122   :  { %1108 = vst [vmem:[%s1775_s3 + $0xb0] sm:$0xff] %v1044_v45  ;;  %1140 = vst [vmem:[%s1775_s3 + $0x1b0] sm:$0xff] %v1076_v46  ;;  %v1045_v55 = vmax.f32 %v981_v47, 0.0  ;;  %v1077_v56 = vmax.f32 %v1013_v48, 0.0 }
 0x123   :  { %1106 = vst [vmem:[%s1775_s3 + $0xa0] sm:$0xff] %v1042_v51  ;;  %1138 = vst [vmem:[%s1775_s3 + $0x1a0] sm:$0xff] %v1074_v52  ;;  %v1043_v57 = vmax.f32 %v979_v53, 0.0  ;;  %v1075_v58 = vmax.f32 %v1011_v54, 0.0 }
 0x124   :  { %1109 = vst [vmem:[%s1775_s3 + $0xb8] sm:$0xff] %v1045_v55  ;;  %1141 = vst [vmem:[%s1775_s3 + $0x1b8] sm:$0xff] %v1077_v56 }
 0x125   :  { %1107 = vst [vmem:[%s1775_s3 + $0xa8] sm:$0xff] %v1043_v57  ;;  %1139 = vst [vmem:[%s1775_s3 + $0x1a8] sm:$0xff] %v1075_v58  ;;  %v1277_v59 = vpop.f32.mrb[24].mxu0  ;;  %v1309_v60 = vpop.f32.mrb[24].mxu1 }
 0x126   :  { %v984_v61 = vadd.f32 %v1277_v59, %v1514_v40  ;;  %v1016_v62 = vadd.f32 %v1309_v60, %v1514_v40  ;;  %v597_v63 = vpop.f32.mrb[25].mxu0  ;;  %v725_v0 = vpop.f32.mrb[25].mxu1 }
 0x127   :  { %v982_v1 = vadd.f32 %v1514_v40, %v597_v63  ;;  %v1014_v2 = vadd.f32 %v1514_v40, %v725_v0  ;;  %v1278_v3 = vpop.f32.mrb[26].mxu0  ;;  %v1310_v4 = vpop.f32.mrb[26].mxu1 }
 0x128   :  { %v1048_v5 = vmax.f32 %v984_v61, 0.0  ;;  %v1080_v6 = vmax.f32 %v1016_v62, 0.0  ;;  %v985_v7 = vadd.f32 %v1278_v3, %v1514_v40  ;;  %v1017_v8 = vadd.f32 %v1310_v4, %v1514_v40  ;;  %v600_v9 = vpop.f32.mrb[27].mxu0  ;;  %v728_v10 = vpop.f32.mrb[27].mxu1 }
 0x129   :  { %v1046_v11 = vmax.f32 %v982_v1, 0.0  ;;  %v1078_v12 = vmax.f32 %v1014_v2, 0.0  ;;  %v983_v13 = vadd.f32 %v1514_v40, %v600_v9  ;;  %v1015_v14 = vadd.f32 %v1514_v40, %v728_v10 }
 0x12a   :  { %1112 = vst [vmem:[%s1775_s3 + $0xd0] sm:$0xff] %v1048_v5  ;;  %1144 = vst [vmem:[%s1775_s3 + $0x1d0] sm:$0xff] %v1080_v6  ;;  %v1049_v15 = vmax.f32 %v985_v7, 0.0  ;;  %v1081_v16 = vmax.f32 %v1017_v8, 0.0 }
 0x12b   :  { %1110 = vst [vmem:[%s1775_s3 + $0xc0] sm:$0xff] %v1046_v11  ;;  %1142 = vst [vmem:[%s1775_s3 + $0x1c0] sm:$0xff] %v1078_v12  ;;  %v1047_v17 = vmax.f32 %v983_v13, 0.0  ;;  %v1079_v18 = vmax.f32 %v1015_v14, 0.0 }
 0x12c   :  { %1113 = vst [vmem:[%s1775_s3 + $0xd8] sm:$0xff] %v1049_v15  ;;  %1145 = vst [vmem:[%s1775_s3 + $0x1d8] sm:$0xff] %v1081_v16 }
 0x12d   :  { %1111 = vst [vmem:[%s1775_s3 + $0xc8] sm:$0xff] %v1047_v17  ;;  %1143 = vst [vmem:[%s1775_s3 + $0x1c8] sm:$0xff] %v1079_v18  ;;  %v1281_v19 = vpop.f32.mrb[28].mxu0  ;;  %v1313_v20 = vpop.f32.mrb[28].mxu1 }
 0x12e   :  { %v988_v21 = vadd.f32 %v1281_v19, %v1514_v40  ;;  %v1020_v22 = vadd.f32 %v1313_v20, %v1514_v40  ;;  %v613_v23 = vpop.f32.mrb[29].mxu0  ;;  %v741_v24 = vpop.f32.mrb[29].mxu1 }
 0x12f   :  { %v986_v25 = vadd.f32 %v1514_v40, %v613_v23  ;;  %v1018_v26 = vadd.f32 %v1514_v40, %v741_v24  ;;  %v1282_v27 = vpop.f32.mrb[30].mxu0  ;;  %v1314_v28 = vpop.f32.mrb[30].mxu1 }
 0x130   :  { %v1052_v29 = vmax.f32 %v988_v21, 0.0  ;;  %v1084_v30 = vmax.f32 %v1020_v22, 0.0  ;;  %v989_v31 = vadd.f32 %v1282_v27, %v1514_v40  ;;  %v1021_v32 = vadd.f32 %v1314_v28, %v1514_v40  ;;  %v616_v33 = vpop.f32.mrb[31].mxu0  ;;  %v744_v34 = vpop.f32.mrb[31].mxu1 }
 0x131   :  { %v1050_v35 = vmax.f32 %v986_v25, 0.0  ;;  %v1082_v36 = vmax.f32 %v1018_v26, 0.0  ;;  %v987_v37 = vadd.f32 %v1514_v40, %v616_v33  ;;  %v1019_v38 = vadd.f32 %v1514_v40, %v744_v34 }
 0x132   :  { %1116 = vst [vmem:[%s1775_s3 + $0xf0] sm:$0xff] %v1052_v29  ;;  %1148 = vst [vmem:[%s1775_s3 + $0x1f0] sm:$0xff] %v1084_v30  ;;  %v1053_v39 = vmax.f32 %v989_v31, 0.0  ;;  %v1085_v41 = vmax.f32 %v1021_v32, 0.0 }
 0x133   :  { %1114 = vst [vmem:[%s1775_s3 + $0xe0] sm:$0xff] %v1050_v35  ;;  %1146 = vst [vmem:[%s1775_s3 + $0x1e0] sm:$0xff] %v1082_v36  ;;  %v1051_v42 = vmax.f32 %v987_v37, 0.0  ;;  %v1083_v40 = vmax.f32 %v1019_v38, 0.0 }
 0x134   :  { %1117 = vst [vmem:[%s1775_s3 + $0xf8] sm:$0xff] %v1053_v39  ;;  %1149 = vst [vmem:[%s1775_s3 + $0x1f8] sm:$0xff] %v1085_v41 }
 0x135   :  { %1115 = vst [vmem:[%s1775_s3 + $0xe8] sm:$0xff] %v1051_v42  ;;  %1147 = vst [vmem:[%s1775_s3 + $0x1e8] sm:$0xff] %v1083_v40 }

// kernel: image_encoder_attnpool_forward.32
= control target key start
LH: loop header
LB: loop body
LE: loop exit
PB: predicated region body
PF: predicated region fallthrough
CT: control target
= control target key end

     0   :  { %s1708_s1 = inlined_call_operand.vmem [shape: bf16[128,128], index: 1, kind: input, shape index: {}]   ;;  %s1709_s0 = inlined_call_operand.vmem [shape: bf16[512,128], index: 0, kind: input, shape index: {}]   ;;  %s1710_s2 = inlined_call_operand.vmem [shape: f32[1,128], index: 2, kind: input, shape index: {}]   ;;  %s1711_s3 = inlined_call_operand.vmem [shape: f32[512,128], index: 3, kind: output, shape index: {}]  }
   0x1   :  { %v1267_v0 = vld [vmem:[%s1708_s1] sm:$0xff]   ;;  %v1268_v1 = vld [vmem:[%s1708_s1 + $0x8] sm:$0xff]   ;;  %v1269_v2 = vld [vmem:[%s1708_s1 + $0x10] sm:$0xff]  }
   0x2   :  { %1171 = vmatprep.subr.bf16.mxu0 %v1267_v0  ;;  %1251 = vmatprep.subr.bf16.mxu1 %v1267_v0  ;;  %v1270_v3 = vld [vmem:[%s1708_s1 + $0x18] sm:$0xff]   ;;  %v1275_v4 = vld [vmem:[%s1709_s0] sm:$0xff]   ;;  %v1272_v7 = vld [vmem:[%s1708_s1 + $0x28] sm:$0xff]  }
   0x3   :  { %1172 = vmatpush3.bf16.msra.mxu0 %v1267_v0  ;;  %1259 = vmatpush3.bf16.msra.mxu1 %v1267_v0  ;;  %v1276_v5 = vld [vmem:[%s1709_s0 + $0x80] sm:$0xff]   ;;  %v1273_v8 = vld [vmem:[%s1708_s1 + $0x30] sm:$0xff]   ;;  %v1274_v9 = vld [vmem:[%s1708_s1 + $0x38] sm:$0xff]  }
   0x4   :  { %1173 = vmatprep.subr.bf16.mxu0 %v1268_v1  ;;  %1252 = vmatprep.subr.bf16.mxu1 %v1268_v1  ;;  %v1271_v6 = vld [vmem:[%s1708_s1 + $0x20] sm:$0xff]   ;;  %v1277_v10 = vld [vmem:[%s1709_s0 + $0x8] sm:$0xff]   ;;  %v1279_v12 = vld [vmem:[%s1709_s0 + $0x10] sm:$0xff]  }
   0x5   :  { %1187 = vmatprep.mubr.bf16.mxu0 %v1275_v4  ;;  %1219 = vmatprep.mubr.bf16.mxu1 %v1276_v5  ;;  %v1278_v11 = vld [vmem:[%s1709_s0 + $0x88] sm:$0xff]   ;;  %v1280_v13 = vld [vmem:[%s1709_s0 + $0x90] sm:$0xff]   ;;  %v1281_v14 = vld [vmem:[%s1709_s0 + $0x18] sm:$0xff]  }
   0x6   :  { %v1282_v15 = vld [vmem:[%s1709_s0 + $0x98] sm:$0xff]   ;;  %v1283_v16 = vld [vmem:[%s1709_s0 + $0x20] sm:$0xff]   ;;  %v1285_v18 = vld [vmem:[%s1709_s0 + $0x28] sm:$0xff]  }
   0x7   :  { %1174 = vmatpush3.bf16.msra.mxu0 %v1268_v1  ;;  %1260 = vmatpush3.bf16.msra.mxu1 %v1268_v1  ;;  %v1284_v17 = vld [vmem:[%s1709_s0 + $0xa0] sm:$0xff]   ;;  %v1286_v19 = vld [vmem:[%s1709_s0 + $0xa8] sm:$0xff]   ;;  %v1287_v20 = vld [vmem:[%s1709_s0 + $0x30] sm:$0xff]  }
   0x8   :  { %1175 = vmatprep.subr.bf16.mxu0 %v1269_v2  ;;  %1253 = vmatprep.subr.bf16.mxu1 %v1269_v2  ;;  %v1288_v21 = vld [vmem:[%s1709_s0 + $0xb0] sm:$0xff]   ;;  %v1289_v22 = vld [vmem:[%s1709_s0 + $0x38] sm:$0xff]   ;;  %v1291_v24 = vld [vmem:[%s1709_s0 + $0x40] sm:$0xff]  }
   0x9   :  { %v1290_v23 = vld [vmem:[%s1709_s0 + $0xb8] sm:$0xff]   ;;  %v1292_v25 = vld [vmem:[%s1709_s0 + $0xc0] sm:$0xff]   ;;  %v1293_v26 = vld [vmem:[%s1709_s0 + $0x48] sm:$0xff]  }
   0xa   :  { %v1294_v27 = vld [vmem:[%s1709_s0 + $0xc8] sm:$0xff]   ;;  %v1295_v28 = vld [vmem:[%s1709_s0 + $0x50] sm:$0xff]   ;;  %v1297_v30 = vld [vmem:[%s1709_s0 + $0x58] sm:$0xff]  }
   0xb   :  { %1176 = vmatpush3.bf16.msra.mxu0 %v1269_v2  ;;  %1261 = vmatpush3.bf16.msra.mxu1 %v1269_v2  ;;  %v1296_v29 = vld [vmem:[%s1709_s0 + $0xd0] sm:$0xff]   ;;  %v1298_v31 = vld [vmem:[%s1709_s0 + $0xd8] sm:$0xff]   ;;  %v1299_v32 = vld [vmem:[%s1709_s0 + $0x60] sm:$0xff]  }
   0xc   :  { %1177 = vmatprep.subr.bf16.mxu0 %v1270_v3  ;;  %1254 = vmatprep.subr.bf16.mxu1 %v1270_v3  ;;  %v1300_v33 = vld [vmem:[%s1709_s0 + $0xe0] sm:$0xff]   ;;  %v1301_v34 = vld [vmem:[%s1709_s0 + $0x68] sm:$0xff]   ;;  %v1303_v36 = vld [vmem:[%s1709_s0 + $0x70] sm:$0xff]  }
   0xd   :  { %v1302_v35 = vld [vmem:[%s1709_s0 + $0xe8] sm:$0xff]   ;;  %v1304_v37 = vld [vmem:[%s1709_s0 + $0xf0] sm:$0xff]   ;;  %v1305_v38 = vld [vmem:[%s1709_s0 + $0x78] sm:$0xff]  }
   0xe   :  { %v1306_v39 = vld [vmem:[%s1709_s0 + $0xf8] sm:$0xff]   ;;  %v1450_v40 = vld [vmem:[%s1710_s2] ss:$0 sm:$0xff] }
   0xf   :  { %1178 = vmatpush3.bf16.msra.mxu0 %v1270_v3  ;;  %1262 = vmatpush3.bf16.msra.mxu1 %v1270_v3 }
  0x10   :  { %1179 = vmatprep.subr.bf16.mxu0 %v1271_v6  ;;  %1255 = vmatprep.subr.bf16.mxu1 %v1271_v6 }
  0x13   :  { %1180 = vmatpush3.bf16.msra.mxu0 %v1271_v6  ;;  %1263 = vmatpush3.bf16.msra.mxu1 %v1271_v6 }
  0x14   :  { %1181 = vmatprep.subr.bf16.mxu0 %v1272_v7  ;;  %1256 = vmatprep.subr.bf16.mxu1 %v1272_v7 }
  0x17   :  { %1182 = vmatpush3.bf16.msra.mxu0 %v1272_v7  ;;  %1264 = vmatpush3.bf16.msra.mxu1 %v1272_v7 }
  0x18   :  { %1183 = vmatprep.subr.bf16.mxu0 %v1273_v8  ;;  %1257 = vmatprep.subr.bf16.mxu1 %v1273_v8 }
  0x1b   :  { %1184 = vmatpush3.bf16.msra.mxu0 %v1273_v8  ;;  %1265 = vmatpush3.bf16.msra.mxu1 %v1273_v8 }
  0x1c   :  { %1185 = vmatprep.subr.bf16.mxu0 %v1274_v9  ;;  %1258 = vmatprep.subr.bf16.mxu1 %v1274_v9 }
  0x1f   :  { %1186 = vmatpush3.bf16.msra.mxu0 %v1274_v9  ;;  %1266 = vmatpush3.bf16.msra.mxu1 %v1274_v9 }
  0x22   :  { %1188 = vmatmul.mubr.bf16.vlgmr.msra.gmra.mrb[0].mxu0 %v1277_v10  ;;  %1220 = vmatmul.mubr.bf16.vlgmr.msra.gmra.mrb[0].mxu1 %v1278_v11 }
  0x23   :  { %1191 = vmatprep.mubr.bf16.mxu0 %v1279_v12  ;;  %1223 = vmatprep.mubr.bf16.mxu1 %v1280_v13 }
  0x2a   :  { %1192 = vmatmul.mubr.bf16.gmra.mrb[4].mxu0 %v1281_v14  ;;  %1224 = vmatmul.mubr.bf16.gmra.mrb[4].mxu1 %v1282_v15 }
  0x2b   :  { %1195 = vmatprep.mubr.bf16.mxu0 %v1283_v16  ;;  %1227 = vmatprep.mubr.bf16.mxu1 %v1284_v17 }
  0x32   :  { %1196 = vmatmul.mubr.bf16.gmra.mrb[8].mxu0 %v1285_v18  ;;  %1228 = vmatmul.mubr.bf16.gmra.mrb[8].mxu1 %v1286_v19 }
  0x33   :  { %1199 = vmatprep.mubr.bf16.mxu0 %v1287_v20  ;;  %1231 = vmatprep.mubr.bf16.mxu1 %v1288_v21 }
  0x3a   :  { %1200 = vmatmul.mubr.bf16.gmra.mrb[12].mxu0 %v1289_v22  ;;  %1232 = vmatmul.mubr.bf16.gmra.mrb[12].mxu1 %v1290_v23 }
  0x3b   :  { %1203 = vmatprep.mubr.bf16.mxu0 %v1291_v24  ;;  %1235 = vmatprep.mubr.bf16.mxu1 %v1292_v25 }
  0x42   :  { %1204 = vmatmul.mubr.bf16.gmra.mrb[16].mxu0 %v1293_v26  ;;  %1236 = vmatmul.mubr.bf16.gmra.mrb[16].mxu1 %v1294_v27 }
  0x43   :  { %1207 = vmatprep.mubr.bf16.mxu0 %v1295_v28  ;;  %1239 = vmatprep.mubr.bf16.mxu1 %v1296_v29 }
  0x4a   :  { %1208 = vmatmul.mubr.bf16.gmra.mrb[20].mxu0 %v1297_v30  ;;  %1240 = vmatmul.mubr.bf16.gmra.mrb[20].mxu1 %v1298_v31 }
  0x4b   :  { %1211 = vmatprep.mubr.bf16.mxu0 %v1299_v32  ;;  %1243 = vmatprep.mubr.bf16.mxu1 %v1300_v33 }
  0x52   :  { %1212 = vmatmul.mubr.bf16.gmra.mrb[24].mxu0 %v1301_v34  ;;  %1244 = vmatmul.mubr.bf16.gmra.mrb[24].mxu1 %v1302_v35 }
  0x53   :  { %1215 = vmatprep.mubr.bf16.mxu0 %v1303_v36  ;;  %1247 = vmatprep.mubr.bf16.mxu1 %v1304_v37 }
  0x5a   :  { %1216 = vmatmul.mubr.bf16.gmra.mrb[28].mxu0 %v1305_v38  ;;  %1248 = vmatmul.mubr.bf16.gmra.mrb[28].mxu1 %v1306_v39 }
  0xf5   :  { %v1189_v41 = vpop.f32.mrb[0].mxu0  ;;  %v1221_v42 = vpop.f32.mrb[0].mxu1 }
  0xf6   :  { %v960_v43 = vadd.f32 %v1189_v41, %v1450_v40  ;;  %v992_v44 = vadd.f32 %v1221_v42, %v1450_v40  ;;  %v501_v45 = vpop.f32.mrb[1].mxu0  ;;  %v629_v46 = vpop.f32.mrb[1].mxu1 }
  0xf7   :  { %v958_v47 = vadd.f32 %v1450_v40, %v501_v45  ;;  %v990_v48 = vadd.f32 %v1450_v40, %v629_v46  ;;  %v1190_v49 = vpop.f32.mrb[2].mxu0  ;;  %v1222_v50 = vpop.f32.mrb[2].mxu1 }
  0xf8   :  { %1024 = vst [vmem:[%s1711_s3 + $0x10] sm:$0xff] %v960_v43  ;;  %1056 = vst [vmem:[%s1711_s3 + $0x110] sm:$0xff] %v992_v44  ;;  %v961_v51 = vadd.f32 %v1190_v49, %v1450_v40  ;;  %v993_v52 = vadd.f32 %v1222_v50, %v1450_v40  ;;  %v504_v53 = vpop.f32.mrb[3].mxu0  ;;  %v632_v54 = vpop.f32.mrb[3].mxu1 }
  0xf9   :  { %1022 = vst [vmem:[%s1711_s3] sm:$0xff] %v958_v47  ;;  %1054 = vst [vmem:[%s1711_s3 + $0x100] sm:$0xff] %v990_v48  ;;  %v959_v55 = vadd.f32 %v1450_v40, %v504_v53  ;;  %v991_v56 = vadd.f32 %v1450_v40, %v632_v54 }
  0xfa   :  { %1025 = vst [vmem:[%s1711_s3 + $0x18] sm:$0xff] %v961_v51  ;;  %1057 = vst [vmem:[%s1711_s3 + $0x118] sm:$0xff] %v993_v52 }
  0xfb   :  { %1023 = vst [vmem:[%s1711_s3 + $0x8] sm:$0xff] %v959_v55  ;;  %1055 = vst [vmem:[%s1711_s3 + $0x108] sm:$0xff] %v991_v56 }
  0xfd   :  { %v1193_v57 = vpop.f32.mrb[4].mxu0  ;;  %v1225_v58 = vpop.f32.mrb[4].mxu1 }
  0xfe   :  { %v964_v59 = vadd.f32 %v1193_v57, %v1450_v40  ;;  %v996_v60 = vadd.f32 %v1225_v58, %v1450_v40  ;;  %v517_v61 = vpop.f32.mrb[5].mxu0  ;;  %v645_v62 = vpop.f32.mrb[5].mxu1 }
  0xff   :  { %v962_v63 = vadd.f32 %v1450_v40, %v517_v61  ;;  %v994_v0 = vadd.f32 %v1450_v40, %v645_v62  ;;  %v1194_v1 = vpop.f32.mrb[6].mxu0  ;;  %v1226_v2 = vpop.f32.mrb[6].mxu1 }
 0x100   :  { %1028 = vst [vmem:[%s1711_s3 + $0x30] sm:$0xff] %v964_v59  ;;  %1060 = vst [vmem:[%s1711_s3 + $0x130] sm:$0xff] %v996_v60  ;;  %v965_v3 = vadd.f32 %v1194_v1, %v1450_v40  ;;  %v997_v4 = vadd.f32 %v1226_v2, %v1450_v40  ;;  %v520_v5 = vpop.f32.mrb[7].mxu0  ;;  %v648_v6 = vpop.f32.mrb[7].mxu1 }
 0x101   :  { %1026 = vst [vmem:[%s1711_s3 + $0x20] sm:$0xff] %v962_v63  ;;  %1058 = vst [vmem:[%s1711_s3 + $0x120] sm:$0xff] %v994_v0  ;;  %v963_v7 = vadd.f32 %v1450_v40, %v520_v5  ;;  %v995_v8 = vadd.f32 %v1450_v40, %v648_v6 }
 0x102   :  { %1029 = vst [vmem:[%s1711_s3 + $0x38] sm:$0xff] %v965_v3  ;;  %1061 = vst [vmem:[%s1711_s3 + $0x138] sm:$0xff] %v997_v4 }
 0x103   :  { %1027 = vst [vmem:[%s1711_s3 + $0x28] sm:$0xff] %v963_v7  ;;  %1059 = vst [vmem:[%s1711_s3 + $0x128] sm:$0xff] %v995_v8 }
 0x105   :  { %v1197_v9 = vpop.f32.mrb[8].mxu0  ;;  %v1229_v10 = vpop.f32.mrb[8].mxu1 }
 0x106   :  { %v968_v11 = vadd.f32 %v1197_v9, %v1450_v40  ;;  %v1000_v12 = vadd.f32 %v1229_v10, %v1450_v40  ;;  %v533_v13 = vpop.f32.mrb[9].mxu0  ;;  %v661_v14 = vpop.f32.mrb[9].mxu1 }
 0x107   :  { %v966_v15 = vadd.f32 %v1450_v40, %v533_v13  ;;  %v998_v16 = vadd.f32 %v1450_v40, %v661_v14  ;;  %v1198_v17 = vpop.f32.mrb[10].mxu0  ;;  %v1230_v18 = vpop.f32.mrb[10].mxu1 }
 0x108   :  { %1032 = vst [vmem:[%s1711_s3 + $0x50] sm:$0xff] %v968_v11  ;;  %1064 = vst [vmem:[%s1711_s3 + $0x150] sm:$0xff] %v1000_v12  ;;  %v969_v19 = vadd.f32 %v1198_v17, %v1450_v40  ;;  %v1001_v20 = vadd.f32 %v1230_v18, %v1450_v40  ;;  %v536_v21 = vpop.f32.mrb[11].mxu0  ;;  %v664_v22 = vpop.f32.mrb[11].mxu1 }
 0x109   :  { %1030 = vst [vmem:[%s1711_s3 + $0x40] sm:$0xff] %v966_v15  ;;  %1062 = vst [vmem:[%s1711_s3 + $0x140] sm:$0xff] %v998_v16  ;;  %v967_v23 = vadd.f32 %v1450_v40, %v536_v21  ;;  %v999_v24 = vadd.f32 %v1450_v40, %v664_v22 }
 0x10a   :  { %1033 = vst [vmem:[%s1711_s3 + $0x58] sm:$0xff] %v969_v19  ;;  %1065 = vst [vmem:[%s1711_s3 + $0x158] sm:$0xff] %v1001_v20 }
 0x10b   :  { %1031 = vst [vmem:[%s1711_s3 + $0x48] sm:$0xff] %v967_v23  ;;  %1063 = vst [vmem:[%s1711_s3 + $0x148] sm:$0xff] %v999_v24 }
 0x10d   :  { %v1201_v25 = vpop.f32.mrb[12].mxu0  ;;  %v1233_v26 = vpop.f32.mrb[12].mxu1 }
 0x10e   :  { %v972_v27 = vadd.f32 %v1201_v25, %v1450_v40  ;;  %v1004_v28 = vadd.f32 %v1233_v26, %v1450_v40  ;;  %v549_v29 = vpop.f32.mrb[13].mxu0  ;;  %v677_v30 = vpop.f32.mrb[13].mxu1 }
 0x10f   :  { %v970_v31 = vadd.f32 %v1450_v40, %v549_v29  ;;  %v1002_v32 = vadd.f32 %v1450_v40, %v677_v30  ;;  %v1202_v33 = vpop.f32.mrb[14].mxu0  ;;  %v1234_v34 = vpop.f32.mrb[14].mxu1 }
 0x110   :  { %1036 = vst [vmem:[%s1711_s3 + $0x70] sm:$0xff] %v972_v27  ;;  %1068 = vst [vmem:[%s1711_s3 + $0x170] sm:$0xff] %v1004_v28  ;;  %v973_v35 = vadd.f32 %v1202_v33, %v1450_v40  ;;  %v1005_v36 = vadd.f32 %v1234_v34, %v1450_v40  ;;  %v552_v37 = vpop.f32.mrb[15].mxu0  ;;  %v680_v38 = vpop.f32.mrb[15].mxu1 }
 0x111   :  { %1034 = vst [vmem:[%s1711_s3 + $0x60] sm:$0xff] %v970_v31  ;;  %1066 = vst [vmem:[%s1711_s3 + $0x160] sm:$0xff] %v1002_v32  ;;  %v971_v39 = vadd.f32 %v1450_v40, %v552_v37  ;;  %v1003_v41 = vadd.f32 %v1450_v40, %v680_v38 }
 0x112   :  { %1037 = vst [vmem:[%s1711_s3 + $0x78] sm:$0xff] %v973_v35  ;;  %1069 = vst [vmem:[%s1711_s3 + $0x178] sm:$0xff] %v1005_v36 }
 0x113   :  { %1035 = vst [vmem:[%s1711_s3 + $0x68] sm:$0xff] %v971_v39  ;;  %1067 = vst [vmem:[%s1711_s3 + $0x168] sm:$0xff] %v1003_v41 }
 0x115   :  { %v1205_v42 = vpop.f32.mrb[16].mxu0  ;;  %v1237_v43 = vpop.f32.mrb[16].mxu1 }
 0x116   :  { %v976_v44 = vadd.f32 %v1205_v42, %v1450_v40  ;;  %v1008_v45 = vadd.f32 %v1237_v43, %v1450_v40  ;;  %v565_v46 = vpop.f32.mrb[17].mxu0  ;;  %v693_v47 = vpop.f32.mrb[17].mxu1 }
 0x117   :  { %v974_v48 = vadd.f32 %v1450_v40, %v565_v46  ;;  %v1006_v49 = vadd.f32 %v1450_v40, %v693_v47  ;;  %v1206_v50 = vpop.f32.mrb[18].mxu0  ;;  %v1238_v51 = vpop.f32.mrb[18].mxu1 }
 0x118   :  { %1040 = vst [vmem:[%s1711_s3 + $0x90] sm:$0xff] %v976_v44  ;;  %1072 = vst [vmem:[%s1711_s3 + $0x190] sm:$0xff] %v1008_v45  ;;  %v977_v52 = vadd.f32 %v1206_v50, %v1450_v40  ;;  %v1009_v53 = vadd.f32 %v1238_v51, %v1450_v40  ;;  %v568_v54 = vpop.f32.mrb[19].mxu0  ;;  %v696_v55 = vpop.f32.mrb[19].mxu1 }
 0x119   :  { %1038 = vst [vmem:[%s1711_s3 + $0x80] sm:$0xff] %v974_v48  ;;  %1070 = vst [vmem:[%s1711_s3 + $0x180] sm:$0xff] %v1006_v49  ;;  %v975_v56 = vadd.f32 %v1450_v40, %v568_v54  ;;  %v1007_v57 = vadd.f32 %v1450_v40, %v696_v55 }
 0x11a   :  { %1041 = vst [vmem:[%s1711_s3 + $0x98] sm:$0xff] %v977_v52  ;;  %1073 = vst [vmem:[%s1711_s3 + $0x198] sm:$0xff] %v1009_v53 }
 0x11b   :  { %1039 = vst [vmem:[%s1711_s3 + $0x88] sm:$0xff] %v975_v56  ;;  %1071 = vst [vmem:[%s1711_s3 + $0x188] sm:$0xff] %v1007_v57 }
 0x11d   :  { %v1209_v58 = vpop.f32.mrb[20].mxu0  ;;  %v1241_v59 = vpop.f32.mrb[20].mxu1 }
 0x11e   :  { %v980_v60 = vadd.f32 %v1209_v58, %v1450_v40  ;;  %v1012_v61 = vadd.f32 %v1241_v59, %v1450_v40  ;;  %v581_v62 = vpop.f32.mrb[21].mxu0  ;;  %v709_v63 = vpop.f32.mrb[21].mxu1 }
 0x11f   :  { %v978_v0 = vadd.f32 %v1450_v40, %v581_v62  ;;  %v1010_v1 = vadd.f32 %v1450_v40, %v709_v63  ;;  %v1210_v2 = vpop.f32.mrb[22].mxu0  ;;  %v1242_v3 = vpop.f32.mrb[22].mxu1 }
 0x120   :  { %1044 = vst [vmem:[%s1711_s3 + $0xb0] sm:$0xff] %v980_v60  ;;  %1076 = vst [vmem:[%s1711_s3 + $0x1b0] sm:$0xff] %v1012_v61  ;;  %v981_v4 = vadd.f32 %v1210_v2, %v1450_v40  ;;  %v1013_v5 = vadd.f32 %v1242_v3, %v1450_v40  ;;  %v584_v6 = vpop.f32.mrb[23].mxu0  ;;  %v712_v7 = vpop.f32.mrb[23].mxu1 }
 0x121   :  { %1042 = vst [vmem:[%s1711_s3 + $0xa0] sm:$0xff] %v978_v0  ;;  %1074 = vst [vmem:[%s1711_s3 + $0x1a0] sm:$0xff] %v1010_v1  ;;  %v979_v8 = vadd.f32 %v1450_v40, %v584_v6  ;;  %v1011_v9 = vadd.f32 %v1450_v40, %v712_v7 }
 0x122   :  { %1045 = vst [vmem:[%s1711_s3 + $0xb8] sm:$0xff] %v981_v4  ;;  %1077 = vst [vmem:[%s1711_s3 + $0x1b8] sm:$0xff] %v1013_v5 }
 0x123   :  { %1043 = vst [vmem:[%s1711_s3 + $0xa8] sm:$0xff] %v979_v8  ;;  %1075 = vst [vmem:[%s1711_s3 + $0x1a8] sm:$0xff] %v1011_v9 }
 0x125   :  { %v1213_v10 = vpop.f32.mrb[24].mxu0  ;;  %v1245_v11 = vpop.f32.mrb[24].mxu1 }
 0x126   :  { %v984_v12 = vadd.f32 %v1213_v10, %v1450_v40  ;;  %v1016_v13 = vadd.f32 %v1245_v11, %v1450_v40  ;;  %v597_v14 = vpop.f32.mrb[25].mxu0  ;;  %v725_v15 = vpop.f32.mrb[25].mxu1 }
 0x127   :  { %v982_v16 = vadd.f32 %v1450_v40, %v597_v14  ;;  %v1014_v17 = vadd.f32 %v1450_v40, %v725_v15  ;;  %v1214_v18 = vpop.f32.mrb[26].mxu0  ;;  %v1246_v19 = vpop.f32.mrb[26].mxu1 }
 0x128   :  { %1048 = vst [vmem:[%s1711_s3 + $0xd0] sm:$0xff] %v984_v12  ;;  %1080 = vst [vmem:[%s1711_s3 + $0x1d0] sm:$0xff] %v1016_v13  ;;  %v985_v20 = vadd.f32 %v1214_v18, %v1450_v40  ;;  %v1017_v21 = vadd.f32 %v1246_v19, %v1450_v40  ;;  %v600_v22 = vpop.f32.mrb[27].mxu0  ;;  %v728_v23 = vpop.f32.mrb[27].mxu1 }
 0x129   :  { %1046 = vst [vmem:[%s1711_s3 + $0xc0] sm:$0xff] %v982_v16  ;;  %1078 = vst [vmem:[%s1711_s3 + $0x1c0] sm:$0xff] %v1014_v17  ;;  %v983_v24 = vadd.f32 %v1450_v40, %v600_v22  ;;  %v1015_v25 = vadd.f32 %v1450_v40, %v728_v23 }
 0x12a   :  { %1049 = vst [vmem:[%s1711_s3 + $0xd8] sm:$0xff] %v985_v20  ;;  %1081 = vst [vmem:[%s1711_s3 + $0x1d8] sm:$0xff] %v1017_v21 }
 0x12b   :  { %1047 = vst [vmem:[%s1711_s3 + $0xc8] sm:$0xff] %v983_v24  ;;  %1079 = vst [vmem:[%s1711_s3 + $0x1c8] sm:$0xff] %v1015_v25 }
 0x12d   :  { %v1217_v26 = vpop.f32.mrb[28].mxu0  ;;  %v1249_v27 = vpop.f32.mrb[28].mxu1 }
 0x12e   :  { %v988_v28 = vadd.f32 %v1217_v26, %v1450_v40  ;;  %v1020_v29 = vadd.f32 %v1249_v27, %v1450_v40  ;;  %v613_v30 = vpop.f32.mrb[29].mxu0  ;;  %v741_v31 = vpop.f32.mrb[29].mxu1 }
 0x12f   :  { %v986_v32 = vadd.f32 %v1450_v40, %v613_v30  ;;  %v1018_v33 = vadd.f32 %v1450_v40, %v741_v31  ;;  %v1218_v34 = vpop.f32.mrb[30].mxu0  ;;  %v1250_v35 = vpop.f32.mrb[30].mxu1 }
 0x130   :  { %1052 = vst [vmem:[%s1711_s3 + $0xf0] sm:$0xff] %v988_v28  ;;  %1084 = vst [vmem:[%s1711_s3 + $0x1f0] sm:$0xff] %v1020_v29  ;;  %v989_v36 = vadd.f32 %v1218_v34, %v1450_v40  ;;  %v1021_v37 = vadd.f32 %v1250_v35, %v1450_v40  ;;  %v616_v38 = vpop.f32.mrb[31].mxu0  ;;  %v744_v39 = vpop.f32.mrb[31].mxu1 }
 0x131   :  { %1050 = vst [vmem:[%s1711_s3 + $0xe0] sm:$0xff] %v986_v32  ;;  %1082 = vst [vmem:[%s1711_s3 + $0x1e0] sm:$0xff] %v1018_v33  ;;  %v987_v41 = vadd.f32 %v1450_v40, %v616_v38  ;;  %v1019_v42 = vadd.f32 %v1450_v40, %v744_v39 }
 0x132   :  { %1053 = vst [vmem:[%s1711_s3 + $0xf8] sm:$0xff] %v989_v36  ;;  %1085 = vst [vmem:[%s1711_s3 + $0x1f8] sm:$0xff] %v1021_v37 }
 0x133   :  { %1051 = vst [vmem:[%s1711_s3 + $0xe8] sm:$0xff] %v987_v41  ;;  %1083 = vst [vmem:[%s1711_s3 + $0x1e8] sm:$0xff] %v1019_v42 }

// kernel: image_encoder_attnpool_forward.34
= control target key start
LH: loop header
LB: loop body
LE: loop exit
PB: predicated region body
PF: predicated region fallthrough
CT: control target
= control target key end

     0   :  { %s142_s0 = inlined_call_operand.vmem [shape: f32[4,2048], index: 0, kind: input, shape index: {}]   ;;  %s143_s1 = inlined_call_operand.vmem [shape: f32[4,2048], index: 1, kind: input, shape index: {}]   ;;  %s144_s2 = inlined_call_operand.vmem [shape: f32[4,2048], index: 2, kind: output, shape index: {}]  }
   0x1   :  { %v11_v0 = vld [vmem:[%s142_s0] sm:$0xff]  ;;  %v12_v2 = vld [vmem:[%s142_s0 + $0x8] sm:$0xff]  ;;  %v13_v5 = vld [vmem:[%s142_s0 + $0x10] sm:$0xff] }
   0x2   :  { %v19_v1 = vld [vmem:[%s143_s1] sm:$0xff]  ;;  %v20_v4 = vld [vmem:[%s143_s1 + $0x8] sm:$0xff]  ;;  %v21_v6 = vld [vmem:[%s143_s1 + $0x10] sm:$0xff] }
   0x3   :  { %v27_v3 = vadd.f32 %v19_v1, %v11_v0  ;;  %v28_v7 = vadd.f32 %v20_v4, %v12_v2  ;;  %v29_v8 = vadd.f32 %v21_v6, %v13_v5  ;;  %v14_v9 = vld [vmem:[%s142_s0 + $0x18] sm:$0xff]  ;;  %v15_v11 = vld [vmem:[%s142_s0 + $0x20] sm:$0xff]  ;;  %v16_v15 = vld [vmem:[%s142_s0 + $0x28] sm:$0xff] }
   0x4   :  { %v22_v10 = vld [vmem:[%s143_s1 + $0x18] sm:$0xff]  ;;  %v23_v14 = vld [vmem:[%s143_s1 + $0x20] sm:$0xff]  ;;  %v24_v16 = vld [vmem:[%s143_s1 + $0x28] sm:$0xff] }
   0x5   :  { %v35_v12 = vmax.f32 %v27_v3, 0.0  ;;  %v30_v13 = vadd.f32 %v22_v10, %v14_v9  ;;  %v36_v17 = vmax.f32 %v28_v7, 0.0  ;;  %v37_v18 = vmax.f32 %v29_v8, 0.0  ;;  %v17_v21 = vld [vmem:[%s142_s0 + $0x30] sm:$0xff]  ;;  %v18_v23 = vld [vmem:[%s142_s0 + $0x38] sm:$0xff] }
   0x6   :  { %v31_v19 = vadd.f32 %v23_v14, %v15_v11  ;;  %v32_v20 = vadd.f32 %v24_v16, %v16_v15  ;;  %v25_v22 = vld [vmem:[%s143_s1 + $0x30] sm:$0xff]  ;;  %v26_v26 = vld [vmem:[%s143_s1 + $0x38] sm:$0xff] }
   0x7   :  { %43 = vst [vmem:[%s144_s2] sm:$0xff] %v35_v12  ;;  %v38_v24 = vmax.f32 %v30_v13, 0.0  ;;  %v33_v25 = vadd.f32 %v25_v22, %v17_v21  ;;  %44 = vst [vmem:[%s144_s2 + $0x8] sm:$0xff] %v36_v17  ;;  %v34_v29 = vadd.f32 %v26_v26, %v18_v23 }
   0x8   :  { %45 = vst [vmem:[%s144_s2 + $0x10] sm:$0xff] %v37_v18  ;;  %v39_v27 = vmax.f32 %v31_v19, 0.0  ;;  %v40_v28 = vmax.f32 %v32_v20, 0.0 }
   0x9   :  { %46 = vst [vmem:[%s144_s2 + $0x18] sm:$0xff] %v38_v24  ;;  %v41_v30 = vmax.f32 %v33_v25, 0.0  ;;  %v42_v31 = vmax.f32 %v34_v29, 0.0 }
   0xa   :  { %47 = vst [vmem:[%s144_s2 + $0x20] sm:$0xff] %v39_v27  ;;  %48 = vst [vmem:[%s144_s2 + $0x28] sm:$0xff] %v40_v28 }
   0xb   :  { %49 = vst [vmem:[%s144_s2 + $0x30] sm:$0xff] %v41_v30  ;;  %50 = vst [vmem:[%s144_s2 + $0x38] sm:$0xff] %v42_v31 }

// kernel: image_encoder_attnpool_forward.36
= control target key start
LH: loop header
LB: loop body
LE: loop exit
PB: predicated region body
PF: predicated region fallthrough
CT: control target
= control target key end

     0   :  { %s602_s1 = inlined_call_operand.vmem [shape: bf16[128,128], index: 1, kind: input, shape index: {}]   ;;  %s603_s0 = inlined_call_operand.vmem [shape: bf16[128,128], index: 0, kind: input, shape index: {}]   ;;  %s604_s2 = inlined_call_operand.vmem [shape: f32[1,128], index: 2, kind: input, shape index: {}]   ;;  %s605_s3 = inlined_call_operand.vmem [shape: f32[128,128], index: 3, kind: output, shape index: {}]  }
   0x1   :  { %v467_v0 = vld [vmem:[%s602_s1] sm:$0xff]   ;;  %v468_v1 = vld [vmem:[%s602_s1 + $0x8] sm:$0xff]   ;;  %v469_v2 = vld [vmem:[%s602_s1 + $0x10] sm:$0xff]  }
   0x2   :  { %419 = vmatprep.subr.bf16.mxu0 %v467_v0  ;;  %451 = vmatprep.subr.bf16.mxu1 %v467_v0  ;;  %v470_v3 = vld [vmem:[%s602_s1 + $0x18] sm:$0xff]   ;;  %v475_v4 = vld [vmem:[%s603_s0] sm:$0xff]   ;;  %v472_v7 = vld [vmem:[%s602_s1 + $0x28] sm:$0xff]  }
   0x3   :  { %420 = vmatpush3.bf16.msra.mxu0 %v467_v0  ;;  %459 = vmatpush3.bf16.msra.mxu1 %v467_v0  ;;  %v476_v5 = vld [vmem:[%s603_s0 + $0x20] sm:$0xff]   ;;  %v473_v8 = vld [vmem:[%s602_s1 + $0x30] sm:$0xff]   ;;  %v474_v9 = vld [vmem:[%s602_s1 + $0x38] sm:$0xff]  }
   0x4   :  { %421 = vmatprep.subr.bf16.mxu0 %v468_v1  ;;  %452 = vmatprep.subr.bf16.mxu1 %v468_v1  ;;  %v471_v6 = vld [vmem:[%s602_s1 + $0x20] sm:$0xff]   ;;  %v477_v10 = vld [vmem:[%s603_s0 + $0x8] sm:$0xff]   ;;  %v479_v12 = vld [vmem:[%s603_s0 + $0x10] sm:$0xff]  }
   0x5   :  { %435 = vmatprep.mubr.bf16.mxu0 %v475_v4  ;;  %443 = vmatprep.mubr.bf16.mxu1 %v476_v5  ;;  %v478_v11 = vld [vmem:[%s603_s0 + $0x28] sm:$0xff]   ;;  %v480_v13 = vld [vmem:[%s603_s0 + $0x30] sm:$0xff]   ;;  %v481_v14 = vld [vmem:[%s603_s0 + $0x18] sm:$0xff]  }
   0x6   :  { %v482_v15 = vld [vmem:[%s603_s0 + $0x38] sm:$0xff]   ;;  %v402_v16 = vld [vmem:[%s604_s2] ss:$0 sm:$0xff] }
   0x7   :  { %422 = vmatpush3.bf16.msra.mxu0 %v468_v1  ;;  %460 = vmatpush3.bf16.msra.mxu1 %v468_v1 }
   0x8   :  { %423 = vmatprep.subr.bf16.mxu0 %v469_v2  ;;  %453 = vmatprep.subr.bf16.mxu1 %v469_v2 }
   0xb   :  { %424 = vmatpush3.bf16.msra.mxu0 %v469_v2  ;;  %461 = vmatpush3.bf16.msra.mxu1 %v469_v2 }
   0xc   :  { %425 = vmatprep.subr.bf16.mxu0 %v470_v3  ;;  %454 = vmatprep.subr.bf16.mxu1 %v470_v3 }
   0xf   :  { %426 = vmatpush3.bf16.msra.mxu0 %v470_v3  ;;  %462 = vmatpush3.bf16.msra.mxu1 %v470_v3 }
  0x10   :  { %427 = vmatprep.subr.bf16.mxu0 %v471_v6  ;;  %455 = vmatprep.subr.bf16.mxu1 %v471_v6 }
  0x13   :  { %428 = vmatpush3.bf16.msra.mxu0 %v471_v6  ;;  %463 = vmatpush3.bf16.msra.mxu1 %v471_v6 }
  0x14   :  { %429 = vmatprep.subr.bf16.mxu0 %v472_v7  ;;  %456 = vmatprep.subr.bf16.mxu1 %v472_v7 }
  0x17   :  { %430 = vmatpush3.bf16.msra.mxu0 %v472_v7  ;;  %464 = vmatpush3.bf16.msra.mxu1 %v472_v7 }
  0x18   :  { %431 = vmatprep.subr.bf16.mxu0 %v473_v8  ;;  %457 = vmatprep.subr.bf16.mxu1 %v473_v8 }
  0x1b   :  { %432 = vmatpush3.bf16.msra.mxu0 %v473_v8  ;;  %465 = vmatpush3.bf16.msra.mxu1 %v473_v8 }
  0x1c   :  { %433 = vmatprep.subr.bf16.mxu0 %v474_v9  ;;  %458 = vmatprep.subr.bf16.mxu1 %v474_v9 }
  0x1f   :  { %434 = vmatpush3.bf16.msra.mxu0 %v474_v9  ;;  %466 = vmatpush3.bf16.msra.mxu1 %v474_v9 }
  0x22   :  { %436 = vmatmul.mubr.bf16.vlgmr.msra.gmra.mrb[0].mxu0 %v477_v10  ;;  %444 = vmatmul.mubr.bf16.vlgmr.msra.gmra.mrb[0].mxu1 %v478_v11 }
  0x23   :  { %439 = vmatprep.mubr.bf16.mxu0 %v479_v12  ;;  %447 = vmatprep.mubr.bf16.mxu1 %v480_v13 }
  0x2a   :  { %440 = vmatmul.mubr.bf16.gmra.mrb[4].mxu0 %v481_v14  ;;  %448 = vmatmul.mubr.bf16.gmra.mrb[4].mxu1 %v482_v15 }
  0xf5   :  { %v437_v17 = vpop.f32.mrb[0].mxu0  ;;  %v445_v18 = vpop.f32.mrb[0].mxu1 }
  0xf6   :  { %v336_v19 = vadd.f32 %v437_v17, %v402_v16  ;;  %v344_v20 = vadd.f32 %v445_v18, %v402_v16  ;;  %v213_v21 = vpop.f32.mrb[1].mxu0  ;;  %v245_v22 = vpop.f32.mrb[1].mxu1 }
  0xf7   :  { %v334_v23 = vadd.f32 %v402_v16, %v213_v21  ;;  %v342_v24 = vadd.f32 %v402_v16, %v245_v22  ;;  %v438_v25 = vpop.f32.mrb[2].mxu0  ;;  %v446_v26 = vpop.f32.mrb[2].mxu1 }
  0xf8   :  { %v352_v27 = vmax.f32 %v336_v19, 0.0  ;;  %v360_v28 = vmax.f32 %v344_v20, 0.0  ;;  %v337_v29 = vadd.f32 %v438_v25, %v402_v16  ;;  %v345_v30 = vadd.f32 %v446_v26, %v402_v16  ;;  %v216_v31 = vpop.f32.mrb[3].mxu0  ;;  %v248_v32 = vpop.f32.mrb[3].mxu1 }
  0xf9   :  { %v350_v33 = vmax.f32 %v334_v23, 0.0  ;;  %v358_v34 = vmax.f32 %v342_v24, 0.0  ;;  %v335_v35 = vadd.f32 %v402_v16, %v216_v31  ;;  %v343_v36 = vadd.f32 %v402_v16, %v248_v32 }
  0xfa   :  { %368 = vst [vmem:[%s605_s3 + $0x10] sm:$0xff] %v352_v27  ;;  %376 = vst [vmem:[%s605_s3 + $0x50] sm:$0xff] %v360_v28  ;;  %v353_v37 = vmax.f32 %v337_v29, 0.0  ;;  %v361_v38 = vmax.f32 %v345_v30, 0.0 }
  0xfb   :  { %366 = vst [vmem:[%s605_s3] sm:$0xff] %v350_v33  ;;  %374 = vst [vmem:[%s605_s3 + $0x40] sm:$0xff] %v358_v34  ;;  %v351_v39 = vmax.f32 %v335_v35, 0.0  ;;  %v359_v40 = vmax.f32 %v343_v36, 0.0 }
  0xfc   :  { %369 = vst [vmem:[%s605_s3 + $0x18] sm:$0xff] %v353_v37  ;;  %377 = vst [vmem:[%s605_s3 + $0x58] sm:$0xff] %v361_v38 }
  0xfd   :  { %367 = vst [vmem:[%s605_s3 + $0x8] sm:$0xff] %v351_v39  ;;  %375 = vst [vmem:[%s605_s3 + $0x48] sm:$0xff] %v359_v40  ;;  %v441_v41 = vpop.f32.mrb[4].mxu0  ;;  %v449_v42 = vpop.f32.mrb[4].mxu1 }
  0xfe   :  { %v340_v43 = vadd.f32 %v441_v41, %v402_v16  ;;  %v348_v44 = vadd.f32 %v449_v42, %v402_v16  ;;  %v229_v45 = vpop.f32.mrb[5].mxu0  ;;  %v261_v46 = vpop.f32.mrb[5].mxu1 }
  0xff   :  { %v338_v47 = vadd.f32 %v402_v16, %v229_v45  ;;  %v346_v48 = vadd.f32 %v402_v16, %v261_v46  ;;  %v442_v49 = vpop.f32.mrb[6].mxu0  ;;  %v450_v50 = vpop.f32.mrb[6].mxu1 }
 0x100   :  { %v356_v51 = vmax.f32 %v340_v43, 0.0  ;;  %v364_v52 = vmax.f32 %v348_v44, 0.0  ;;  %v341_v53 = vadd.f32 %v442_v49, %v402_v16  ;;  %v349_v54 = vadd.f32 %v450_v50, %v402_v16  ;;  %v232_v55 = vpop.f32.mrb[7].mxu0  ;;  %v264_v56 = vpop.f32.mrb[7].mxu1 }
 0x101   :  { %v354_v57 = vmax.f32 %v338_v47, 0.0  ;;  %v362_v58 = vmax.f32 %v346_v48, 0.0  ;;  %v339_v59 = vadd.f32 %v402_v16, %v232_v55  ;;  %v347_v60 = vadd.f32 %v402_v16, %v264_v56 }
 0x102   :  { %372 = vst [vmem:[%s605_s3 + $0x30] sm:$0xff] %v356_v51  ;;  %380 = vst [vmem:[%s605_s3 + $0x70] sm:$0xff] %v364_v52  ;;  %v357_v61 = vmax.f32 %v341_v53, 0.0  ;;  %v365_v62 = vmax.f32 %v349_v54, 0.0 }
 0x103   :  { %370 = vst [vmem:[%s605_s3 + $0x20] sm:$0xff] %v354_v57  ;;  %378 = vst [vmem:[%s605_s3 + $0x60] sm:$0xff] %v362_v58  ;;  %v355_v63 = vmax.f32 %v339_v59, 0.0  ;;  %v363_v0 = vmax.f32 %v347_v60, 0.0 }
 0x104   :  { %373 = vst [vmem:[%s605_s3 + $0x38] sm:$0xff] %v357_v61  ;;  %381 = vst [vmem:[%s605_s3 + $0x78] sm:$0xff] %v365_v62 }
 0x105   :  { %371 = vst [vmem:[%s605_s3 + $0x28] sm:$0xff] %v355_v63  ;;  %379 = vst [vmem:[%s605_s3 + $0x68] sm:$0xff] %v363_v0 }

// kernel: image_encoder_attnpool_forward.37
= control target key start
LH: loop header
LB: loop body
LE: loop exit
PB: predicated region body
PF: predicated region fallthrough
CT: control target
= control target key end

     0   :  { %s586_s1 = inlined_call_operand.vmem [shape: bf16[128,128], index: 1, kind: input, shape index: {}]   ;;  %s587_s0 = inlined_call_operand.vmem [shape: bf16[128,128], index: 0, kind: input, shape index: {}]   ;;  %s588_s2 = inlined_call_operand.vmem [shape: f32[1,128], index: 2, kind: input, shape index: {}]   ;;  %s589_s3 = inlined_call_operand.vmem [shape: f32[128,128], index: 3, kind: output, shape index: {}]  }
   0x1   :  { %v451_v0 = vld [vmem:[%s586_s1] sm:$0xff]   ;;  %v452_v1 = vld [vmem:[%s586_s1 + $0x8] sm:$0xff]   ;;  %v453_v2 = vld [vmem:[%s586_s1 + $0x10] sm:$0xff]  }
   0x2   :  { %403 = vmatprep.subr.bf16.mxu0 %v451_v0  ;;  %435 = vmatprep.subr.bf16.mxu1 %v451_v0  ;;  %v454_v3 = vld [vmem:[%s586_s1 + $0x18] sm:$0xff]   ;;  %v459_v4 = vld [vmem:[%s587_s0] sm:$0xff]   ;;  %v456_v7 = vld [vmem:[%s586_s1 + $0x28] sm:$0xff]  }
   0x3   :  { %404 = vmatpush3.bf16.msra.mxu0 %v451_v0  ;;  %443 = vmatpush3.bf16.msra.mxu1 %v451_v0  ;;  %v460_v5 = vld [vmem:[%s587_s0 + $0x20] sm:$0xff]   ;;  %v457_v8 = vld [vmem:[%s586_s1 + $0x30] sm:$0xff]   ;;  %v458_v9 = vld [vmem:[%s586_s1 + $0x38] sm:$0xff]  }
   0x4   :  { %405 = vmatprep.subr.bf16.mxu0 %v452_v1  ;;  %436 = vmatprep.subr.bf16.mxu1 %v452_v1  ;;  %v455_v6 = vld [vmem:[%s586_s1 + $0x20] sm:$0xff]   ;;  %v461_v10 = vld [vmem:[%s587_s0 + $0x8] sm:$0xff]   ;;  %v463_v12 = vld [vmem:[%s587_s0 + $0x10] sm:$0xff]  }
   0x5   :  { %419 = vmatprep.mubr.bf16.mxu0 %v459_v4  ;;  %427 = vmatprep.mubr.bf16.mxu1 %v460_v5  ;;  %v462_v11 = vld [vmem:[%s587_s0 + $0x28] sm:$0xff]   ;;  %v464_v13 = vld [vmem:[%s587_s0 + $0x30] sm:$0xff]   ;;  %v465_v14 = vld [vmem:[%s587_s0 + $0x18] sm:$0xff]  }
   0x6   :  { %v466_v15 = vld [vmem:[%s587_s0 + $0x38] sm:$0xff]   ;;  %v386_v16 = vld [vmem:[%s588_s2] ss:$0 sm:$0xff] }
   0x7   :  { %406 = vmatpush3.bf16.msra.mxu0 %v452_v1  ;;  %444 = vmatpush3.bf16.msra.mxu1 %v452_v1 }
   0x8   :  { %407 = vmatprep.subr.bf16.mxu0 %v453_v2  ;;  %437 = vmatprep.subr.bf16.mxu1 %v453_v2 }
   0xb   :  { %408 = vmatpush3.bf16.msra.mxu0 %v453_v2  ;;  %445 = vmatpush3.bf16.msra.mxu1 %v453_v2 }
   0xc   :  { %409 = vmatprep.subr.bf16.mxu0 %v454_v3  ;;  %438 = vmatprep.subr.bf16.mxu1 %v454_v3 }
   0xf   :  { %410 = vmatpush3.bf16.msra.mxu0 %v454_v3  ;;  %446 = vmatpush3.bf16.msra.mxu1 %v454_v3 }
  0x10   :  { %411 = vmatprep.subr.bf16.mxu0 %v455_v6  ;;  %439 = vmatprep.subr.bf16.mxu1 %v455_v6 }
  0x13   :  { %412 = vmatpush3.bf16.msra.mxu0 %v455_v6  ;;  %447 = vmatpush3.bf16.msra.mxu1 %v455_v6 }
  0x14   :  { %413 = vmatprep.subr.bf16.mxu0 %v456_v7  ;;  %440 = vmatprep.subr.bf16.mxu1 %v456_v7 }
  0x17   :  { %414 = vmatpush3.bf16.msra.mxu0 %v456_v7  ;;  %448 = vmatpush3.bf16.msra.mxu1 %v456_v7 }
  0x18   :  { %415 = vmatprep.subr.bf16.mxu0 %v457_v8  ;;  %441 = vmatprep.subr.bf16.mxu1 %v457_v8 }
  0x1b   :  { %416 = vmatpush3.bf16.msra.mxu0 %v457_v8  ;;  %449 = vmatpush3.bf16.msra.mxu1 %v457_v8 }
  0x1c   :  { %417 = vmatprep.subr.bf16.mxu0 %v458_v9  ;;  %442 = vmatprep.subr.bf16.mxu1 %v458_v9 }
  0x1f   :  { %418 = vmatpush3.bf16.msra.mxu0 %v458_v9  ;;  %450 = vmatpush3.bf16.msra.mxu1 %v458_v9 }
  0x22   :  { %420 = vmatmul.mubr.bf16.vlgmr.msra.gmra.mrb[0].mxu0 %v461_v10  ;;  %428 = vmatmul.mubr.bf16.vlgmr.msra.gmra.mrb[0].mxu1 %v462_v11 }
  0x23   :  { %423 = vmatprep.mubr.bf16.mxu0 %v463_v12  ;;  %431 = vmatprep.mubr.bf16.mxu1 %v464_v13 }
  0x2a   :  { %424 = vmatmul.mubr.bf16.gmra.mrb[4].mxu0 %v465_v14  ;;  %432 = vmatmul.mubr.bf16.gmra.mrb[4].mxu1 %v466_v15 }
  0xf5   :  { %v421_v17 = vpop.f32.mrb[0].mxu0  ;;  %v429_v18 = vpop.f32.mrb[0].mxu1 }
  0xf6   :  { %v336_v19 = vadd.f32 %v421_v17, %v386_v16  ;;  %v344_v20 = vadd.f32 %v429_v18, %v386_v16  ;;  %v213_v21 = vpop.f32.mrb[1].mxu0  ;;  %v245_v22 = vpop.f32.mrb[1].mxu1 }
  0xf7   :  { %v334_v23 = vadd.f32 %v386_v16, %v213_v21  ;;  %v342_v24 = vadd.f32 %v386_v16, %v245_v22  ;;  %v422_v25 = vpop.f32.mrb[2].mxu0  ;;  %v430_v26 = vpop.f32.mrb[2].mxu1 }
  0xf8   :  { %352 = vst [vmem:[%s589_s3 + $0x10] sm:$0xff] %v336_v19  ;;  %360 = vst [vmem:[%s589_s3 + $0x50] sm:$0xff] %v344_v20  ;;  %v337_v27 = vadd.f32 %v422_v25, %v386_v16  ;;  %v345_v28 = vadd.f32 %v430_v26, %v386_v16  ;;  %v216_v29 = vpop.f32.mrb[3].mxu0  ;;  %v248_v30 = vpop.f32.mrb[3].mxu1 }
  0xf9   :  { %350 = vst [vmem:[%s589_s3] sm:$0xff] %v334_v23  ;;  %358 = vst [vmem:[%s589_s3 + $0x40] sm:$0xff] %v342_v24  ;;  %v335_v31 = vadd.f32 %v386_v16, %v216_v29  ;;  %v343_v32 = vadd.f32 %v386_v16, %v248_v30 }
  0xfa   :  { %353 = vst [vmem:[%s589_s3 + $0x18] sm:$0xff] %v337_v27  ;;  %361 = vst [vmem:[%s589_s3 + $0x58] sm:$0xff] %v345_v28 }
  0xfb   :  { %351 = vst [vmem:[%s589_s3 + $0x8] sm:$0xff] %v335_v31  ;;  %359 = vst [vmem:[%s589_s3 + $0x48] sm:$0xff] %v343_v32 }
  0xfd   :  { %v425_v33 = vpop.f32.mrb[4].mxu0  ;;  %v433_v34 = vpop.f32.mrb[4].mxu1 }
  0xfe   :  { %v340_v35 = vadd.f32 %v425_v33, %v386_v16  ;;  %v348_v36 = vadd.f32 %v433_v34, %v386_v16  ;;  %v229_v37 = vpop.f32.mrb[5].mxu0  ;;  %v261_v38 = vpop.f32.mrb[5].mxu1 }
  0xff   :  { %v338_v39 = vadd.f32 %v386_v16, %v229_v37  ;;  %v346_v40 = vadd.f32 %v386_v16, %v261_v38  ;;  %v426_v41 = vpop.f32.mrb[6].mxu0  ;;  %v434_v42 = vpop.f32.mrb[6].mxu1 }
 0x100   :  { %356 = vst [vmem:[%s589_s3 + $0x30] sm:$0xff] %v340_v35  ;;  %364 = vst [vmem:[%s589_s3 + $0x70] sm:$0xff] %v348_v36  ;;  %v341_v43 = vadd.f32 %v426_v41, %v386_v16  ;;  %v349_v44 = vadd.f32 %v434_v42, %v386_v16  ;;  %v232_v45 = vpop.f32.mrb[7].mxu0  ;;  %v264_v46 = vpop.f32.mrb[7].mxu1 }
 0x101   :  { %354 = vst [vmem:[%s589_s3 + $0x20] sm:$0xff] %v338_v39  ;;  %362 = vst [vmem:[%s589_s3 + $0x60] sm:$0xff] %v346_v40  ;;  %v339_v47 = vadd.f32 %v386_v16, %v232_v45  ;;  %v347_v48 = vadd.f32 %v386_v16, %v264_v46 }
 0x102   :  { %357 = vst [vmem:[%s589_s3 + $0x38] sm:$0xff] %v341_v43  ;;  %365 = vst [vmem:[%s589_s3 + $0x78] sm:$0xff] %v349_v44 }
 0x103   :  { %355 = vst [vmem:[%s589_s3 + $0x28] sm:$0xff] %v339_v47  ;;  %363 = vst [vmem:[%s589_s3 + $0x68] sm:$0xff] %v347_v48 }

// kernel: image_encoder_attnpool_forward.39
= control target key start
LH: loop header
LB: loop body
LE: loop exit
PB: predicated region body
PF: predicated region fallthrough
CT: control target
= control target key end

     0   :  { %s86_s0 = inlined_call_operand.vmem [shape: f32[2,2048], index: 0, kind: input, shape index: {}]   ;;  %s87_s1 = inlined_call_operand.vmem [shape: f32[2,2048], index: 1, kind: input, shape index: {}]   ;;  %s88_s2 = inlined_call_operand.vmem [shape: f32[2,2048], index: 2, kind: output, shape index: {}]  }
   0x1   :  { %v11_v0 = vld [vmem:[%s86_s0] sm:$0xff]  ;;  %v12_v2 = vld [vmem:[%s86_s0 + $0x8] sm:$0xff]  ;;  %v13_v5 = vld [vmem:[%s86_s0 + $0x10] sm:$0xff] }
   0x2   :  { %v15_v1 = vld [vmem:[%s87_s1] sm:$0xff]  ;;  %v16_v4 = vld [vmem:[%s87_s1 + $0x8] sm:$0xff]  ;;  %v17_v6 = vld [vmem:[%s87_s1 + $0x10] sm:$0xff] }
   0x3   :  { %v19_v3 = vadd.f32 %v15_v1, %v11_v0  ;;  %v20_v7 = vadd.f32 %v16_v4, %v12_v2  ;;  %v21_v8 = vadd.f32 %v17_v6, %v13_v5  ;;  %v14_v9 = vld [vmem:[%s86_s0 + $0x18] sm:$0xff] }
   0x4   :  { %v18_v10 = vld [vmem:[%s87_s1 + $0x18] sm:$0xff] }
   0x5   :  { %v23_v11 = vmax.f32 %v19_v3, 0.0  ;;  %v22_v12 = vadd.f32 %v18_v10, %v14_v9  ;;  %v24_v13 = vmax.f32 %v20_v7, 0.0  ;;  %v25_v14 = vmax.f32 %v21_v8, 0.0 }
   0x7   :  { %27 = vst [vmem:[%s88_s2] sm:$0xff] %v23_v11  ;;  %v26_v15 = vmax.f32 %v22_v12, 0.0  ;;  %28 = vst [vmem:[%s88_s2 + $0x8] sm:$0xff] %v24_v13 }
   0x8   :  { %29 = vst [vmem:[%s88_s2 + $0x10] sm:$0xff] %v25_v14 }
   0x9   :  { %30 = vst [vmem:[%s88_s2 + $0x18] sm:$0xff] %v26_v15 }

// kernel: image_encoder_attnpool_forward.41
= control target key start
LH: loop header
LB: loop body
LE: loop exit
PB: predicated region body
PF: predicated region fallthrough
CT: control target
= control target key end

     0   :  { %s448_s1 = inlined_call_operand.vmem [shape: bf16[256,128], index: 1, kind: input, shape index: {}]   ;;  %s449_s0 = inlined_call_operand.vmem [shape: bf16[32,256], index: 0, kind: input, shape index: {}]   ;;  %s450_s2 = inlined_call_operand.vmem [shape: f32[1,128], index: 2, kind: input, shape index: {}]   ;;  %s451_s3 = inlined_call_operand.vmem [shape: f32[32,128], index: 3, kind: output, shape index: {}]  }
   0x1   :  { %v331_v0 = vld [vmem:[%s448_s1 + $0x40] sm:$0xff]   ;;  %v333_v2 = vld [vmem:[%s448_s1 + $0x48] sm:$0xff]   ;;  %v335_v4 = vld [vmem:[%s448_s1 + $0x50] sm:$0xff]  }
   0x2   :  { %v332_v1 = vld [vmem:[%s448_s1] sm:$0xff]   ;;  %287 = vmatprep.subr.bf16.mxu0 %v331_v0  ;;  %315 = vmatprep.subr.bf16.mxu1 %v331_v0  ;;  %v334_v3 = vld [vmem:[%s448_s1 + $0x8] sm:$0xff]   ;;  %v336_v5 = vld [vmem:[%s448_s1 + $0x10] sm:$0xff]  }
   0x3   :  { %288 = vmatpush3.bf16.msra.mxu0 %v332_v1  ;;  %323 = vmatpush3.bf16.msra.mxu1 %v332_v1  ;;  %v337_v6 = vld [vmem:[%s448_s1 + $0x58] sm:$0xff]   ;;  %v339_v8 = vld [vmem:[%s448_s1 + $0x60] sm:$0xff]   ;;  %v341_v10 = vld [vmem:[%s448_s1 + $0x68] sm:$0xff]  }
   0x4   :  { %289 = vmatprep.subr.bf16.mxu0 %v333_v2  ;;  %316 = vmatprep.subr.bf16.mxu1 %v333_v2  ;;  %v338_v7 = vld [vmem:[%s448_s1 + $0x18] sm:$0xff]   ;;  %v340_v9 = vld [vmem:[%s448_s1 + $0x20] sm:$0xff]   ;;  %v342_v13 = vld [vmem:[%s448_s1 + $0x28] sm:$0xff]  }
   0x5   :  { %v349_v11 = vld [vmem:[%s449_s0 + $0x4] ss:$8 sps:$4 sm:$0xff]   ;;  %v352_v12 = vld [vmem:[%s449_s0 + $0x14] ss:$8 sps:$4 sm:$0xff]   ;;  %v347_v18 = vld [vmem:[%s449_s0] ss:$8 sps:$4 sm:$0xff]  }
   0x6   :  { %v343_v14 = vld [vmem:[%s448_s1 + $0x70] sm:$0xff]   ;;  %211 = vmatprep.mubr.bf16.mxu0 %v349_v11  ;;  %219 = vmatprep.mubr.bf16.mxu1 %v352_v12  ;;  %v345_v16 = vld [vmem:[%s448_s1 + $0x78] sm:$0xff]   ;;  %v286_v23 = vld [vmem:[%s450_s2] ss:$0 sm:$0xff] }
   0x7   :  { %290 = vmatpush3.bf16.msra.mxu0 %v334_v3  ;;  %324 = vmatpush3.bf16.msra.mxu1 %v334_v3  ;;  %v344_v15 = vld [vmem:[%s448_s1 + $0x30] sm:$0xff]   ;;  %v346_v17 = vld [vmem:[%s448_s1 + $0x38] sm:$0xff]  }
   0x8   :  { %291 = vmatprep.subr.bf16.mxu0 %v335_v4  ;;  %317 = vmatprep.subr.bf16.mxu1 %v335_v4  ;;  %v350_v19 = vld [vmem:[%s449_s0 + $0x10] ss:$8 sps:$4 sm:$0xff]  }
   0xb   :  { %292 = vmatpush3.bf16.msra.mxu0 %v336_v5  ;;  %325 = vmatpush3.bf16.msra.mxu1 %v336_v5 }
   0xc   :  { %293 = vmatprep.subr.bf16.mxu0 %v337_v6  ;;  %318 = vmatprep.subr.bf16.mxu1 %v337_v6 }
   0xf   :  { %294 = vmatpush3.bf16.msra.mxu0 %v338_v7  ;;  %326 = vmatpush3.bf16.msra.mxu1 %v338_v7 }
  0x10   :  { %295 = vmatprep.subr.bf16.mxu0 %v339_v8  ;;  %319 = vmatprep.subr.bf16.mxu1 %v339_v8 }
  0x13   :  { %296 = vmatpush3.bf16.msra.mxu0 %v340_v9  ;;  %327 = vmatpush3.bf16.msra.mxu1 %v340_v9 }
  0x14   :  { %297 = vmatprep.subr.bf16.mxu0 %v341_v10  ;;  %320 = vmatprep.subr.bf16.mxu1 %v341_v10 }
  0x17   :  { %298 = vmatpush3.bf16.msra.mxu0 %v342_v13  ;;  %328 = vmatpush3.bf16.msra.mxu1 %v342_v13 }
  0x18   :  { %299 = vmatprep.subr.bf16.mxu0 %v343_v14  ;;  %321 = vmatprep.subr.bf16.mxu1 %v343_v14 }
  0x1b   :  { %300 = vmatpush3.bf16.msra.mxu0 %v344_v15  ;;  %329 = vmatpush3.bf16.msra.mxu1 %v344_v15 }
  0x1c   :  { %301 = vmatprep.subr.bf16.mxu0 %v345_v16  ;;  %322 = vmatprep.subr.bf16.mxu1 %v345_v16 }
  0x1f   :  { %302 = vmatpush3.bf16.msra.mxu0 %v346_v17  ;;  %330 = vmatpush3.bf16.msra.mxu1 %v346_v17 }
  0x22   :  { %212 = vmatmul.mubr.bf16.vlgmr.msra.gmra.mrb[0].mxu0 %v347_v18  ;;  %220 = vmatmul.mubr.bf16.vlgmr.msra.gmra.mrb[0].mxu1 %v350_v19 }
  0xf5   :  { %v303_v20 = vpop.f32.mrb[0].mxu0  ;;  %v309_v21 = vpop.f32.mrb[0].mxu1 }
  0xf6   :  { %v304_v22 = vpop.f32.mrb[1].mxu0  ;;  %v310_v24 = vpop.f32.mrb[1].mxu1 }
  0xf7   :  { %v305_v25 = vadd.f32 %v304_v22, %v303_v20  ;;  %v311_v26 = vadd.f32 %v310_v24, %v309_v21  ;;  %v306_v27 = vpop.f32.mrb[2].mxu0  ;;  %v312_v28 = vpop.f32.mrb[2].mxu1 }
  0xf8   :  { %v307_v29 = vpop.f32.mrb[3].mxu0  ;;  %v313_v30 = vpop.f32.mrb[3].mxu1 }
  0xf9   :  { %v250_v31 = vadd.f32 %v305_v25, %v286_v23  ;;  %v252_v32 = vadd.f32 %v311_v26, %v286_v23  ;;  %v308_v33 = vadd.f32 %v307_v29, %v306_v27  ;;  %v314_v34 = vadd.f32 %v313_v30, %v312_v28 }
  0xfb   :  { %v254_v35 = vmax.f32 %v250_v31, 0.0  ;;  %v256_v36 = vmax.f32 %v252_v32, 0.0  ;;  %v251_v37 = vadd.f32 %v308_v33, %v286_v23  ;;  %v253_v38 = vadd.f32 %v314_v34, %v286_v23 }
  0xfd   :  { %258 = vst [vmem:[%s451_s3] sm:$0xff] %v254_v35  ;;  %260 = vst [vmem:[%s451_s3 + $0x10] sm:$0xff] %v256_v36  ;;  %v255_v39 = vmax.f32 %v251_v37, 0.0  ;;  %v257_v40 = vmax.f32 %v253_v38, 0.0 }
  0xff   :  { %259 = vst [vmem:[%s451_s3 + $0x8] sm:$0xff] %v255_v39  ;;  %261 = vst [vmem:[%s451_s3 + $0x18] sm:$0xff] %v257_v40 }

// kernel: image_encoder_attnpool_forward.42
= control target key start
LH: loop header
LB: loop body
LE: loop exit
PB: predicated region body
PF: predicated region fallthrough
CT: control target
= control target key end

     0   :  { %s306_s1 = inlined_call_operand.vmem [shape: bf16[128,128], index: 1, kind: input, shape index: {}]   ;;  %s307_s0 = inlined_call_operand.vmem [shape: bf16[32,128], index: 0, kind: input, shape index: {}]   ;;  %s308_s2 = inlined_call_operand.vmem [shape: f32[1,128], index: 2, kind: input, shape index: {}]   ;;  %s309_s3 = inlined_call_operand.vmem [shape: f32[32,128], index: 3, kind: output, shape index: {}]  }
   0x1   :  { %v231_v0 = vld [vmem:[%s306_s1] sm:$0xff]   ;;  %v232_v1 = vld [vmem:[%s306_s1 + $0x8] sm:$0xff]   ;;  %v233_v2 = vld [vmem:[%s306_s1 + $0x10] sm:$0xff]  }
   0x2   :  { %211 = vmatprep.subr.bf16.mxu0 %v231_v0  ;;  %v234_v3 = vld [vmem:[%s306_s1 + $0x18] sm:$0xff]   ;;  %v239_v4 = vld [vmem:[%s307_s0] sm:$0xff]   ;;  %v236_v6 = vld [vmem:[%s306_s1 + $0x28] sm:$0xff]  }
   0x3   :  { %212 = vmatpush3.bf16.msra.mxu0 %v231_v0  ;;  %227 = vmatprep.mubr.bf16.mxu0 %v239_v4  ;;  %v235_v5 = vld [vmem:[%s306_s1 + $0x20] sm:$0xff]   ;;  %v237_v7 = vld [vmem:[%s306_s1 + $0x30] sm:$0xff]   ;;  %v238_v8 = vld [vmem:[%s306_s1 + $0x38] sm:$0xff]  }
   0x4   :  { %213 = vmatprep.subr.bf16.mxu0 %v232_v1  ;;  %v240_v9 = vld [vmem:[%s307_s0 + $0x8] sm:$0xff]   ;;  %v200_v10 = vld [vmem:[%s308_s2] ss:$0 sm:$0xff] }
   0x7   :  { %214 = vmatpush3.bf16.msra.mxu0 %v232_v1 }
   0x8   :  { %215 = vmatprep.subr.bf16.mxu0 %v233_v2 }
   0xb   :  { %216 = vmatpush3.bf16.msra.mxu0 %v233_v2 }
   0xc   :  { %217 = vmatprep.subr.bf16.mxu0 %v234_v3 }
   0xf   :  { %218 = vmatpush3.bf16.msra.mxu0 %v234_v3 }
  0x10   :  { %219 = vmatprep.subr.bf16.mxu0 %v235_v5 }
  0x13   :  { %220 = vmatpush3.bf16.msra.mxu0 %v235_v5 }
  0x14   :  { %221 = vmatprep.subr.bf16.mxu0 %v236_v6 }
  0x17   :  { %222 = vmatpush3.bf16.msra.mxu0 %v236_v6 }
  0x18   :  { %223 = vmatprep.subr.bf16.mxu0 %v237_v7 }
  0x1b   :  { %224 = vmatpush3.bf16.msra.mxu0 %v237_v7 }
  0x1c   :  { %225 = vmatprep.subr.bf16.mxu0 %v238_v8 }
  0x1f   :  { %226 = vmatpush3.bf16.msra.mxu0 %v238_v8 }
  0x22   :  { %228 = vmatmul.mubr.bf16.vlgmr.msra.gmra.mrb[0].mxu0 %v240_v9 }
  0xf5   :  { %v229_v11 = vpop.f32.mrb[0].mxu0 }
  0xf6   :  { %v180_v12 = vadd.f32 %v229_v11, %v200_v10  ;;  %v141_v13 = vpop.f32.mrb[1].mxu0 }
  0xf7   :  { %v178_v14 = vadd.f32 %v200_v10, %v141_v13  ;;  %v230_v15 = vpop.f32.mrb[2].mxu0 }
  0xf8   :  { %184 = vst [vmem:[%s309_s3 + $0x10] sm:$0xff] %v180_v12  ;;  %v181_v16 = vadd.f32 %v230_v15, %v200_v10  ;;  %v144_v17 = vpop.f32.mrb[3].mxu0 }
  0xf9   :  { %182 = vst [vmem:[%s309_s3] sm:$0xff] %v178_v14  ;;  %v179_v18 = vadd.f32 %v200_v10, %v144_v17 }
  0xfa   :  { %185 = vst [vmem:[%s309_s3 + $0x18] sm:$0xff] %v181_v16 }
  0xfb   :  { %183 = vst [vmem:[%s309_s3 + $0x8] sm:$0xff] %v179_v18 }

// kernel: image_encoder_attnpool_forward.44
= control target key start
LH: loop header
LB: loop body
LE: loop exit
PB: predicated region body
PF: predicated region fallthrough
CT: control target
= control target key end

     0   :  { %s58_s0 = inlined_call_operand.vmem [shape: f32[1,2048], index: 0, kind: input, shape index: {}]   ;;  %s59_s1 = inlined_call_operand.vmem [shape: f32[1,2048], index: 1, kind: input, shape index: {}]   ;;  %s60_s2 = inlined_call_operand.vmem [shape: f32[1,2048], index: 2, kind: output, shape index: {}]  }
   0x1   :  { %v11_v0 = vld [vmem:[%s58_s0] sm:$0xff]  ;;  %v12_v2 = vld [vmem:[%s58_s0 + $0x8] sm:$0xff] }
   0x2   :  { %v13_v1 = vld [vmem:[%s59_s1] sm:$0xff]  ;;  %v14_v4 = vld [vmem:[%s59_s1 + $0x8] sm:$0xff] }
   0x3   :  { %v15_v3 = vadd.f32 %v13_v1, %v11_v0  ;;  %v16_v5 = vadd.f32 %v14_v4, %v12_v2 }
   0x5   :  { %v17_v6 = vmax.f32 %v15_v3, 0.0  ;;  %v18_v7 = vmax.f32 %v16_v5, 0.0 }
   0x7   :  { %19 = vst [vmem:[%s60_s2] sm:$0xff] %v17_v6  ;;  %20 = vst [vmem:[%s60_s2 + $0x8] sm:$0xff] %v18_v7 }

// kernel: image_encoder_attnpool_forward.45
= control target key start
LH: loop header
LB: loop body
LE: loop exit
PB: predicated region body
PF: predicated region fallthrough
CT: control target
= control target key end

     0   :  { %s310_s1 = inlined_call_operand.vmem [shape: bf16[128,128], index: 1, kind: input, shape index: {}]   ;;  %s311_s0 = inlined_call_operand.vmem [shape: bf16[32,128], index: 0, kind: input, shape index: {}]   ;;  %s312_s2 = inlined_call_operand.vmem [shape: f32[1,128], index: 2, kind: input, shape index: {}]   ;;  %s313_s3 = inlined_call_operand.vmem [shape: f32[32,128], index: 3, kind: output, shape index: {}]  }
   0x1   :  { %v235_v0 = vld [vmem:[%s310_s1] sm:$0xff]   ;;  %v236_v1 = vld [vmem:[%s310_s1 + $0x8] sm:$0xff]   ;;  %v237_v2 = vld [vmem:[%s310_s1 + $0x10] sm:$0xff]  }
   0x2   :  { %215 = vmatprep.subr.bf16.mxu0 %v235_v0  ;;  %v238_v3 = vld [vmem:[%s310_s1 + $0x18] sm:$0xff]   ;;  %v243_v4 = vld [vmem:[%s311_s0] sm:$0xff]   ;;  %v240_v6 = vld [vmem:[%s310_s1 + $0x28] sm:$0xff]  }
   0x3   :  { %216 = vmatpush3.bf16.msra.mxu0 %v235_v0  ;;  %231 = vmatprep.mubr.bf16.mxu0 %v243_v4  ;;  %v239_v5 = vld [vmem:[%s310_s1 + $0x20] sm:$0xff]   ;;  %v241_v7 = vld [vmem:[%s310_s1 + $0x30] sm:$0xff]   ;;  %v242_v8 = vld [vmem:[%s310_s1 + $0x38] sm:$0xff]  }
   0x4   :  { %217 = vmatprep.subr.bf16.mxu0 %v236_v1  ;;  %v244_v9 = vld [vmem:[%s311_s0 + $0x8] sm:$0xff]   ;;  %v204_v10 = vld [vmem:[%s312_s2] ss:$0 sm:$0xff] }
   0x7   :  { %218 = vmatpush3.bf16.msra.mxu0 %v236_v1 }
   0x8   :  { %219 = vmatprep.subr.bf16.mxu0 %v237_v2 }
   0xb   :  { %220 = vmatpush3.bf16.msra.mxu0 %v237_v2 }
   0xc   :  { %221 = vmatprep.subr.bf16.mxu0 %v238_v3 }
   0xf   :  { %222 = vmatpush3.bf16.msra.mxu0 %v238_v3 }
  0x10   :  { %223 = vmatprep.subr.bf16.mxu0 %v239_v5 }
  0x13   :  { %224 = vmatpush3.bf16.msra.mxu0 %v239_v5 }
  0x14   :  { %225 = vmatprep.subr.bf16.mxu0 %v240_v6 }
  0x17   :  { %226 = vmatpush3.bf16.msra.mxu0 %v240_v6 }
  0x18   :  { %227 = vmatprep.subr.bf16.mxu0 %v241_v7 }
  0x1b   :  { %228 = vmatpush3.bf16.msra.mxu0 %v241_v7 }
  0x1c   :  { %229 = vmatprep.subr.bf16.mxu0 %v242_v8 }
  0x1f   :  { %230 = vmatpush3.bf16.msra.mxu0 %v242_v8 }
  0x22   :  { %232 = vmatmul.mubr.bf16.vlgmr.msra.gmra.mrb[0].mxu0 %v244_v9 }
  0xf5   :  { %v233_v11 = vpop.f32.mrb[0].mxu0 }
  0xf6   :  { %v180_v12 = vadd.f32 %v233_v11, %v204_v10  ;;  %v141_v13 = vpop.f32.mrb[1].mxu0 }
  0xf7   :  { %v178_v14 = vadd.f32 %v204_v10, %v141_v13  ;;  %v234_v15 = vpop.f32.mrb[2].mxu0 }
  0xf8   :  { %v184_v16 = vmax.f32 %v180_v12, 0.0  ;;  %v181_v17 = vadd.f32 %v234_v15, %v204_v10  ;;  %v144_v18 = vpop.f32.mrb[3].mxu0 }
  0xf9   :  { %v182_v19 = vmax.f32 %v178_v14, 0.0  ;;  %v179_v20 = vadd.f32 %v204_v10, %v144_v18 }
  0xfa   :  { %188 = vst [vmem:[%s313_s3 + $0x10] sm:$0xff] %v184_v16  ;;  %v185_v21 = vmax.f32 %v181_v17, 0.0 }
  0xfb   :  { %186 = vst [vmem:[%s313_s3] sm:$0xff] %v182_v19  ;;  %v183_v22 = vmax.f32 %v179_v20, 0.0 }
  0xfc   :  { %189 = vst [vmem:[%s313_s3 + $0x18] sm:$0xff] %v185_v21 }
  0xfd   :  { %187 = vst [vmem:[%s313_s3 + $0x8] sm:$0xff] %v183_v22 }

// kernel: image_encoder_attnpool_forward.46
= control target key start
LH: loop header
LB: loop body
LE: loop exit
PB: predicated region body
PF: predicated region fallthrough
CT: control target
= control target key end

     0   :  { %s621_s12 = smov 0   ;;  %s623_s13 = smov 0   ;;  %s670_s0 = inlined_call_operand.vmem [shape: bf16[8,384], index: 0, kind: input, shape index: {}]   ;;  %s671_s1 = inlined_call_operand.vmem [shape: bf16[384,128], index: 1, kind: input, shape index: {}]   ;;  %s672_s2 = inlined_call_operand.vmem [shape: f32[1,128], index: 2, kind: input, shape index: {}]   ;;  %s673_s3 = inlined_call_operand.vmem [shape: f32[8,128], index: 3, kind: output, shape index: {}]  }
   0x1   :  { %s625_s14 = smov 0  }
   0x2 LB: > { %s25_s15 = sadd.s32 1, %s592_s13  ;;  %p492_p0 = scmp.ge.s32.totalorder %s596_s14, 1  ;;  %s596_s14 = sphi %s625_s14, %s13_s14   ;;  %s592_s13 = sphi %s623_s13, %s675_s13   ;;  %s588_s12 = sphi %s621_s12, %s674_s12  }
   0x3   : > { %p26_p1 = scmp.ge.s32.totalorder %s25_s15, 3  ;;  %p187_p2 = scmp.lt.s32.totalorder %s596_s14, 4 }
   0x5   : > { %s677_s15 = smov (%p26_p1, %s25_s15), 0  ;;  %p188_p3 = pnand %p492_p0, %p187_p2 }
   0x6   : > { %p229_p4 = scmp.lt.s32.totalorder (!%p188_p3), %s588_s12, 2  ;;  %s494_s16 = sshll.u32 (!%p188_p3), %s588_s12, 4 }
   0x7   : > { %191 = sbr.rel (%p188_p3) target bundleno = 282 (0x11a), region = 32  ;;  %p236_p5 = scmp.lt.s32.totalorder (!%p188_p3), %s494_s16, 47 }
   0x8   : > { %p496_p6 = scmp.ne.s32.totalorder (!%p188_p3), %s588_s12, 0 }
   0xe   : > { %s230_s17 = scalar_select %p229_p4, %s588_s12, 2 }
   0xf   : > { %s679_s16 = smov (!%p236_p5, %s494_s16), 47  ;;  %258 = sbr.rel (%p496_p6) target bundleno = 22 (0x16), region = 36 }
  0x10   : > { %s493_s18 = sshll.u32 %s230_s17, 2  ;;  %s495_s22 = sshll.u32 %s679_s16, 2  ;;  %v598_v0 = vmov (!%p496_p6), 0.0  }
  0x11   : > { %s647_s21 = scalar_lea.vmem %s670_s0, %s493_s18  ;;  %s242_s25 = scalar_lea.vmem %s671_s1, %s495_s22  ;;  %259 = vst [vmem:[#allocation2] sm:$0xff] (!%p496_p6), %v598_v0 }
  0x16 PF: > { %v566_v1 = vld [vmem:[%s242_s25] sm:$0xff]   ;;  %v599_v2 = vmov 0.0   ;;  %v567_v3 = vld [vmem:[%s242_s25 + $0x8] sm:$0xff]   ;;  %vm600_vm0 = vmmov 0   ;;  %v568_v4 = vld [vmem:[%s242_s25 + $0x10] sm:$0xff]   ;;  %p505_p7 = scmp.ne.s32.totalorder %s588_s12, 2 }
  0x17   : > { %519 = vmatprep.subr.bf16.mxu0 %v599_v2  ;;  %535 = vmatprep.mubr.msk.bf16.mxu0 %vm600_vm0, %v599_v2  ;;  %v569_v5 = vld [vmem:[%s242_s25 + $0x18] sm:$0xff]   ;;  %v570_v6 = vld [vmem:[%s242_s25 + $0x20] sm:$0xff]   ;;  %v571_v7 = vld [vmem:[%s242_s25 + $0x28] sm:$0xff]  }
  0x18   : > { %520 = vmatpush3.bf16.msra.mxu0 %v566_v1  ;;  %v572_v8 = vld [vmem:[%s242_s25 + $0x30] sm:$0xff]   ;;  %v573_v9 = vld [vmem:[%s242_s25 + $0x38] sm:$0xff]   ;;  %v261_v10 = vld [vmem:[%s647_s21] sm:$0xf] }
  0x19   : > { %521 = vmatprep.subr.bf16.mxu0 %v599_v2  ;;  %v260_v11 = vld [vmem:[#allocation2] sm:$0xff] }
  0x1a   : > { %v506_v18 = vld [vmem:[%s672_s2] ss:$0 sm:$0xff] (!%p505_p7) }
  0x1c   : > { %522 = vmatpush3.bf16.msra.mxu0 %v567_v3 }
  0x1d   : > { %523 = vmatprep.subr.bf16.mxu0 %v599_v2 }
  0x20   : > { %524 = vmatpush3.bf16.msra.mxu0 %v568_v4 }
  0x21   : > { %525 = vmatprep.subr.bf16.mxu0 %v599_v2 }
  0x24   : > { %526 = vmatpush3.bf16.msra.mxu0 %v569_v5 }
  0x25   : > { %527 = vmatprep.subr.bf16.mxu0 %v599_v2 }
  0x28   : > { %528 = vmatpush3.bf16.msra.mxu0 %v570_v6 }
  0x29   : > { %529 = vmatprep.subr.bf16.mxu0 %v599_v2 }
  0x2c   : > { %530 = vmatpush3.bf16.msra.mxu0 %v571_v7 }
  0x2d   : > { %531 = vmatprep.subr.bf16.mxu0 %v599_v2 }
  0x30   : > { %532 = vmatpush3.bf16.msra.mxu0 %v572_v8 }
  0x31   : > { %533 = vmatprep.subr.bf16.mxu0 %v599_v2 }
  0x34   : > { %534 = vmatpush3.bf16.msra.mxu0 %v573_v9 }
  0x37   : > { %536 = vmatmul.mubr.bf16.vlgmr.msra.gmra.mrb[0].mxu0 %v261_v10 }
 0x107   : > { %371 = sbr.rel (%p505_p7) target bundleno = 282 (0x11a), region = 40 }
 0x10a   : > { %v360_v12 = vpop.f32.mrb[0].mxu0 }
 0x10b   : > { %v366_v13 = vadd.f32 %v360_v12, %v260_v11  ;;  %v537_v14 = vpop.f32.mrb[1].mxu0 }
 0x10c   : > { %v363_v15 = vpop.f32.mrb[2].mxu0 }
 0x10d   : > { %367 = vst [vmem:[#allocation2] sm:$0xff] %v366_v13  ;;  %v538_v16 = vpop.f32.mrb[3].mxu0 }
 0x114   : > { %v372_v17 = vld [vmem:[#allocation2] sm:$0xff] }
 0x115   : > { %v380_v19 = vadd.f32 %v506_v18, %v372_v17 }
 0x117   : > { %v381_v20 = vmax.f32 %v380_v19, 0.0 }
 0x119   : > { %382 = vst [vmem:[%s673_s3] sm:$0xff] %v381_v20 }
 0x11a PF: > { %s13_s14 = sadd.s32 1, %s596_s14   ;;  %s674_s12 = smov %s592_s13 }
 0x11b   : > { %p10_p8 = scmp.ge.s32.totalorder %s13_s14, 5   ;;  %s675_s13 = smov %s677_s15 }
 0x11d   :  { %12 = sbr.rel (!%p10_p8) target bundleno = 2 (0x2), region = 76 }

// kernel: image_encoder_attnpool_forward.47
= control target key start
LH: loop header
LB: loop body
LE: loop exit
PB: predicated region body
PF: predicated region fallthrough
CT: control target
= control target key end

     0   :  { %v193_v0 = vmov 0.0   ;;  %vm194_vm0 = vmmov 0   ;;  %s248_s1 = inlined_call_operand.vmem [shape: bf16[128,128], index: 1, kind: input, shape index: {}]   ;;  %s249_s0 = inlined_call_operand.vmem [shape: bf16[8,128], index: 0, kind: input, shape index: {}]   ;;  %s250_s2 = inlined_call_operand.vmem [shape: f32[1,128], index: 2, kind: input, shape index: {}]   ;;  %s251_s3 = inlined_call_operand.vmem [shape: f32[8,128], index: 3, kind: output, shape index: {}]  }
   0x1   :  { %163 = vmatprep.subr.bf16.mxu0 %v193_v0  ;;  %v185_v1 = vld [vmem:[%s248_s1] sm:$0xff]   ;;  %179 = vmatprep.mubr.msk.bf16.mxu0 %vm194_vm0, %v193_v0  ;;  %v186_v2 = vld [vmem:[%s248_s1 + $0x8] sm:$0xff]   ;;  %v187_v3 = vld [vmem:[%s248_s1 + $0x10] sm:$0xff]  }
   0x2   :  { %164 = vmatpush3.bf16.msra.mxu0 %v185_v1  ;;  %v188_v4 = vld [vmem:[%s248_s1 + $0x18] sm:$0xff]   ;;  %v189_v5 = vld [vmem:[%s248_s1 + $0x20] sm:$0xff]   ;;  %v190_v6 = vld [vmem:[%s248_s1 + $0x28] sm:$0xff]  }
   0x3   :  { %165 = vmatprep.subr.bf16.mxu0 %v193_v0  ;;  %v191_v7 = vld [vmem:[%s248_s1 + $0x30] sm:$0xff]   ;;  %v192_v8 = vld [vmem:[%s248_s1 + $0x38] sm:$0xff]   ;;  %v21_v9 = vld [vmem:[%s249_s0] sm:$0xf] }
   0x4   :  { %v153_v10 = vld [vmem:[%s250_s2] ss:$0 sm:$0xff] }
   0x6   :  { %166 = vmatpush3.bf16.msra.mxu0 %v186_v2 }
   0x7   :  { %167 = vmatprep.subr.bf16.mxu0 %v193_v0 }
   0xa   :  { %168 = vmatpush3.bf16.msra.mxu0 %v187_v3 }
   0xb   :  { %169 = vmatprep.subr.bf16.mxu0 %v193_v0 }
   0xe   :  { %170 = vmatpush3.bf16.msra.mxu0 %v188_v4 }
   0xf   :  { %171 = vmatprep.subr.bf16.mxu0 %v193_v0 }
  0x12   :  { %172 = vmatpush3.bf16.msra.mxu0 %v189_v5 }
  0x13   :  { %173 = vmatprep.subr.bf16.mxu0 %v193_v0 }
  0x16   :  { %174 = vmatpush3.bf16.msra.mxu0 %v190_v6 }
  0x17   :  { %175 = vmatprep.subr.bf16.mxu0 %v193_v0 }
  0x1a   :  { %176 = vmatpush3.bf16.msra.mxu0 %v191_v7 }
  0x1b   :  { %177 = vmatprep.subr.bf16.mxu0 %v193_v0 }
  0x1e   :  { %178 = vmatpush3.bf16.msra.mxu0 %v192_v8 }
  0x21   :  { %180 = vmatmul.mubr.bf16.vlgmr.msra.gmra.mrb[0].mxu0 %v21_v9 }
  0xf4   :  { %v120_v11 = vpop.f32.mrb[0].mxu0 }
  0xf5   :  { %v139_v12 = vadd.f32 %v153_v10, %v120_v11  ;;  %v181_v13 = vpop.f32.mrb[1].mxu0 }
  0xf6   :  { %v123_v14 = vpop.f32.mrb[2].mxu0 }
  0xf7   :  { %140 = vst [vmem:[%s251_s3] sm:$0xff] %v139_v12  ;;  %v182_v15 = vpop.f32.mrb[3].mxu0 }

// kernel: image_encoder_attnpool_forward.49
= control target key start
LH: loop header
LB: loop body
LE: loop exit
PB: predicated region body
PF: predicated region fallthrough
CT: control target
= control target key end

     0   :  { %s44_s0 = inlined_call_operand.vmem [shape: f32[1,1024], index: 0, kind: input, shape index: {}]   ;;  %s45_s1 = inlined_call_operand.vmem [shape: f32[1,1024], index: 1, kind: input, shape index: {}]   ;;  %s46_s2 = inlined_call_operand.vmem [shape: f32[1,1024], index: 2, kind: output, shape index: {}]  }
   0x1   :  { %v11_v0 = vld [vmem:[%s44_s0] sm:$0xff] }
   0x2   :  { %v12_v1 = vld [vmem:[%s45_s1] sm:$0xff] }
   0x3   :  { %v13_v2 = vadd.f32 %v12_v1, %v11_v0 }
   0x5   :  { %v14_v3 = vmax.f32 %v13_v2, 0.0 }
   0x7   :  { %15 = vst [vmem:[%s46_s2] sm:$0xff] %v14_v3 }

// kernel: image_encoder_attnpool_forward.51
= control target key start
LH: loop header
LB: loop body
LE: loop exit
PB: predicated region body
PF: predicated region fallthrough
CT: control target
= control target key end

     0   :  { %v210_v0 = vmov 0.0   ;;  %vm211_vm0 = vmmov 0   ;;  %s268_s1 = inlined_call_operand.vmem [shape: bf16[128,128], index: 1, kind: input, shape index: {}]   ;;  %s269_s0 = inlined_call_operand.vmem [shape: bf16[16,128], index: 0, kind: input, shape index: {}]   ;;  %s270_s2 = inlined_call_operand.vmem [shape: f32[1,128], index: 2, kind: input, shape index: {}]   ;;  %s271_s3 = inlined_call_operand.vmem [shape: f32[16,128], index: 3, kind: output, shape index: {}]  }
   0x1   :  { %179 = vmatprep.subr.bf16.mxu0 %v210_v0  ;;  %v201_v1 = vld [vmem:[%s268_s1] sm:$0xff]   ;;  %195 = vmatprep.mubr.msk.bf16.mxu0 %vm211_vm0, %v210_v0  ;;  %v202_v2 = vld [vmem:[%s268_s1 + $0x8] sm:$0xff]   ;;  %v203_v3 = vld [vmem:[%s268_s1 + $0x10] sm:$0xff]  }
   0x2   :  { %180 = vmatpush3.bf16.msra.mxu0 %v201_v1  ;;  %v204_v4 = vld [vmem:[%s268_s1 + $0x18] sm:$0xff]   ;;  %v205_v5 = vld [vmem:[%s268_s1 + $0x20] sm:$0xff]   ;;  %v206_v6 = vld [vmem:[%s268_s1 + $0x28] sm:$0xff]  }
   0x3   :  { %181 = vmatprep.subr.bf16.mxu0 %v210_v0  ;;  %v207_v7 = vld [vmem:[%s268_s1 + $0x30] sm:$0xff]   ;;  %v208_v8 = vld [vmem:[%s268_s1 + $0x38] sm:$0xff]   ;;  %v209_v9 = vld [vmem:[%s269_s0] sm:$0xff]  }
   0x4   :  { %v169_v10 = vld [vmem:[%s270_s2] ss:$0 sm:$0xff] }
   0x6   :  { %182 = vmatpush3.bf16.msra.mxu0 %v202_v2 }
   0x7   :  { %183 = vmatprep.subr.bf16.mxu0 %v210_v0 }
   0xa   :  { %184 = vmatpush3.bf16.msra.mxu0 %v203_v3 }
   0xb   :  { %185 = vmatprep.subr.bf16.mxu0 %v210_v0 }
   0xe   :  { %186 = vmatpush3.bf16.msra.mxu0 %v204_v4 }
   0xf   :  { %187 = vmatprep.subr.bf16.mxu0 %v210_v0 }
  0x12   :  { %188 = vmatpush3.bf16.msra.mxu0 %v205_v5 }
  0x13   :  { %189 = vmatprep.subr.bf16.mxu0 %v210_v0 }
  0x16   :  { %190 = vmatpush3.bf16.msra.mxu0 %v206_v6 }
  0x17   :  { %191 = vmatprep.subr.bf16.mxu0 %v210_v0 }
  0x1a   :  { %192 = vmatpush3.bf16.msra.mxu0 %v207_v7 }
  0x1b   :  { %193 = vmatprep.subr.bf16.mxu0 %v210_v0 }
  0x1e   :  { %194 = vmatpush3.bf16.msra.mxu0 %v208_v8 }
  0x21   :  { %196 = vmatmul.mubr.bf16.vlgmr.msra.gmra.mrb[0].mxu0 %v209_v9 }
  0xf4   :  { %v129_v11 = vpop.f32.mrb[0].mxu0 }
  0xf5   :  { %v152_v12 = vadd.f32 %v169_v10, %v129_v11  ;;  %v197_v13 = vpop.f32.mrb[1].mxu0 }
  0xf6   :  { %v132_v14 = vpop.f32.mrb[2].mxu0 }
  0xf7   :  { %154 = vst [vmem:[%s271_s3] sm:$0xff] %v152_v12  ;;  %v153_v15 = vadd.f32 %v169_v10, %v132_v14  ;;  %v198_v16 = vpop.f32.mrb[3].mxu0 }
  0xf9   :  { %155 = vst [vmem:[%s271_s3 + $0x8] sm:$0xff] %v153_v15 }

// kernel: image_encoder_attnpool_forward.53
= control target key start
LH: loop header
LB: loop body
LE: loop exit
PB: predicated region body
PF: predicated region fallthrough
CT: control target
= control target key end

     0   :  { %s873_s12 = smov 0   ;;  %s956_s0 = inlined_call_operand.vmem [shape: bf16[2,4,1,32], index: 0, kind: input, shape index: {}]   ;;  %s957_s1 = inlined_call_operand.vmem [shape: bf16[2,4,5,32], index: 1, kind: input, shape index: {}]   ;;  %s958_s2 = inlined_call_operand.vmem [shape: bf16[2,4,5,32], index: 2, kind: input, shape index: {}]   ;;  %s959_s3 = inlined_call_operand.vmem [shape: f32[2,4,1,32], index: 3, kind: output, shape index: {}]  }
   0x1 LB: > { %s728_s13 = sadd.s32 4294967295, %s848_s12   ;;  %p732_p0 = scmp.ge.s32.totalorder %s848_s12, 1  ;;  %s848_s12 = sphi %s873_s12, %s13_s12  }
   0x2   : > { %p156_p1 = scmp.lt.s32.totalorder %s848_s12, 3 }
   0x4   : > { %p157_p2 = pnand %p732_p0, %p156_p1 }
   0x5   : > { %p188_p3 = scmp.lt.s32.totalorder (!%p157_p2), %s728_s13, 1  ;;  %v850_v0 = vmov (!%p157_p2), 0.0   ;;  %vm851_vm0 = vmmov (!%p157_p2), 0   ;;  %vm219_vm1 = vcmask (!%p157_p2), 261120   ;;  %vm408_vm2 = vcmask (!%p157_p2), 32768  }
   0x6   : > { %160 = sbr.rel (%p157_p2) target bundleno = 782 (0x30e), region = 32  ;;  %767 = vmatprep.subr.bf16.mxu0 (!%p157_p2), %v850_v0  ;;  %773 = vmatprep.subr.bf16.mxu1 (!%p157_p2), %v850_v0  ;;  %vm461_vm3 = vcmask (!%p157_p2), 1041408   ;;  %vm462_vm4 = vcmask (!%p157_p2), 1042432   ;;  %v852_v57 = vmov (!%p157_p2), 65535   ;;  %vm457_vm5 = vcmask (!%p157_p2), 39936  }
   0x7   : > { %769 = vmatprep.mubr.msk.bf16.mxu0 (!%p157_p2), %vm851_vm0, %v850_v0  ;;  %775 = vmatprep.mubr.msk.bf16.mxu1 (!%p157_p2), %vm851_vm0, %v850_v0  ;;  %v463_v58 = vsel (!%p157_p2), %vm461_vm3, 4294967295, %v852_v57  ;;  %vm646_vm6 = vcmask (!%p157_p2), 253952  }
   0x8   : > { %v464_v60 = vsel (!%p157_p2), %vm462_vm4, %v463_v58, 0 }
   0xd   : > { %s961_s13 = smov (!%p188_p3, %s728_s13), 1 }
   0xe   : > { %s749_s14 = sshll.u32 %s961_s13, 4  ;;  %s733_s18 = sshll.u32 %s961_s13, 2 }
   0xf   : > { %s196_s17 = scalar_lea.vmem %s957_s1, %s749_s14  ;;  %s191_s21 = scalar_lea.vmem %s956_s0, %s733_s18 }
  0x10   : > { %v211_v1 = vld [vmem:[%s196_s17] sm:$0x7]  ;;  %v212_v2 = vld [vmem:[%s196_s17 + $0x4] sm:$0x7]  ;;  %v213_v5 = vld [vmem:[%s196_s17 + $0x8] sm:$0x7]  ;;  %s201_s24 = scalar_lea.vmem %s958_s2, %s749_s14  ;;  %s205_s27 = scalar_lea.vmem %s959_s3, %s733_s18 }
  0x11   : > { %v224_v3 = vsel %vm219_vm1, %v211_v1, 0  ;;  %v270_v4 = vsel %vm219_vm1, %v212_v2, 0  ;;  %v214_v6 = vld [vmem:[%s196_s17 + $0xc] sm:$0x7]  ;;  %v207_v7 = vld [vmem:[%s191_s21] sm:$0x1] }
  0x12   : > { %768 = vmatpush3.bf16.xpose.msra.mxu0 %v224_v3  ;;  %774 = vmatpush3.bf16.xpose.msra.mxu1 %v270_v4  ;;  %v208_v8 = vld [vmem:[%s191_s21 + $0x1] sm:$0x1]  ;;  %v316_v9 = vsel %vm219_vm1, %v213_v5, 0  ;;  %v362_v10 = vsel %vm219_vm1, %v214_v6, 0  ;;  %v209_v11 = vld [vmem:[%s191_s21 + $0x2] sm:$0x1] }
  0x13   : > { %779 = vmatprep.subr.bf16.mxu0 %v850_v0  ;;  %785 = vmatprep.subr.bf16.mxu1 %v850_v0  ;;  %v210_v12 = vld [vmem:[%s191_s21 + $0x3] sm:$0x1]  ;;  %v215_v59 = vld [vmem:[%s201_s24] sm:$0x7]  ;;  %v216_v62 = vld [vmem:[%s201_s24 + $0x4] sm:$0x7] }
  0x14   : > { %v466_v61 = vand.u32 %v464_v60, %v215_v59  ;;  %v512_v63 = vand.u32 %v464_v60, %v216_v62  ;;  %v217_v1 = vld [vmem:[%s201_s24 + $0x8] sm:$0x7]  ;;  %v218_v3 = vld [vmem:[%s201_s24 + $0xc] sm:$0x7] }
  0x15   : > { %v558_v2 = vand.u32 %v464_v60, %v217_v1  ;;  %v604_v4 = vand.u32 %v464_v60, %v218_v3 }
  0x19   : > { %770 = vmatmul.mubr.msk.bf16.vlgmr.msra.gmra.mrb[0].mxu0 %vm219_vm1, %v207_v7  ;;  %776 = vmatmul.mubr.msk.bf16.vlgmr.msra.gmra.mrb[0].mxu1 %vm219_vm1, %v208_v8 }
  0x1a   : > { %780 = vmatpush3.bf16.xpose.msra.mxu0 %v316_v9  ;;  %786 = vmatpush3.bf16.xpose.msra.mxu1 %v362_v10 }
  0x1b   : > { %781 = vmatprep.mubr.msk.bf16.mxu0 %vm851_vm0, %v850_v0  ;;  %787 = vmatprep.mubr.msk.bf16.mxu1 %vm851_vm0, %v850_v0 }
  0x1c   : > { %791 = vmatprep.subr.bf16.mxu0 %v850_v0  ;;  %797 = vmatprep.subr.bf16.mxu1 %v850_v0 }
  0x21   : > { %782 = vmatmul.mubr.msk.bf16.vlgmr.msra.gmra.mrb[4].mxu0 %vm219_vm1, %v209_v11  ;;  %788 = vmatmul.mubr.msk.bf16.vlgmr.msra.gmra.mrb[4].mxu1 %vm219_vm1, %v210_v12 }
  0x22   : > { %793 = vmatprep.mubr.msk.bf16.mxu0 %vm851_vm0, %v850_v0  ;;  %799 = vmatprep.mubr.msk.bf16.mxu1 %vm851_vm0, %v850_v0 }
  0x23   : > { %792 = vmatpush3.bf16.msra.mxu0 %v466_v61  ;;  %798 = vmatpush3.bf16.msra.mxu1 %v512_v63 }
  0x24   : > { %803 = vmatprep.subr.bf16.mxu0 %v850_v0  ;;  %809 = vmatprep.subr.bf16.mxu1 %v850_v0 }
  0xec   : > { %v260_v13 = vpop.f32.mrb[0].mxu0  ;;  %v306_v14 = vpop.f32.mrb[0].mxu1 }
  0xed   : > { %v404_v15 = vmul.f32 0.17677669, %v260_v13  ;;  %v771_v16 = vpop.f32.mrb[1].mxu0  ;;  %v405_v17 = vmul.f32 0.17677669, %v306_v14  ;;  %v777_v18 = vpop.f32.mrb[1].mxu1 }
  0xee   : > { %v263_v19 = vpop.f32.mrb[2].mxu0  ;;  %v309_v20 = vpop.f32.mrb[2].mxu1 }
  0xef   : > { %v772_v21 = vpop.f32.mrb[3].mxu0  ;;  %v409_v22 = vsel %vm408_vm2, %v404_v15, -inf  ;;  %v778_v23 = vpop.f32.mrb[3].mxu1  ;;  %v412_v24 = vsel %vm408_vm2, %v405_v17, -inf }
  0xf0   : > { %410 = vmax.xlane.f32.xlu0 %v409_v22 }
  0xf4   : > { %413 = vmax.xlane.f32.xlu0 %v412_v24  ;;  %v352_v25 = vpop.f32.mrb[4].mxu0  ;;  %v398_v26 = vpop.f32.mrb[4].mxu1 }
  0xf5   : > { %v406_v27 = vmul.f32 0.17677669, %v352_v25  ;;  %v783_v28 = vpop.f32.mrb[5].mxu0  ;;  %v407_v29 = vmul.f32 0.17677669, %v398_v26  ;;  %v789_v30 = vpop.f32.mrb[5].mxu1 }
  0xf6   : > { %v355_v31 = vpop.f32.mrb[6].mxu0  ;;  %v401_v32 = vpop.f32.mrb[6].mxu1 }
  0xf7   : > { %v784_v33 = vpop.f32.mrb[7].mxu0  ;;  %v415_v34 = vsel %vm408_vm2, %v406_v27, -inf  ;;  %v790_v35 = vpop.f32.mrb[7].mxu1  ;;  %v418_v36 = vsel %vm408_vm2, %v407_v29, -inf }
  0xf8   : > { %416 = vmax.xlane.f32.xlu1 %v415_v34 }
  0xfc   : > { %419 = vmax.xlane.f32.xlu1 %v418_v36 }
 0x17d   : > { %v411_v37 = vpop.xlane.xlu0 %410 }
 0x17e   : > { %v421_v38 = vsub.f32 %v404_v15, %v411_v37 }
 0x180   : > { %v425_v39 = vmul.f32 1.442695, %v421_v38 }
 0x181   : > { %v414_v40 = vpop.xlane.xlu0 %413 }
 0x182   : > { %826 = vpow2.f32 %v425_v39  ;;  %v422_v41 = vsub.f32 %v405_v17, %v414_v40 }
 0x184   : > { %v427_v42 = vmul.f32 1.442695, %v422_v41 }
 0x185   : > { %v417_v43 = vpop.xlane.xlu1 %416 }
 0x186   : > { %828 = vpow2.f32 %v427_v42  ;;  %v423_v44 = vsub.f32 %v406_v27, %v417_v43 }
 0x188   : > { %v429_v45 = vmul.f32 1.442695, %v423_v44 }
 0x189   : > { %v420_v46 = vpop.xlane.xlu1 %419 }
 0x18a   : > { %830 = vpow2.f32 %v429_v45  ;;  %v424_v47 = vsub.f32 %v407_v29, %v420_v46 }
 0x18c   : > { %v827_v48 = vpop.eup %826  ;;  %v431_v49 = vmul.f32 1.442695, %v424_v47 }
 0x18d   : > { %v433_v50 = vsel %vm408_vm2, %v827_v48, 0.0 }
 0x18e   : > { %832 = vpow2.f32 %v431_v49  ;;  %434 = vadd.xlane.f32.xlu0 %v433_v50 }
 0x190   : > { %v829_v51 = vpop.eup %828 }
 0x191   : > { %v436_v52 = vsel %vm408_vm2, %v829_v51, 0.0 }
 0x192   : > { %437 = vadd.xlane.f32.xlu1 %v436_v52 }
 0x194   : > { %v831_v53 = vpop.eup %830 }
 0x195   : > { %v439_v54 = vsel %vm408_vm2, %v831_v53, 0.0 }
 0x196   : > { %440 = vadd.xlane.f32.xlu0 %v439_v54 }
 0x198   : > { %v833_v55 = vpop.eup %832 }
 0x199   : > { %v442_v56 = vsel %vm408_vm2, %v833_v55, 0.0 }
 0x19a   : > { %443 = vadd.xlane.f32.xlu1 %v442_v56 }
 0x21b   : > { %v435_v5 = vpop.xlane.xlu0 %434 }
 0x21c   : > { %834 = vrcp.f32 %v435_v5 }
 0x21f   : > { %v438_v6 = vpop.xlane.xlu1 %437 }
 0x220   : > { %836 = vrcp.f32 %v438_v6 }
 0x223   : > { %v441_v7 = vpop.xlane.xlu0 %440 }
 0x224   : > { %838 = vrcp.f32 %v441_v7 }
 0x226   : > { %v835_v8 = vpop.eup %834 }
 0x227   : > { %v449_v9 = vmul.f32 %v835_v8, %v827_v48  ;;  %v444_v10 = vpop.xlane.xlu1 %443 }
 0x228   : > { %840 = vrcp.f32 %v444_v10 }
 0x229   : > { %v453_v11 = vpack.c.bf16 %v449_v9, %v449_v9 }
 0x22a   : > { %v837_v12 = vpop.eup %836 }
 0x22b   : > { %v450_v13 = vmul.f32 %v837_v12, %v829_v51  ;;  %794 = vmatmul.mubr.msk.bf16.vlgmr.msra.gmra.mrb[8].mxu0 %vm457_vm5, %v453_v11 }
 0x22c   : > { %804 = vmatpush3.bf16.msra.mxu0 %v558_v2  ;;  %805 = vmatprep.mubr.msk.bf16.mxu0 %vm851_vm0, %v850_v0 }
 0x22d   : > { %v454_v14 = vpack.c.bf16 %v450_v13, %v450_v13 }
 0x22e   : > { %v839_v15 = vpop.eup %838 }
 0x22f   : > { %v451_v16 = vmul.f32 %v839_v15, %v831_v53  ;;  %800 = vmatmul.mubr.msk.bf16.vlgmr.msra.gmra.mrb[8].mxu1 %vm457_vm5, %v454_v14 }
 0x230   : > { %810 = vmatpush3.bf16.msra.mxu1 %v604_v4  ;;  %811 = vmatprep.mubr.msk.bf16.mxu1 %vm851_vm0, %v850_v0 }
 0x231   : > { %v455_v17 = vpack.c.bf16 %v451_v16, %v451_v16 }
 0x232   : > { %v841_v18 = vpop.eup %840 }
 0x233   : > { %v452_v19 = vmul.f32 %v841_v18, %v833_v55  ;;  %806 = vmatmul.mubr.msk.bf16.vlgmr.msra.gmra.mrb[12].mxu0 %vm457_vm5, %v455_v17 }
 0x235   : > { %v456_v20 = vpack.c.bf16 %v452_v19, %v452_v19 }
 0x237   : > { %812 = vmatmul.mubr.msk.bf16.vlgmr.msra.gmra.mrb[12].mxu1 %vm457_vm5, %v456_v20 }
 0x2fe   : > { %v502_v21 = vpop.f32.mrb[8].mxu0 }
 0x2ff   : > { %647 = vst.msk [vmem:[%s205_s27] sm:$0x1] %vm646_vm6, %v502_v21  ;;  %v795_v22 = vpop.f32.mrb[9].mxu0 }
 0x300   : > { %v505_v23 = vpop.f32.mrb[10].mxu0 }
 0x301   : > { %v796_v0 = vpop.f32.mrb[11].mxu0 }
 0x302   : > { %v548_v24 = vpop.f32.mrb[8].mxu1 }
 0x303   : > { %648 = vst.msk [vmem:[%s205_s27 + $0x1] sm:$0x1] %vm646_vm6, %v548_v24  ;;  %v801_v25 = vpop.f32.mrb[9].mxu1 }
 0x304   : > { %v551_v26 = vpop.f32.mrb[10].mxu1 }
 0x305   : > { %v802_v27 = vpop.f32.mrb[11].mxu1 }
 0x306   : > { %v594_v28 = vpop.f32.mrb[12].mxu0 }
 0x307   : > { %649 = vst.msk [vmem:[%s205_s27 + $0x2] sm:$0x1] %vm646_vm6, %v594_v28  ;;  %v807_v29 = vpop.f32.mrb[13].mxu0 }
 0x308   : > { %v597_v30 = vpop.f32.mrb[14].mxu0 }
 0x309   : > { %v808_v31 = vpop.f32.mrb[15].mxu0 }
 0x30a   : > { %v640_v32 = vpop.f32.mrb[12].mxu1 }
 0x30b   : > { %650 = vst.msk [vmem:[%s205_s27 + $0x3] sm:$0x1] %vm646_vm6, %v640_v32  ;;  %v813_v33 = vpop.f32.mrb[13].mxu1 }
 0x30c   : > { %v643_v34 = vpop.f32.mrb[14].mxu1 }
 0x30d   : > { %v814_v35 = vpop.f32.mrb[15].mxu1 }
 0x30e PF: > { %s13_s12 = sadd.s32 1, %s848_s12  }
 0x30f   : > { %p10_p4 = scmp.ge.s32.totalorder %s13_s12, 4  }
 0x311   :  { %12 = sbr.rel (!%p10_p4) target bundleno = 1 (0x1), region = 68 }

// kernel: image_encoder_attnpool_forward.55
= control target key start
LH: loop header
LB: loop body
LE: loop exit
PB: predicated region body
PF: predicated region fallthrough
CT: control target
= control target key end

     0   :  { %vm11_vm0 = vcmask 254976   ;;  %s86_s0 = inlined_call_operand.vmem [shape: f32[2,32], index: 0, kind: input, shape index: {}]   ;;  %s87_s1 = inlined_call_operand.hbm [shape: f32[2,32], index: 1, kind: output, shape index: {}]  }
   0x1   :  { %v9_v0 = vld [vmem:[%s86_s0] sm:$0x3] }
   0x2   :  { %6 = vsyncpa [#allocation3], 0  ;;  %v10_v1 = vmul.f32 %v9_v0, %v9_v0  ;;  %s60_s8 = smov [#allocation2]  }
   0x3   :  { %s25_s9 = sshll.u32 %s60_s8, 4  ;;  %s26_s9 = int_to_ptr.vmem [resolvable:$true] %s25_s9 }
   0x4   :  { %v12_v2 = vsel %vm11_vm0, %v10_v1, 0.0  ;;  %s36_s10 = scalar_lea.vmem %s26_s9, 32  ;;  %p41_p1 = scmp.lt.s32.totalorder %s26_s9, %s26_s9 }
   0x5   :  { %13 = vadd.xlane.f32.xlu0 %v12_v2  ;;  %p37_p0 = scmp.ne.s32.totalorder %s26_s9, %s36_s10  ;;  %p42_p2 = scmp.lt.s32.totalorder %s36_s10, %s36_s10 }
   0x7   :  { %p43_p3 = por %p42_p2, %p41_p1 }
   0x9   :  { %p44_p4 = pnand %p43_p3, %p37_p0 }
  0x92   :  { %v14_v3 = vpop.xlane.xlu0 %13 }
  0x93   :  { %v15_v4 = vadd.f32 1e-12, %v14_v3 }
  0x95   :  { %34 = vrsqrt.f32 %v15_v4 }
  0x9f   :  { %v35_v5 = vpop.eup %34 }
  0xa0   :  { %v17_v6 = vmul.f32 %v35_v5, %v9_v0 }
  0xa2   :  { %18 = vst.msk [vmem:[#allocation2] sm:$0x3] %vm11_vm0, %v17_v6 }
  0xa3   :  { %47 = shalt.err (!%p44_p4)
}
  0xa4   :  { %s48_s12 = scalar_lea.hbm %s87_s1, 32 }
  0xa5   :  { %p49_p5 = scmp.ne.s32.totalorder %s87_s1, %s48_s12  ;;  %p52_p6 = scmp.lt.u32.totalorder %s48_s12, %s87_s1 }
  0xa7   :  { %p54_p7 = pnand %p52_p6, %p49_p5 }
  0xa9   :  { %57 = shalt.err (!%p54_p7)
}
  0xaa   :  { %28 = dma.vmem_to_hbm [thread:$0]  %s26_s9, 32, %s87_s1, [#allocation3]  }
  0xab   :  { %58 = dma.done.wait [#allocation3], 32  }
  0xac   :  { %59 = vsyncadd [#allocation3], 4294967264 }
  0xad   :  { %32 = vsyncpa [#allocation3], 1 }

</bundles_post_ra>
